<compile_context>
chip_gen: v5e
topology: v5e:2x2
jax: 0.10.0
libtpu: 0.0.40
codegen_flags: <defaults>
</compile_context>

<pallas_src>
import jax
import jax.numpy as jnp
from jax import lax
from jax.experimental import pallas as pl
from jax.experimental.pallas import tpu as pltpu

# Encoder conv configs: (Cin, Cout, (KH, KW), (sH, sW), (pH, pW))
_LAYERS = [
    (3, 16, (5, 5), (2, 2), (2, 2)),
    (16, 32, (3, 3), (2, 2), (1, 1)),
    (32, 48, (4, 3), (2, 1), (1, 1)),
    (48, 64, (8, 3), (4, 1), (2, 1)),
    (64, 64, (7, 3), (1, 1), (0, 1)),
]


def _gemm_bias_relu_kernel(w_ref, p_ref, b_ref, o_ref):
    # w_ref: (Cout, K), p_ref: (K, TM), b_ref: (Cout, 1), o_ref: (Cout, TM)
    acc = jnp.dot(w_ref[...], p_ref[...], preferred_element_type=jnp.float32)
    acc = acc + b_ref[...]                 # bias broadcast over the lane (M) axis
    o_ref[...] = jnp.maximum(acc, 0.0).astype(o_ref.dtype)


def _pick_tm(m):
    """Lane-tile size: full block if small, else ~2 tiles (multiple of 128)."""
    if m <= 128:
        return m
    lane_tiles = (m + 127) // 128
    return 128 * ((lane_tiles + 1) // 2)


def _matmul_bias_relu_t(w_t, p_t, bias):
    """ReLU(w_t @ p_t + bias[:, None]) -> (Cout, M), lane-dense output."""
    cout, k = w_t.shape
    m = p_t.shape[1]
    tm = _pick_tm(m)
    grid_m = pl.cdiv(m, tm)
    cost = pl.CostEstimate(
        flops=2 * m * k * cout,
        transcendentals=0,
        bytes_accessed=4 * (k * m + cout * k + cout * m + cout),
    )
    return pl.pallas_call(
        _gemm_bias_relu_kernel,
        out_shape=jax.ShapeDtypeStruct((cout, m), jnp.float32),
        grid=(grid_m,),
        in_specs=[
            pl.BlockSpec((cout, k), lambda i: (0, 0)),   # weights: resident
            pl.BlockSpec((k, tm), lambda i: (0, i)),     # patches^T: lane-tiled
            pl.BlockSpec((cout, 1), lambda i: (0, 0)),   # bias
        ],
        out_specs=pl.BlockSpec((cout, tm), lambda i: (0, i)),
        compiler_params=pltpu.CompilerParams(
            dimension_semantics=("parallel",)),
        cost_estimate=cost,
    )(w_t, p_t, bias.reshape(cout, 1))


def _im2col_t(x_cnhw, ksize, stride, pad):
    """(Cin, N, H, W) -> transposed im2col matrix (KH*KW*Cin, N*Ho*Wo)."""
    cin, n, h, w = x_cnhw.shape
    kh_sz, kw_sz = ksize
    sh, sw = stride
    ph, pw = pad
    ho = (h + 2 * ph - kh_sz) // sh + 1
    wo = (w + 2 * pw - kw_sz) // sw + 1
    xp = jnp.pad(x_cnhw, ((0, 0), (0, 0), (ph, ph), (pw, pw)))
    taps = []
    for kh in range(kh_sz):
        for kw in range(kw_sz):
            taps.append(lax.slice(
                xp,
                (0, 0, kh, kw),
                (cin, n, kh + sh * (ho - 1) + 1, kw + sw * (wo - 1) + 1),
                (1, 1, sh, sw)))
    patches = jnp.stack(taps, axis=0)          # (KH*KW, Cin, N, Ho, Wo)
    return patches.reshape(kh_sz * kw_sz * cin, n * ho * wo), ho, wo


def _conv2d_relu_t(x_cnhw, w_oihw, bias, ksize, stride, pad):
    """PyTorch Conv2d + ReLU; channels-outermost in/out: (Cin,N,H,W)->(Cout,N,Ho,Wo)."""
    cin, n = x_cnhw.shape[:2]
    cout = w_oihw.shape[0]
    kh, kw = ksize
    p_t, ho, wo = _im2col_t(x_cnhw, ksize, stride, pad)
    # (Cout, Cin, KH, KW) -> (Cout, KH, KW, Cin) -> (Cout, K); K index order
    # (kh*KW + kw)*Cin + cin matches the im2col stacking order above.
    w_t = jnp.transpose(w_oihw, (0, 2, 3, 1)).reshape(cout, kh * kw * cin)
    out_t = _matmul_bias_relu_t(w_t, p_t, bias)   # (Cout, N*Ho*Wo)
    return out_t.reshape(cout, n, ho, wo)


def init_encoder_params(key):
    """Deterministic init mimicking PyTorch's default Conv2d uniform init."""
    params = []
    for (cin, cout, (kh, kw), _, _) in _LAYERS:
        key, wkey, bkey = jax.random.split(key, 3)
        fan_in = cin * kh * kw
        bound = 1.0 / (fan_in ** 0.5)
        w = jax.random.uniform(wkey, (cout, cin, kh, kw), jnp.float32,
                               -bound, bound)
        b = jax.random.uniform(bkey, (cout,), jnp.float32, -bound, bound)
        params.append((w, b))
    return params


def encoder_forward(x_nchw, params):
    # NCHW in/out (PyTorch convention); (C, N, H, W) internally so every
    # layer's lane-dense GEMM output is already in the layout the next layer's
    # im2col consumes (no per-layer transposes).
    x = jnp.transpose(x_nchw, (1, 0, 2, 3))
    for (w, b), (_, _, ksize, stride, pad) in zip(params, _LAYERS):
        x = _conv2d_relu_t(x, w, b, ksize, stride, pad)
    return jnp.transpose(x, (1, 0, 2, 3))


def encoder_reference(x_nchw, params):
    """Plain-JAX reference (lax.conv) for correctness checking."""
    x = x_nchw
    for (w, b), (_, _, _, stride, pad) in zip(params, _LAYERS):
        x = lax.conv_general_dilated(
            x, w, window_strides=stride,
            padding=[(pad[0], pad[0]), (pad[1], pad[1])],
            dimension_numbers=("NCHW", "OIHW", "NCHW"))
        x = jnp.maximum(x + b[None, :, None, None], 0.0)
    return x


if __name__ == "__main__":
    key = jax.random.PRNGKey(0)
    pkey, xkey = jax.random.split(key)
    params = init_encoder_params(pkey)
    # H must be >= 221 for the (7,3) kernel of the last layer to be valid
    # (total height downsampling 2*2*2*4 = 32, then kernel height 7, pad 0).
    x = jax.random.normal(xkey, (2, 3, 224, 16), jnp.float32)

    out = jax.jit(encoder_forward)(x, params)
    out = jax.block_until_ready(out)

    ref = encoder_reference(x, params)
    assert out.shape == (2, 64, 1, 4), out.shape
    max_err = float(jnp.max(jnp.abs(out - ref)))
    assert jnp.allclose(out, ref, atol=1e-4, rtol=1e-4), max_err
    print("KERNEL_OK")
</pallas_src>

<mosaic_0001>
module attributes {stable_mosaic.version = 11 : i64} {
  func.func @_gemm_bias_relu_kernel(%arg0: i32, %arg1: memref<16x75xf32, #tpu.memory_space<vmem>>, %arg2: memref<75x896xf32, #tpu.memory_space<vmem>>, %arg3: memref<16x1xf32, #tpu.memory_space<vmem>>, %arg4: memref<16x896xf32, #tpu.memory_space<vmem>>) attributes {dimension_semantics = [#tpu.dimension_semantics<parallel>], iteration_bounds = array<i64: 2>, scalar_prefetch = 0 : i64, scratch_operands = 0 : i64, tpu.core_type = #tpu.core_type<tc>, window_params = [{pipeline_mode = #tpu.pipeline_mode<synchronous>, transform_indices = @transform_0, window_bounds = array<i64: 16, 75>}, {transform_indices = @transform_1, window_bounds = array<i64: 75, 896>}, {pipeline_mode = #tpu.pipeline_mode<synchronous>, transform_indices = @transform_2, window_bounds = array<i64: 16, 1>}, {transform_indices = @transform_3, window_bounds = array<i64: 16, 896>}]} {
    %c0 = arith.constant 0 : index
    %c0_0 = arith.constant 0 : index
    %0 = vector.load %arg1[%c0, %c0_0] : memref<16x75xf32, #tpu.memory_space<vmem>>, vector<16x75xf32>
    %c0_1 = arith.constant 0 : index
    %c0_2 = arith.constant 0 : index
    %1 = vector.load %arg2[%c0_1, %c0_2] : memref<75x896xf32, #tpu.memory_space<vmem>>, vector<75x896xf32>
    %cst = arith.constant dense<0.000000e+00> : vector<16x896xf32>
    %2 = tpu.matmul %0, %1, %cst {dimension_numbers = #tpu.dot_dimension_numbers<[1], [0], [0], [1], [0, 0, 1, 1], [], []>} : vector<16x75xf32>, vector<75x896xf32>, vector<16x896xf32> -> vector<16x896xf32>
    %c0_3 = arith.constant 0 : index
    %c0_4 = arith.constant 0 : index
    %3 = vector.load %arg3[%c0_3, %c0_4] : memref<16x1xf32, #tpu.memory_space<vmem>>, vector<16x1xf32>
    %4 = vector.broadcast %3 : vector<16x1xf32> to vector<16x896xf32>
    %5 = arith.addf %2, %4 : vector<16x896xf32>
    %cst_5 = arith.constant 0.000000e+00 : f32
    %6 = vector.broadcast %cst_5 : f32 to vector<16x896xf32>
    %7 = arith.maximumf %5, %6 : vector<16x896xf32>
    %c0_6 = arith.constant 0 : index
    %c0_7 = arith.constant 0 : index
    %8 = vector.load %arg4[%c0_6, %c0_7] : memref<16x896xf32, #tpu.memory_space<vmem>>, vector<16x896xf32>
    tpu.vector_store %arg4[%c0_6, %c0_7], %7 {strides = array<i32>} : memref<16x896xf32, #tpu.memory_space<vmem>>, vector<16x896xf32>,
    return
  }
  func.func @transform_0(%arg0: i32) -> (i32, i32) {
    %c0_i32 = arith.constant 0 : i32
    %c0_i32_0 = arith.constant 0 : i32
    %c0_i32_1 = arith.constant 0 : i32
    return %c0_i32, %c0_i32_0 : i32, i32
  }
  func.func @transform_1(%arg0: i32) -> (i32, i32) {
    %c0_i32 = arith.constant 0 : i32
    %c0_i32_0 = arith.constant 0 : i32
    return %c0_i32, %arg0 : i32, i32
  }
  func.func @transform_2(%arg0: i32) -> (i32, i32) {
    %c0_i32 = arith.constant 0 : i32
    %c0_i32_0 = arith.constant 0 : i32
    %c0_i32_1 = arith.constant 0 : i32
    return %c0_i32, %c0_i32_0 : i32, i32
  }
  func.func @transform_3(%arg0: i32) -> (i32, i32) {
    %c0_i32 = arith.constant 0 : i32
    %c0_i32_0 = arith.constant 0 : i32
    return %c0_i32, %arg0 : i32, i32
  }
}

module attributes {stable_mosaic.version = 11 : i64} {
  func.func @_gemm_bias_relu_kernel(%arg0: i32, %arg1: memref<32x144xf32, #tpu.memory_space<vmem>>, %arg2: memref<144x256xf32, #tpu.memory_space<vmem>>, %arg3: memref<32x1xf32, #tpu.memory_space<vmem>>, %arg4: memref<32x256xf32, #tpu.memory_space<vmem>>) attributes {dimension_semantics = [#tpu.dimension_semantics<parallel>], iteration_bounds = array<i64: 2>, scalar_prefetch = 0 : i64, scratch_operands = 0 : i64, tpu.core_type = #tpu.core_type<tc>, window_params = [{pipeline_mode = #tpu.pipeline_mode<synchronous>, transform_indices = @transform_0, window_bounds = array<i64: 32, 144>}, {transform_indices = @transform_1, window_bounds = array<i64: 144, 256>}, {pipeline_mode = #tpu.pipeline_mode<synchronous>, transform_indices = @transform_2, window_bounds = array<i64: 32, 1>}, {transform_indices = @transform_3, window_bounds = array<i64: 32, 256>}]} {
    %c0 = arith.constant 0 : index
    %c0_0 = arith.constant 0 : index
    %0 = vector.load %arg1[%c0, %c0_0] : memref<32x144xf32, #tpu.memory_space<vmem>>, vector<32x144xf32>
    %c0_1 = arith.constant 0 : index
    %c0_2 = arith.constant 0 : index
    %1 = vector.load %arg2[%c0_1, %c0_2] : memref<144x256xf32, #tpu.memory_space<vmem>>, vector<144x256xf32>
    %cst = arith.constant dense<0.000000e+00> : vector<32x256xf32>
    %2 = tpu.matmul %0, %1, %cst {dimension_numbers = #tpu.dot_dimension_numbers<[1], [0], [0], [1], [0, 0, 1, 1], [], []>} : vector<32x144xf32>, vector<144x256xf32>, vector<32x256xf32> -> vector<32x256xf32>
    %c0_3 = arith.constant 0 : index
    %c0_4 = arith.constant 0 : index
    %3 = vector.load %arg3[%c0_3, %c0_4] : memref<32x1xf32, #tpu.memory_space<vmem>>, vector<32x1xf32>
    %4 = vector.broadcast %3 : vector<32x1xf32> to vector<32x256xf32>
    %5 = arith.addf %2, %4 : vector<32x256xf32>
    %cst_5 = arith.constant 0.000000e+00 : f32
    %6 = vector.broadcast %cst_5 : f32 to vector<32x256xf32>
    %7 = arith.maximumf %5, %6 : vector<32x256xf32>
    %c0_6 = arith.constant 0 : index
    %c0_7 = arith.constant 0 : index
    %8 = vector.load %arg4[%c0_6, %c0_7] : memref<32x256xf32, #tpu.memory_space<vmem>>, vector<32x256xf32>
    tpu.vector_store %arg4[%c0_6, %c0_7], %7 {strides = array<i32>} : memref<32x256xf32, #tpu.memory_space<vmem>>, vector<32x256xf32>,
    return
  }
  func.func @transform_0(%arg0: i32) -> (i32, i32) {
    %c0_i32 = arith.constant 0 : i32
    %c0_i32_0 = arith.constant 0 : i32
    %c0_i32_1 = arith.constant 0 : i32
    return %c0_i32, %c0_i32_0 : i32, i32
  }
  func.func @transform_1(%arg0: i32) -> (i32, i32) {
    %c0_i32 = arith.constant 0 : i32
    %c0_i32_0 = arith.constant 0 : i32
    return %c0_i32, %arg0 : i32, i32
  }
  func.func @transform_2(%arg0: i32) -> (i32, i32) {
    %c0_i32 = arith.constant 0 : i32
    %c0_i32_0 = arith.constant 0 : i32
    %c0_i32_1 = arith.constant 0 : i32
    return %c0_i32, %c0_i32_0 : i32, i32
  }
  func.func @transform_3(%arg0: i32) -> (i32, i32) {
    %c0_i32 = arith.constant 0 : i32
    %c0_i32_0 = arith.constant 0 : i32
    return %c0_i32, %arg0 : i32, i32
  }
}

module attributes {stable_mosaic.version = 11 : i64} {
  func.func @_gemm_bias_relu_kernel(%arg0: i32, %arg1: memref<48x384xf32, #tpu.memory_space<vmem>>, %arg2: memref<384x128xf32, #tpu.memory_space<vmem>>, %arg3: memref<48x1xf32, #tpu.memory_space<vmem>>, %arg4: memref<48x128xf32, #tpu.memory_space<vmem>>) attributes {dimension_semantics = [#tpu.dimension_semantics<parallel>], iteration_bounds = array<i64: 2>, scalar_prefetch = 0 : i64, scratch_operands = 0 : i64, tpu.core_type = #tpu.core_type<tc>, window_params = [{pipeline_mode = #tpu.pipeline_mode<synchronous>, transform_indices = @transform_0, window_bounds = array<i64: 48, 384>}, {transform_indices = @transform_1, window_bounds = array<i64: 384, 128>}, {pipeline_mode = #tpu.pipeline_mode<synchronous>, transform_indices = @transform_2, window_bounds = array<i64: 48, 1>}, {transform_indices = @transform_3, window_bounds = array<i64: 48, 128>}]} {
    %c0 = arith.constant 0 : index
    %c0_0 = arith.constant 0 : index
    %0 = vector.load %arg1[%c0, %c0_0] : memref<48x384xf32, #tpu.memory_space<vmem>>, vector<48x384xf32>
    %c0_1 = arith.constant 0 : index
    %c0_2 = arith.constant 0 : index
    %1 = vector.load %arg2[%c0_1, %c0_2] : memref<384x128xf32, #tpu.memory_space<vmem>>, vector<384x128xf32>
    %cst = arith.constant dense<0.000000e+00> : vector<48x128xf32>
    %2 = tpu.matmul %0, %1, %cst {dimension_numbers = #tpu.dot_dimension_numbers<[1], [0], [0], [1], [0, 0, 1, 1], [], []>} : vector<48x384xf32>, vector<384x128xf32>, vector<48x128xf32> -> vector<48x128xf32>
    %c0_3 = arith.constant 0 : index
    %c0_4 = arith.constant 0 : index
    %3 = vector.load %arg3[%c0_3, %c0_4] : memref<48x1xf32, #tpu.memory_space<vmem>>, vector<48x1xf32>
    %4 = vector.broadcast %3 : vector<48x1xf32> to vector<48x128xf32>
    %5 = arith.addf %2, %4 : vector<48x128xf32>
    %cst_5 = arith.constant 0.000000e+00 : f32
    %6 = vector.broadcast %cst_5 : f32 to vector<48x128xf32>
    %7 = arith.maximumf %5, %6 : vector<48x128xf32>
    %c0_6 = arith.constant 0 : index
    %c0_7 = arith.constant 0 : index
    %8 = vector.load %arg4[%c0_6, %c0_7] : memref<48x128xf32, #tpu.memory_space<vmem>>, vector<48x128xf32>
    tpu.vector_store %arg4[%c0_6, %c0_7], %7 {strides = array<i32>} : memref<48x128xf32, #tpu.memory_space<vmem>>, vector<48x128xf32>,
    return
  }
  func.func @transform_0(%arg0: i32) -> (i32, i32) {
    %c0_i32 = arith.constant 0 : i32
    %c0_i32_0 = arith.constant 0 : i32
    %c0_i32_1 = arith.constant 0 : i32
    return %c0_i32, %c0_i32_0 : i32, i32
  }
  func.func @transform_1(%arg0: i32) -> (i32, i32) {
    %c0_i32 = arith.constant 0 : i32
    %c0_i32_0 = arith.constant 0 : i32
    return %c0_i32, %arg0 : i32, i32
  }
  func.func @transform_2(%arg0: i32) -> (i32, i32) {
    %c0_i32 = arith.constant 0 : i32
    %c0_i32_0 = arith.constant 0 : i32
    %c0_i32_1 = arith.constant 0 : i32
    return %c0_i32, %c0_i32_0 : i32, i32
  }
  func.func @transform_3(%arg0: i32) -> (i32, i32) {
    %c0_i32 = arith.constant 0 : i32
    %c0_i32_0 = arith.constant 0 : i32
    return %c0_i32, %arg0 : i32, i32
  }
}

module attributes {stable_mosaic.version = 11 : i64} {
  func.func @_gemm_bias_relu_kernel(%arg0: i32, %arg1: memref<64x1152xf32, #tpu.memory_space<vmem>>, %arg2: memref<1152x56xf32, #tpu.memory_space<vmem>>, %arg3: memref<64x1xf32, #tpu.memory_space<vmem>>, %arg4: memref<64x56xf32, #tpu.memory_space<vmem>>) attributes {dimension_semantics = [#tpu.dimension_semantics<parallel>], iteration_bounds = array<i64: 1>, scalar_prefetch = 0 : i64, scratch_operands = 0 : i64, tpu.core_type = #tpu.core_type<tc>, window_params = [{pipeline_mode = #tpu.pipeline_mode<synchronous>, transform_indices = @transform_0, window_bounds = array<i64: 64, 1152>}, {transform_indices = @transform_1, window_bounds = array<i64: 1152, 56>}, {pipeline_mode = #tpu.pipeline_mode<synchronous>, transform_indices = @transform_2, window_bounds = array<i64: 64, 1>}, {transform_indices = @transform_3, window_bounds = array<i64: 64, 56>}]} {
    %c0 = arith.constant 0 : index
    %c0_0 = arith.constant 0 : index
    %0 = vector.load %arg1[%c0, %c0_0] : memref<64x1152xf32, #tpu.memory_space<vmem>>, vector<64x1152xf32>
    %c0_1 = arith.constant 0 : index
    %c0_2 = arith.constant 0 : index
    %1 = vector.load %arg2[%c0_1, %c0_2] : memref<1152x56xf32, #tpu.memory_space<vmem>>, vector<1152x56xf32>
    %cst = arith.constant dense<0.000000e+00> : vector<64x56xf32>
    %2 = tpu.matmul %0, %1, %cst {dimension_numbers = #tpu.dot_dimension_numbers<[1], [0], [0], [1], [0, 0, 1, 1], [], []>} : vector<64x1152xf32>, vector<1152x56xf32>, vector<64x56xf32> -> vector<64x56xf32>
    %c0_3 = arith.constant 0 : index
    %c0_4 = arith.constant 0 : index
    %3 = vector.load %arg3[%c0_3, %c0_4] : memref<64x1xf32, #tpu.memory_space<vmem>>, vector<64x1xf32>
    %4 = vector.broadcast %3 : vector<64x1xf32> to vector<64x56xf32>
    %5 = arith.addf %2, %4 : vector<64x56xf32>
    %cst_5 = arith.constant 0.000000e+00 : f32
    %6 = vector.broadcast %cst_5 : f32 to vector<64x56xf32>
    %7 = arith.maximumf %5, %6 : vector<64x56xf32>
    %c0_6 = arith.constant 0 : index
    %c0_7 = arith.constant 0 : index
    %8 = vector.load %arg4[%c0_6, %c0_7] : memref<64x56xf32, #tpu.memory_space<vmem>>, vector<64x56xf32>
    tpu.vector_store %arg4[%c0_6, %c0_7], %7 {strides = array<i32>} : memref<64x56xf32, #tpu.memory_space<vmem>>, vector<64x56xf32>,
    return
  }
  func.func @transform_0(%arg0: i32) -> (i32, i32) {
    %c0_i32 = arith.constant 0 : i32
    %c0_i32_0 = arith.constant 0 : i32
    %c0_i32_1 = arith.constant 0 : i32
    return %c0_i32, %c0_i32_0 : i32, i32
  }
  func.func @transform_1(%arg0: i32) -> (i32, i32) {
    %c0_i32 = arith.constant 0 : i32
    %c0_i32_0 = arith.constant 0 : i32
    return %c0_i32, %arg0 : i32, i32
  }
  func.func @transform_2(%arg0: i32) -> (i32, i32) {
    %c0_i32 = arith.constant 0 : i32
    %c0_i32_0 = arith.constant 0 : i32
    %c0_i32_1 = arith.constant 0 : i32
    return %c0_i32, %c0_i32_0 : i32, i32
  }
  func.func @transform_3(%arg0: i32) -> (i32, i32) {
    %c0_i32 = arith.constant 0 : i32
    %c0_i32_0 = arith.constant 0 : i32
    return %c0_i32, %arg0 : i32, i32
  }
}

module attributes {stable_mosaic.version = 11 : i64} {
  func.func @_gemm_bias_relu_kernel(%arg0: i32, %arg1: memref<64x1344xf32, #tpu.memory_space<vmem>>, %arg2: memref<1344x8xf32, #tpu.memory_space<vmem>>, %arg3: memref<64x1xf32, #tpu.memory_space<vmem>>, %arg4: memref<64x8xf32, #tpu.memory_space<vmem>>) attributes {dimension_semantics = [#tpu.dimension_semantics<parallel>], iteration_bounds = array<i64: 1>, scalar_prefetch = 0 : i64, scratch_operands = 0 : i64, tpu.core_type = #tpu.core_type<tc>, window_params = [{pipeline_mode = #tpu.pipeline_mode<synchronous>, transform_indices = @transform_0, window_bounds = array<i64: 64, 1344>}, {transform_indices = @transform_1, window_bounds = array<i64: 1344, 8>}, {pipeline_mode = #tpu.pipeline_mode<synchronous>, transform_indices = @transform_2, window_bounds = array<i64: 64, 1>}, {transform_indices = @transform_3, window_bounds = array<i64: 64, 8>}]} {
    %c0 = arith.constant 0 : index
    %c0_0 = arith.constant 0 : index
    %0 = vector.load %arg1[%c0, %c0_0] : memref<64x1344xf32, #tpu.memory_space<vmem>>, vector<64x1344xf32>
    %c0_1 = arith.constant 0 : index
    %c0_2 = arith.constant 0 : index
    %1 = vector.load %arg2[%c0_1, %c0_2] : memref<1344x8xf32, #tpu.memory_space<vmem>>, vector<1344x8xf32>
    %cst = arith.constant dense<0.000000e+00> : vector<64x8xf32>
    %2 = tpu.matmul %0, %1, %cst {dimension_numbers = #tpu.dot_dimension_numbers<[1], [0], [0], [1], [0, 0, 1, 1], [], []>} : vector<64x1344xf32>, vector<1344x8xf32>, vector<64x8xf32> -> vector<64x8xf32>
    %c0_3 = arith.constant 0 : index
    %c0_4 = arith.constant 0 : index
    %3 = vector.load %arg3[%c0_3, %c0_4] : memref<64x1xf32, #tpu.memory_space<vmem>>, vector<64x1xf32>
    %4 = vector.broadcast %3 : vector<64x1xf32> to vector<64x8xf32>
    %5 = arith.addf %2, %4 : vector<64x8xf32>
    %cst_5 = arith.constant 0.000000e+00 : f32
    %6 = vector.broadcast %cst_5 : f32 to vector<64x8xf32>
    %7 = arith.maximumf %5, %6 : vector<64x8xf32>
    %c0_6 = arith.constant 0 : index
    %c0_7 = arith.constant 0 : index
    %8 = vector.load %arg4[%c0_6, %c0_7] : memref<64x8xf32, #tpu.memory_space<vmem>>, vector<64x8xf32>
    tpu.vector_store %arg4[%c0_6, %c0_7], %7 {strides = array<i32>} : memref<64x8xf32, #tpu.memory_space<vmem>>, vector<64x8xf32>,
    return
  }
  func.func @transform_0(%arg0: i32) -> (i32, i32) {
    %c0_i32 = arith.constant 0 : i32
    %c0_i32_0 = arith.constant 0 : i32
    %c0_i32_1 = arith.constant 0 : i32
    return %c0_i32, %c0_i32_0 : i32, i32
  }
  func.func @transform_1(%arg0: i32) -> (i32, i32) {
    %c0_i32 = arith.constant 0 : i32
    %c0_i32_0 = arith.constant 0 : i32
    return %c0_i32, %arg0 : i32, i32
  }
  func.func @transform_2(%arg0: i32) -> (i32, i32) {
    %c0_i32 = arith.constant 0 : i32
    %c0_i32_0 = arith.constant 0 : i32
    %c0_i32_1 = arith.constant 0 : i32
    return %c0_i32, %c0_i32_0 : i32, i32
  }
  func.func @transform_3(%arg0: i32) -> (i32, i32) {
    %c0_i32 = arith.constant 0 : i32
    %c0_i32_0 = arith.constant 0 : i32
    return %c0_i32, %arg0 : i32, i32
  }
}

</mosaic_0001>

<bundles_post_ra>
// kernel: encoder_forward.5
= control target key start
LH: loop header
LB: loop body
LE: loop exit
PB: predicated region body
PF: predicated region fallthrough
CT: control target
= control target key end

     0   :  { %s852_s12 = smov 0   ;;  %s854_s13 = smov 0   ;;  %s1205_s0 = inlined_call_operand.vmem [shape: f32[16,75], index: 0, kind: input, shape index: {}]   ;;  %s1206_s1 = inlined_call_operand.vmem [shape: f32[75,1792], index: 1, kind: input, shape index: {}]   ;;  %s1207_s2 = inlined_call_operand.vmem [shape: f32[16,1], index: 2, kind: input, shape index: {}]   ;;  %s1208_s3 = inlined_call_operand.vmem [shape: f32[16,1792], index: 3, kind: output, shape index: {}]  }
   0x1   :  { %s856_s14 = smov 0  }
   0x2 LB: > { %s736_s15 = sadd.s32 4294967295, %s829_s14   ;;  %s869_s16 = sadd.s32 1, %s829_s14   ;;  %s829_s14 = sphi %s856_s14, %s1212_s14   ;;  %s825_s13 = sphi %s854_s13, %s1211_s13   ;;  %s821_s12 = sphi %s852_s12, %s1210_s12  }
   0x3   : > { %s38_s17 = ssub.s32 %s829_s14, %s869_s16  ;;  %s41_s18 = sadd.s32 1, %s825_s13 }
   0x4   : > { %p39_p0 = scmp.eq.s32.totalorder %s38_s17, 0  ;;  %p48_p1 = scmp.ne.s32.totalorder %s825_s13, %s821_s12 }
   0x5   : > { %p49_p2 = scmp.eq.s32.totalorder %s829_s14, 0  ;;  %p99_p3 = scmp.eq.s32.totalorder %s736_s15, 1 }
   0x6   : > { %s880_s19 = scalar_select %p39_p0, %s825_s13, %s41_s18  }
   0x7   : > { %p50_p4 = por %p49_p2, %p48_p1  ;;  %p882_p5 = por %p99_p3, %p48_p1 }
   0x8   : > { %p739_p6 = scmp.ge.s32.totalorder %s829_s14, 2 }
   0xa   : > { %127 = sbr.rel (%p739_p6) target bundleno = 90 (0x5a), region = 24 }
   0xf   : > { %130 = sbr.rel (!%p50_p4) target bundleno = 90 (0x5a), region = 28  ;;  %s132_s21 = sand.u32 (%p50_p4), 1, %s825_s13  }
  0x10   : > { %s766_s22 = smul.u32 (%p50_p4), 56, %s829_s14 }
  0x11   : > { %s778_s23 = smul.u32 (%p50_p4), 560, %s132_s21 }
  0x12   : > { %s892_s26 = scalar_lea.vmem (%p50_p4), %s1206_s1, %s766_s22 }
  0x13   : > { %v150_v0 = vld [vmem:[%s892_s26] sm:$0xff] (%p50_p4)  ;;  %v152_v1 = vld [vmem:[%s892_s26 + $0x8] sm:$0xff] (%p50_p4)  ;;  %v154_v2 = vld [vmem:[%s892_s26 + $0x10] sm:$0xff] (%p50_p4)  ;;  %s897_s27 = scalar_lea.vmem (%p50_p4), [#allocation2], %s778_s23 }
  0x14   : > { %151 = vst [vmem:[%s897_s27] sm:$0xff] %v150_v0  ;;  %v156_v3 = vld [vmem:[%s892_s26 + $0x18] sm:$0xff]  ;;  %v158_v4 = vld [vmem:[%s892_s26 + $0x20] sm:$0xff]  ;;  %v160_v5 = vld [vmem:[%s892_s26 + $0x28] sm:$0xff] }
  0x15   : > { %153 = vst [vmem:[%s897_s27 + $0x8] sm:$0xff] %v152_v1  ;;  %v162_v6 = vld [vmem:[%s892_s26 + $0x30] sm:$0xff]  ;;  %v166_v8 = vld [vmem:[%s892_s26 + $0x78] sm:$0xff]  ;;  %v168_v9 = vld [vmem:[%s892_s26 + $0x80] sm:$0xff] }
  0x16   : > { %155 = vst [vmem:[%s897_s27 + $0x10] sm:$0xff] %v154_v2  ;;  %v164_v7 = vld [vmem:[%s892_s26 + $0x70] sm:$0xff]  ;;  %v170_v10 = vld [vmem:[%s892_s26 + $0x88] sm:$0xff]  ;;  %v174_v12 = vld [vmem:[%s892_s26 + $0x98] sm:$0xff] }
  0x17   : > { %157 = vst [vmem:[%s897_s27 + $0x18] sm:$0xff] %v156_v3  ;;  %v172_v11 = vld [vmem:[%s892_s26 + $0x90] sm:$0xff]  ;;  %v176_v13 = vld [vmem:[%s892_s26 + $0xa0] sm:$0xff]  ;;  %v180_v15 = vld [vmem:[%s892_s26 + $0xe8] sm:$0xff] }
  0x18   : > { %159 = vst [vmem:[%s897_s27 + $0x20] sm:$0xff] %v158_v4  ;;  %v178_v14 = vld [vmem:[%s892_s26 + $0xe0] sm:$0xff]  ;;  %v182_v16 = vld [vmem:[%s892_s26 + $0xf0] sm:$0xff]  ;;  %v184_v17 = vld [vmem:[%s892_s26 + $0xf8] sm:$0xff] }
  0x19   : > { %161 = vst [vmem:[%s897_s27 + $0x28] sm:$0xff] %v160_v5  ;;  %v186_v18 = vld [vmem:[%s892_s26 + $0x100] sm:$0xff]  ;;  %v188_v19 = vld [vmem:[%s892_s26 + $0x108] sm:$0xff]  ;;  %v190_v20 = vld [vmem:[%s892_s26 + $0x110] sm:$0xff] }
  0x1a   : > { %163 = vst [vmem:[%s897_s27 + $0x30] sm:$0xff] %v162_v6  ;;  %v192_v21 = vld [vmem:[%s892_s26 + $0x150] sm:$0xff]  ;;  %v194_v22 = vld [vmem:[%s892_s26 + $0x158] sm:$0xff]  ;;  %v196_v23 = vld [vmem:[%s892_s26 + $0x160] sm:$0xff] }
  0x1b   : > { %165 = vst [vmem:[%s897_s27 + $0x38] sm:$0xff] %v164_v7  ;;  %v198_v24 = vld [vmem:[%s892_s26 + $0x168] sm:$0xff]  ;;  %v200_v25 = vld [vmem:[%s892_s26 + $0x170] sm:$0xff]  ;;  %v202_v26 = vld [vmem:[%s892_s26 + $0x178] sm:$0xff] }
  0x1c   : > { %167 = vst [vmem:[%s897_s27 + $0x40] sm:$0xff] %v166_v8  ;;  %v204_v27 = vld [vmem:[%s892_s26 + $0x180] sm:$0xff]  ;;  %v208_v29 = vld [vmem:[%s892_s26 + $0x1c8] sm:$0xff]  ;;  %v210_v30 = vld [vmem:[%s892_s26 + $0x1d0] sm:$0xff] }
  0x1d   : > { %169 = vst [vmem:[%s897_s27 + $0x48] sm:$0xff] %v168_v9  ;;  %v206_v28 = vld [vmem:[%s892_s26 + $0x1c0] sm:$0xff]  ;;  %v212_v31 = vld [vmem:[%s892_s26 + $0x1d8] sm:$0xff]  ;;  %v216_v33 = vld [vmem:[%s892_s26 + $0x1e8] sm:$0xff] }
  0x1e   : > { %171 = vst [vmem:[%s897_s27 + $0x50] sm:$0xff] %v170_v10  ;;  %v214_v32 = vld [vmem:[%s892_s26 + $0x1e0] sm:$0xff]  ;;  %v218_v34 = vld [vmem:[%s892_s26 + $0x1f0] sm:$0xff]  ;;  %v222_v36 = vld [vmem:[%s892_s26 + $0x238] sm:$0xff] }
  0x1f   : > { %173 = vst [vmem:[%s897_s27 + $0x58] sm:$0xff] %v172_v11  ;;  %v220_v35 = vld [vmem:[%s892_s26 + $0x230] sm:$0xff]  ;;  %v224_v37 = vld [vmem:[%s892_s26 + $0x240] sm:$0xff]  ;;  %v226_v38 = vld [vmem:[%s892_s26 + $0x248] sm:$0xff] }
  0x20   : > { %175 = vst [vmem:[%s897_s27 + $0x60] sm:$0xff] %v174_v12  ;;  %v228_v39 = vld [vmem:[%s892_s26 + $0x250] sm:$0xff]  ;;  %v230_v40 = vld [vmem:[%s892_s26 + $0x258] sm:$0xff]  ;;  %v232_v41 = vld [vmem:[%s892_s26 + $0x260] sm:$0xff] }
  0x21   : > { %177 = vst [vmem:[%s897_s27 + $0x68] sm:$0xff] %v176_v13  ;;  %v234_v42 = vld [vmem:[%s892_s26 + $0x2a0] sm:$0xff]  ;;  %v236_v43 = vld [vmem:[%s892_s26 + $0x2a8] sm:$0xff]  ;;  %v238_v44 = vld [vmem:[%s892_s26 + $0x2b0] sm:$0xff] }
  0x22   : > { %179 = vst [vmem:[%s897_s27 + $0x70] sm:$0xff] %v178_v14  ;;  %v240_v45 = vld [vmem:[%s892_s26 + $0x2b8] sm:$0xff]  ;;  %v242_v46 = vld [vmem:[%s892_s26 + $0x2c0] sm:$0xff]  ;;  %v244_v47 = vld [vmem:[%s892_s26 + $0x2c8] sm:$0xff] }
  0x23   : > { %181 = vst [vmem:[%s897_s27 + $0x78] sm:$0xff] %v180_v15  ;;  %v246_v48 = vld [vmem:[%s892_s26 + $0x2d0] sm:$0xff]  ;;  %v250_v50 = vld [vmem:[%s892_s26 + $0x318] sm:$0xff]  ;;  %v252_v51 = vld [vmem:[%s892_s26 + $0x320] sm:$0xff] }
  0x24   : > { %183 = vst [vmem:[%s897_s27 + $0x80] sm:$0xff] %v182_v16  ;;  %v248_v49 = vld [vmem:[%s892_s26 + $0x310] sm:$0xff]  ;;  %v254_v52 = vld [vmem:[%s892_s26 + $0x328] sm:$0xff]  ;;  %v258_v54 = vld [vmem:[%s892_s26 + $0x338] sm:$0xff] }
  0x25   : > { %185 = vst [vmem:[%s897_s27 + $0x88] sm:$0xff] %v184_v17  ;;  %v256_v53 = vld [vmem:[%s892_s26 + $0x330] sm:$0xff]  ;;  %v260_v55 = vld [vmem:[%s892_s26 + $0x340] sm:$0xff]  ;;  %v264_v57 = vld [vmem:[%s892_s26 + $0x388] sm:$0xff] }
  0x26   : > { %187 = vst [vmem:[%s897_s27 + $0x90] sm:$0xff] %v186_v18  ;;  %v262_v56 = vld [vmem:[%s892_s26 + $0x380] sm:$0xff]  ;;  %v266_v58 = vld [vmem:[%s892_s26 + $0x390] sm:$0xff]  ;;  %v268_v59 = vld [vmem:[%s892_s26 + $0x398] sm:$0xff] }
  0x27   : > { %189 = vst [vmem:[%s897_s27 + $0x98] sm:$0xff] %v188_v19  ;;  %v270_v60 = vld [vmem:[%s892_s26 + $0x3a0] sm:$0xff]  ;;  %v272_v61 = vld [vmem:[%s892_s26 + $0x3a8] sm:$0xff]  ;;  %v274_v62 = vld [vmem:[%s892_s26 + $0x3b0] sm:$0xff] }
  0x28   : > { %191 = vst [vmem:[%s897_s27 + $0xa0] sm:$0xff] %v190_v20  ;;  %v276_v63 = vld [vmem:[%s892_s26 + $0x3f0] sm:$0xff]  ;;  %v278_v0 = vld [vmem:[%s892_s26 + $0x3f8] sm:$0xff]  ;;  %v280_v1 = vld [vmem:[%s892_s26 + $0x400] sm:$0xff] }
  0x29   : > { %193 = vst [vmem:[%s897_s27 + $0xa8] sm:$0xff] %v192_v21  ;;  %v282_v2 = vld [vmem:[%s892_s26 + $0x408] sm:$0xff]  ;;  %v284_v3 = vld [vmem:[%s892_s26 + $0x410] sm:$0xff]  ;;  %v286_v4 = vld [vmem:[%s892_s26 + $0x418] sm:$0xff] }
  0x2a   : > { %195 = vst [vmem:[%s897_s27 + $0xb0] sm:$0xff] %v194_v22  ;;  %v288_v5 = vld [vmem:[%s892_s26 + $0x420] sm:$0xff] }
  0x2b   : > { %197 = vst [vmem:[%s897_s27 + $0xb8] sm:$0xff] %v196_v23 }
  0x2c   : > { %199 = vst [vmem:[%s897_s27 + $0xc0] sm:$0xff] %v198_v24 }
  0x2d   : > { %201 = vst [vmem:[%s897_s27 + $0xc8] sm:$0xff] %v200_v25 }
  0x2e   : > { %203 = vst [vmem:[%s897_s27 + $0xd0] sm:$0xff] %v202_v26 }
  0x2f   : > { %205 = vst [vmem:[%s897_s27 + $0xd8] sm:$0xff] %v204_v27 }
  0x30   : > { %207 = vst [vmem:[%s897_s27 + $0xe0] sm:$0xff] %v206_v28 }
  0x31   : > { %209 = vst [vmem:[%s897_s27 + $0xe8] sm:$0xff] %v208_v29 }
  0x32   : > { %211 = vst [vmem:[%s897_s27 + $0xf0] sm:$0xff] %v210_v30 }
  0x33   : > { %213 = vst [vmem:[%s897_s27 + $0xf8] sm:$0xff] %v212_v31 }
  0x34   : > { %215 = vst [vmem:[%s897_s27 + $0x100] sm:$0xff] %v214_v32 }
  0x35   : > { %217 = vst [vmem:[%s897_s27 + $0x108] sm:$0xff] %v216_v33 }
  0x36   : > { %219 = vst [vmem:[%s897_s27 + $0x110] sm:$0xff] %v218_v34 }
  0x37   : > { %221 = vst [vmem:[%s897_s27 + $0x118] sm:$0xff] %v220_v35 }
  0x38   : > { %223 = vst [vmem:[%s897_s27 + $0x120] sm:$0xff] %v222_v36 }
  0x39   : > { %225 = vst [vmem:[%s897_s27 + $0x128] sm:$0xff] %v224_v37 }
  0x3a   : > { %227 = vst [vmem:[%s897_s27 + $0x130] sm:$0xff] %v226_v38 }
  0x3b   : > { %229 = vst [vmem:[%s897_s27 + $0x138] sm:$0xff] %v228_v39 }
  0x3c   : > { %231 = vst [vmem:[%s897_s27 + $0x140] sm:$0xff] %v230_v40 }
  0x3d   : > { %233 = vst [vmem:[%s897_s27 + $0x148] sm:$0xff] %v232_v41 }
  0x3e   : > { %235 = vst [vmem:[%s897_s27 + $0x150] sm:$0xff] %v234_v42 }
  0x3f   : > { %237 = vst [vmem:[%s897_s27 + $0x158] sm:$0xff] %v236_v43 }
  0x40   : > { %239 = vst [vmem:[%s897_s27 + $0x160] sm:$0xff] %v238_v44 }
  0x41   : > { %241 = vst [vmem:[%s897_s27 + $0x168] sm:$0xff] %v240_v45 }
  0x42   : > { %243 = vst [vmem:[%s897_s27 + $0x170] sm:$0xff] %v242_v46 }
  0x43   : > { %245 = vst [vmem:[%s897_s27 + $0x178] sm:$0xff] %v244_v47 }
  0x44   : > { %247 = vst [vmem:[%s897_s27 + $0x180] sm:$0xff] %v246_v48 }
  0x45   : > { %249 = vst [vmem:[%s897_s27 + $0x188] sm:$0xff] %v248_v49 }
  0x46   : > { %251 = vst [vmem:[%s897_s27 + $0x190] sm:$0xff] %v250_v50 }
  0x47   : > { %253 = vst [vmem:[%s897_s27 + $0x198] sm:$0xff] %v252_v51 }
  0x48   : > { %255 = vst [vmem:[%s897_s27 + $0x1a0] sm:$0xff] %v254_v52 }
  0x49   : > { %257 = vst [vmem:[%s897_s27 + $0x1a8] sm:$0xff] %v256_v53 }
  0x4a   : > { %259 = vst [vmem:[%s897_s27 + $0x1b0] sm:$0xff] %v258_v54 }
  0x4b   : > { %261 = vst [vmem:[%s897_s27 + $0x1b8] sm:$0xff] %v260_v55 }
  0x4c   : > { %263 = vst [vmem:[%s897_s27 + $0x1c0] sm:$0xff] %v262_v56 }
  0x4d   : > { %265 = vst [vmem:[%s897_s27 + $0x1c8] sm:$0xff] %v264_v57 }
  0x4e   : > { %267 = vst [vmem:[%s897_s27 + $0x1d0] sm:$0xff] %v266_v58 }
  0x4f   : > { %269 = vst [vmem:[%s897_s27 + $0x1d8] sm:$0xff] %v268_v59 }
  0x50   : > { %271 = vst [vmem:[%s897_s27 + $0x1e0] sm:$0xff] %v270_v60 }
  0x51   : > { %273 = vst [vmem:[%s897_s27 + $0x1e8] sm:$0xff] %v272_v61 }
  0x52   : > { %275 = vst [vmem:[%s897_s27 + $0x1f0] sm:$0xff] %v274_v62 }
  0x53   : > { %277 = vst [vmem:[%s897_s27 + $0x1f8] sm:$0xff] %v276_v63 }
  0x54   : > { %279 = vst [vmem:[%s897_s27 + $0x200] sm:$0xff] %v278_v0 }
  0x55   : > { %281 = vst [vmem:[%s897_s27 + $0x208] sm:$0xff] %v280_v1 }
  0x56   : > { %283 = vst [vmem:[%s897_s27 + $0x210] sm:$0xff] %v282_v2 }
  0x57   : > { %285 = vst [vmem:[%s897_s27 + $0x218] sm:$0xff] %v284_v3 }
  0x58   : > { %287 = vst [vmem:[%s897_s27 + $0x220] sm:$0xff] %v286_v4 }
  0x59   : > { %289 = vst [vmem:[%s897_s27 + $0x228] sm:$0xff] %v288_v5 }
  0x5a PF: > { %p741_p7 = scmp.ge.s32.totalorder %s829_s14, 1  ;;  %p294_p8 = scmp.lt.s32.totalorder %s829_s14, 3 }
  0x5c   : > { %p295_p9 = pnand %p741_p7, %p294_p8 }
  0x5d   : > { %s301_s28 = sand.u32 (!%p295_p9), 1, %s821_s12  }
  0x5e   : > { %298 = sbr.rel (%p295_p9) target bundleno = 297 (0x129), region = 51 }
  0x5f   : > { %s779_s29 = smul.u32 (!%p295_p9), 560, %s301_s28 }
  0x60   : > { %s780_s17 = smul.u32 (!%p295_p9), 112, %s301_s28 }
  0x61   : > { %s1041_s30 = scalar_lea.vmem (!%p295_p9), [#allocation2], %s779_s29 }
  0x62   : > { %s1158_s18 = scalar_lea.vmem (!%p295_p9), [#allocation3], %s780_s17 }
  0x63   : > { %vm416_vm0 = vcmask 1042432   ;;  %v391_v6 = vld [vmem:[%s1041_s30 + $0x200] sm:$0x7]  ;;  %v392_v7 = vld [vmem:[%s1041_s30 + $0x208] sm:$0x7]  ;;  %v385_v10 = vld [vmem:[%s1041_s30 + $0x1d0] sm:$0xff] }
  0x64   : > { %v393_v8 = vld [vmem:[%s1041_s30 + $0x210] sm:$0x7]  ;;  %745 = vmatpush.msk.msra.mxu1 %vm416_vm0, %v391_v6  ;;  %748 = vmatpush.msk.msra.mxu2 %vm416_vm0, %v392_v7  ;;  %v384_v9 = vld [vmem:[%s1041_s30 + $0x1c8] sm:$0xff]  ;;  %v386_v11 = vld [vmem:[%s1041_s30 + $0x1d8] sm:$0xff]  ;;  %vm409_vm1 = vcmask 613376   ;;  %s767_s12 = smul.u32 (%p882_p5), 56, %s736_s15 }
  0x65   : > { %751 = vmatpush.msk.msra.mxu3 %vm416_vm0, %v393_v8  ;;  %v377_v12 = vld [vmem:[%s1041_s30 + $0x190] sm:$0xff]  ;;  %v378_v13 = vld [vmem:[%s1041_s30 + $0x198] sm:$0xff]  ;;  %v379_v14 = vld [vmem:[%s1041_s30 + $0x1a0] sm:$0xff] }
  0x66   : > { %468 = vmatpush.msra.mxu1 %v384_v9  ;;  %491 = vmatpush.msra.mxu2 %v385_v10  ;;  %v390_v15 = vld [vmem:[%s1041_s30 + $0x1f8] sm:$0x7]  ;;  %v371_v17 = vld [vmem:[%s1041_s30 + $0x160] sm:$0xff]  ;;  %v372_v19 = vld [vmem:[%s1041_s30 + $0x168] sm:$0xff]  ;;  %s636_s20 = scalar_lea.vmem (%p882_p5), %s1208_s3, %s767_s12 }
  0x67   : > { %514 = vmatpush.msra.mxu3 %v386_v11  ;;  %742 = vmatpush.msk.msra.mxu0 %vm416_vm0, %v390_v15  ;;  %v370_v16 = vld [vmem:[%s1041_s30 + $0x158] sm:$0xff]  ;;  %v383_v18 = vld [vmem:[%s1041_s30 + $0x1c0] sm:$0xff]  ;;  %v376_v20 = vld [vmem:[%s1041_s30 + $0x188] sm:$0xff]  ;;  %v831_v15 = vmov 0  }
  0x68   : > { %469 = vmatpush.msra.mxu1 %v377_v12  ;;  %492 = vmatpush.msra.mxu2 %v378_v13  ;;  %v363_v21 = vld [vmem:[%s1041_s30 + $0x120] sm:$0xff]  ;;  %v364_v22 = vld [vmem:[%s1041_s30 + $0x128] sm:$0xff]  ;;  %v365_v23 = vld [vmem:[%s1041_s30 + $0x130] sm:$0xff] }
  0x69   : > { %515 = vmatpush.msra.mxu3 %v379_v14  ;;  %445 = vmatpush.msra.mxu0 %v383_v18  ;;  %v369_v24 = vld [vmem:[%s1041_s30 + $0x150] sm:$0xff]  ;;  %v356_v25 = vld [vmem:[%s1041_s30 + $0xe8] sm:$0xff]  ;;  %v358_v27 = vld [vmem:[%s1041_s30 + $0xf8] sm:$0xff] }
  0x6a   : > { %470 = vmatpush.msra.mxu1 %v370_v16  ;;  %493 = vmatpush.msra.mxu2 %v371_v17  ;;  %v357_v26 = vld [vmem:[%s1041_s30 + $0xf0] sm:$0xff]  ;;  %v362_v28 = vld [vmem:[%s1041_s30 + $0x118] sm:$0xff]  ;;  %v351_v31 = vld [vmem:[%s1041_s30 + $0xc0] sm:$0xff] }
  0x6b   : > { %516 = vmatpush.msra.mxu3 %v372_v19  ;;  %446 = vmatpush.msra.mxu0 %v376_v20  ;;  %v349_v29 = vld [vmem:[%s1041_s30 + $0xb0] sm:$0xff]  ;;  %v350_v30 = vld [vmem:[%s1041_s30 + $0xb8] sm:$0xff]  ;;  %v355_v32 = vld [vmem:[%s1041_s30 + $0xe0] sm:$0xff] }
  0x6c   : > { %471 = vmatpush.msra.mxu1 %v363_v21  ;;  %494 = vmatpush.msra.mxu2 %v364_v22  ;;  %v342_v33 = vld [vmem:[%s1041_s30 + $0x78] sm:$0xff]  ;;  %v343_v34 = vld [vmem:[%s1041_s30 + $0x80] sm:$0xff]  ;;  %v344_v35 = vld [vmem:[%s1041_s30 + $0x88] sm:$0xff] }
  0x6d   : > { %517 = vmatpush.msra.mxu3 %v365_v23  ;;  %447 = vmatpush.msra.mxu0 %v369_v24  ;;  %v348_v36 = vld [vmem:[%s1041_s30 + $0xa8] sm:$0xff]  ;;  %v335_v37 = vld [vmem:[%s1041_s30 + $0x40] sm:$0xff]  ;;  %v337_v39 = vld [vmem:[%s1041_s30 + $0x50] sm:$0xff] }
  0x6e   : > { %472 = vmatpush.msra.mxu1 %v356_v25  ;;  %495 = vmatpush.msra.mxu2 %v357_v26  ;;  %v336_v38 = vld [vmem:[%s1041_s30 + $0x48] sm:$0xff]  ;;  %v341_v40 = vld [vmem:[%s1041_s30 + $0x70] sm:$0xff]  ;;  %v330_v43 = vld [vmem:[%s1041_s30 + $0x18] sm:$0xff] }
  0x6f   : > { %518 = vmatpush.msra.mxu3 %v358_v27  ;;  %448 = vmatpush.msra.mxu0 %v362_v28  ;;  %v328_v41 = vld [vmem:[%s1041_s30 + $0x8] sm:$0xff]  ;;  %v329_v42 = vld [vmem:[%s1041_s30 + $0x10] sm:$0xff]  ;;  %v395_v44 = vld [vmem:[%s1041_s30 + $0x220] sm:$0x7] }
  0x70   : > { %473 = vmatpush.msra.mxu1 %v349_v29  ;;  %496 = vmatpush.msra.mxu2 %v350_v30  ;;  %v394_v45 = vld [vmem:[%s1041_s30 + $0x218] sm:$0x7]  ;;  %v396_v46 = vld [vmem:[%s1041_s30 + $0x228] sm:$0x7]  ;;  %v387_v49 = vld [vmem:[%s1041_s30 + $0x1e0] sm:$0xff] }
  0x71   : > { %519 = vmatpush.msra.mxu3 %v351_v31  ;;  %449 = vmatpush.msra.mxu0 %v355_v32  ;;  %v388_v47 = vld [vmem:[%s1041_s30 + $0x1e8] sm:$0xff]  ;;  %v334_v48 = vld [vmem:[%s1041_s30 + $0x38] sm:$0xff]  ;;  %v389_v50 = vld [vmem:[%s1041_s30 + $0x1f0] sm:$0xff] }
  0x72   : > { %474 = vmatpush.msra.mxu1 %v342_v33  ;;  %497 = vmatpush.msra.mxu2 %v343_v34  ;;  %v1098_v51 = vld [vmem:[%s1205_s0] sm:$0xff]  ;;  %v380_v53 = vld [vmem:[%s1041_s30 + $0x1a8] sm:$0xff]  ;;  %v382_v54 = vld [vmem:[%s1041_s30 + $0x1b8] sm:$0xff] }
  0x73   : > { %520 = vmatpush.msra.mxu3 %v344_v35  ;;  %450 = vmatpush.msra.mxu0 %v348_v36  ;;  %v381_v52 = vld [vmem:[%s1041_s30 + $0x1b0] sm:$0xff]  ;;  %v327_v55 = vld [vmem:[%s1041_s30] sm:$0xff]  ;;  %v374_v56 = vld [vmem:[%s1041_s30 + $0x178] sm:$0xff] }
  0x74   : > { %475 = vmatpush.msra.mxu1 %v335_v37  ;;  %498 = vmatpush.msra.mxu2 %v336_v38  ;;  %v373_v57 = vld [vmem:[%s1041_s30 + $0x170] sm:$0xff]  ;;  %v375_v58 = vld [vmem:[%s1041_s30 + $0x180] sm:$0xff]  ;;  %v366_v60 = vld [vmem:[%s1041_s30 + $0x138] sm:$0xff] }
  0x75   : > { %521 = vmatpush.msra.mxu3 %v337_v39  ;;  %451 = vmatpush.msra.mxu0 %v341_v40  ;;  %v367_v59 = vld [vmem:[%s1041_s30 + $0x140] sm:$0xff]  ;;  %v368_v61 = vld [vmem:[%s1041_s30 + $0x148] sm:$0xff]  ;;  %v361_v0 = vld [vmem:[%s1041_s30 + $0x110] sm:$0xff] }
  0x76   : > { %476 = vmatpush.msra.mxu1 %v328_v41  ;;  %499 = vmatpush.msra.mxu2 %v329_v42  ;;  %v359_v62 = vld [vmem:[%s1041_s30 + $0x100] sm:$0xff]  ;;  %v360_v63 = vld [vmem:[%s1041_s30 + $0x108] sm:$0xff]  ;;  %v353_v3 = vld [vmem:[%s1041_s30 + $0xd0] sm:$0xff] }
  0x77   : > { %522 = vmatpush.msra.mxu3 %v330_v43  ;;  %452 = vmatpush.msra.mxu0 %v334_v48  ;;  %v326_v1 = vld [vmem:[%s1205_s0 + $0x8] sm:$0xff]  ;;  %v345_v5 = vld [vmem:[%s1041_s30 + $0x90] sm:$0xff]  ;;  %v347_v7 = vld [vmem:[%s1041_s30 + $0xa0] sm:$0xff] }
  0x78   : > { %757 = vmatpush.msk.msrb.mxu1 %vm416_vm0, %v395_v44  ;;  %760 = vmatpush.msk.msrb.mxu2 %vm416_vm0, %v396_v46  ;;  %v352_v2 = vld [vmem:[%s1041_s30 + $0xc8] sm:$0xff]  ;;  %v354_v4 = vld [vmem:[%s1041_s30 + $0xd8] sm:$0xff]  ;;  %v339_v9 = vld [vmem:[%s1041_s30 + $0x60] sm:$0xff] }
  0x79   : > { %768 = vmatpush.msk.msrb.mxu3 %vm416_vm0, %v394_v45  ;;  %746 = vmatmul.msk.f32.vlgmr.msra.gmra.mxu1 %vm409_vm1, %v1098_v51  ;;  %v346_v6 = vld [vmem:[%s1041_s30 + $0x98] sm:$0xff]  ;;  %v340_v10 = vld [vmem:[%s1041_s30 + $0x68] sm:$0xff]  ;;  %v331_v11 = vld [vmem:[%s1041_s30 + $0x20] sm:$0xff] }
  0x7a   : > { %560 = vmatpush.msrb.mxu1 %v388_v47  ;;  %583 = vmatpush.msrb.mxu2 %v389_v50  ;;  %v338_v8 = vld [vmem:[%s1041_s30 + $0x58] sm:$0xff]  ;;  %v332_v12 = vld [vmem:[%s1041_s30 + $0x28] sm:$0xff]  ;;  %v333_v13 = vld [vmem:[%s1041_s30 + $0x30] sm:$0xff] }
  0x7b   : > { %769 = vmatpush.msrb.mxu3 %v387_v49  ;;  %749 = vmatmul.msk.f32.vlgmr.msra.gmra.mxu2 %vm409_vm1, %v1098_v51  ;;  %v397_v14 = vld [vmem:[%s1207_s2] sm:$0xff]  ;;  %v398_v16 = vld [vmem:[%s1207_s2 + $0x8] sm:$0xff] }
  0x7c   : > { %752 = vmatmul.msk.f32.vlgmr.msra.gmra.mxu3 %vm409_vm1, %v1098_v51  ;;  %561 = vmatpush.msrb.mxu1 %v381_v52 }
  0x7d   : > { %770 = vmatpush.msrb.mxu3 %v380_v53  ;;  %584 = vmatpush.msrb.mxu2 %v382_v54 }
  0x7e   : > { %453 = vmatpush.msra.mxu0 %v327_v55  ;;  %562 = vmatpush.msrb.mxu1 %v374_v56 }
  0x7f   : > { %771 = vmatpush.msrb.mxu3 %v373_v57  ;;  %585 = vmatpush.msrb.mxu2 %v375_v58 }
  0x80   : > { %754 = vmatpush.msk.msrb.mxu0 %vm416_vm0, %v394_v45  ;;  %563 = vmatpush.msrb.mxu1 %v367_v59 }
  0x81   : > { %772 = vmatpush.msrb.mxu3 %v366_v60  ;;  %586 = vmatpush.msrb.mxu2 %v368_v61 }
  0x82   : > { %537 = vmatpush.msrb.mxu0 %v387_v49  ;;  %564 = vmatpush.msrb.mxu1 %v360_v63 }
  0x83   : > { %743 = vmatmul.msk.f32.vlgmr.msra.gmra.mxu0 %vm409_vm1, %v1098_v51  ;;  %773 = vmatpush.msrb.mxu3 %v359_v62 }
  0x84   : > { %538 = vmatpush.msrb.mxu0 %v380_v53  ;;  %587 = vmatpush.msrb.mxu2 %v361_v0 }
  0x85   : > { %747 = vmatmul.msk.f32.gmra.mxu1 %vm409_vm1, %v326_v1  ;;  %750 = vmatmul.msk.f32.gmra.mxu2 %vm409_vm1, %v326_v1 }
  0x86   : > { %753 = vmatmul.msk.f32.gmra.mxu3 %vm409_vm1, %v326_v1  ;;  %539 = vmatpush.msrb.mxu0 %v373_v57 }
  0x87   : > { %774 = vmatpush.msrb.mxu3 %v352_v2  ;;  %565 = vmatpush.msrb.mxu1 %v353_v3 }
  0x88   : > { %588 = vmatpush.msrb.mxu2 %v354_v4  ;;  %540 = vmatpush.msrb.mxu0 %v366_v60 }
  0x89   : > { %775 = vmatpush.msrb.mxu3 %v345_v5  ;;  %566 = vmatpush.msrb.mxu1 %v346_v6 }
  0x8a   : > { %589 = vmatpush.msrb.mxu2 %v347_v7  ;;  %541 = vmatpush.msrb.mxu0 %v359_v62 }
  0x8b   : > { %776 = vmatpush.msrb.mxu3 %v338_v8  ;;  %567 = vmatpush.msrb.mxu1 %v339_v9 }
  0x8c   : > { %590 = vmatpush.msrb.mxu2 %v340_v10  ;;  %744 = vmatmul.msk.f32.gmra.mxu0 %vm409_vm1, %v326_v1 }
  0x8d   : > { %542 = vmatpush.msrb.mxu0 %v352_v2  ;;  %777 = vmatpush.msrb.mxu3 %v331_v11 }
  0x8e   : > { %568 = vmatpush.msrb.mxu1 %v332_v12  ;;  %591 = vmatpush.msrb.mxu2 %v333_v13 }
  0x8f   : > { %806 = vset.pattern.permute.xlu0 %v831_v15  ;;  %756 = vmatmul.msk.f32.vlgmr.msrb.gmra.mxu3 %vm409_vm1, %v326_v1 }
  0x90   : > { %758 = vmatmul.msk.f32.vlgmr.msrb.gmra.mxu1 %vm409_vm1, %v1098_v51  ;;  %761 = vmatmul.msk.f32.vlgmr.msrb.gmra.mxu2 %vm409_vm1, %v1098_v51 }
  0x91   : > { %401 = vperm.xlu0 %806, %v397_v14   ;;  %543 = vmatpush.msrb.mxu0 %v345_v5 }
  0x93   : > { %544 = vmatpush.msrb.mxu0 %v338_v8 }
  0x95   : > { %545 = vmatpush.msrb.mxu0 %v331_v11 }
  0x96   : > { %755 = vmatmul.msk.f32.vlgmr.msrb.gmra.mxu0 %vm409_vm1, %v1098_v51 }
  0x98   : > { %759 = vmatmul.msk.f32.gmra.mxu1 %vm409_vm1, %v326_v1  ;;  %762 = vmatmul.msk.f32.gmra.mxu2 %vm409_vm1, %v326_v1 }
  0x99   : > { %406 = vperm.xlu0 %806, %v398_v16  }
  0xf6   : > { %v478_v17 = vpop.f32.mrf.mxu1 }
  0xfe   : > { %v501_v18 = vpop.f32.mrf.mxu2 }
  0xff   : > { %v524_v20 = vpop.f32.mrf.mxu3 }
 0x100   : > { %v455_v19 = vpop.f32.mrf.mxu0 }
 0x102   : > { %v481_v22 = vpop.f32.mrf.mxu1 }
 0x103   : > { %v402_v21 = vpop.permute.xlu0 %401 }
 0x104   : > { %v479_v23 = vadd.f32 %v478_v17, %v402_v21  ;;  %v456_v24 = vadd.f32 %v455_v19, %v402_v21  ;;  %v502_v25 = vadd.f32 %v501_v18, %v402_v21  ;;  %v525_v26 = vadd.f32 %v524_v20, %v402_v21 }
 0x106   : > { %v600_v27 = vmax.f32 %v479_v23, 0.0  ;;  %v599_v28 = vmax.f32 %v456_v24, 0.0  ;;  %v601_v29 = vmax.f32 %v502_v25, 0.0  ;;  %v602_v30 = vmax.f32 %v525_v26, 0.0 }
 0x108   : > { %614 = vst [vmem:[%s1158_s18 + $0x8] sm:$0xff] %v600_v27  ;;  %v504_v31 = vpop.f32.mrf.mxu2 }
 0x109   : > { %613 = vst [vmem:[%s1158_s18] sm:$0xff] %v599_v28  ;;  %v458_v32 = vpop.f32.mrf.mxu0  ;;  %v527_v33 = vpop.f32.mrf.mxu3 }
 0x10a   : > { %615 = vst [vmem:[%s1158_s18 + $0x10] sm:$0xff] %v601_v29 }
 0x10b   : > { %616 = vst [vmem:[%s1158_s18 + $0x18] sm:$0xff] %v602_v30  ;;  %v407_v34 = vpop.permute.xlu0 %406 }
 0x10c   : > { %v482_v35 = vadd.f32 %v481_v22, %v407_v34  ;;  %v459_v36 = vadd.f32 %v458_v32, %v407_v34  ;;  %v505_v37 = vadd.f32 %v504_v31, %v407_v34  ;;  %v528_v38 = vadd.f32 %v527_v33, %v407_v34 }
 0x10d   : > { %v570_v39 = vpop.f32.mrf.mxu1 }
 0x10e   : > { %v607_v40 = vmax.f32 %v482_v35, 0.0  ;;  %v606_v41 = vmax.f32 %v459_v36, 0.0  ;;  %v608_v42 = vmax.f32 %v505_v37, 0.0  ;;  %v609_v43 = vmax.f32 %v528_v38, 0.0 }
 0x10f   : > { %v571_v44 = vadd.f32 %v570_v39, %v402_v21  ;;  %v651_v62 = vld [vmem:[%s1158_s18 + $0x8] sm:$0xff] (%p882_p5) }
 0x110   : > { %621 = vst [vmem:[%s1158_s18 + $0x40] sm:$0xff] %v607_v40  ;;  %v649_v61 = vld [vmem:[%s1158_s18] sm:$0xff] (%p882_p5) }
 0x111   : > { %620 = vst [vmem:[%s1158_s18 + $0x38] sm:$0xff] %v606_v41  ;;  %v604_v45 = vmax.f32 %v571_v44, 0.0  ;;  %v653_v63 = vld [vmem:[%s1158_s18 + $0x10] sm:$0xff] (%p882_p5) }
 0x112   : > { %622 = vst [vmem:[%s1158_s18 + $0x48] sm:$0xff] %v608_v42  ;;  %v550_v46 = vpop.f32.mrf.mxu3  ;;  %v655_v0 = vld [vmem:[%s1158_s18 + $0x18] sm:$0xff] (%p882_p5) }
 0x113   : > { %623 = vst [vmem:[%s1158_s18 + $0x50] sm:$0xff] %v609_v43  ;;  %v547_v47 = vpop.f32.mrf.mxu0  ;;  %v551_v48 = vadd.f32 %v550_v46, %v407_v34  ;;  %v593_v49 = vpop.f32.mrf.mxu2 }
 0x114   : > { %618 = vst [vmem:[%s1158_s18 + $0x28] sm:$0xff] %v604_v45  ;;  %v548_v50 = vadd.f32 %v547_v47, %v402_v21  ;;  %v594_v51 = vadd.f32 %v593_v49, %v402_v21 }
 0x115   : > { %v610_v52 = vmax.f32 %v551_v48, 0.0  ;;  %v573_v53 = vpop.f32.mrf.mxu1  ;;  %650 = vst [vmem:[%s636_s20] sm:$0xff] (%p882_p5), %v649_v61 }
 0x116   : > { %v603_v54 = vmax.f32 %v548_v50, 0.0  ;;  %v605_v55 = vmax.f32 %v594_v51, 0.0  ;;  %v574_v56 = vadd.f32 %v573_v53, %v407_v34  ;;  %652 = vst [vmem:[%s636_s20 + $0x8] sm:$0xff] (%p882_p5), %v651_v62 }
 0x117   : > { %624 = vst [vmem:[%s1158_s18 + $0x58] sm:$0xff] %v610_v52  ;;  %v665_v5 = vld [vmem:[%s1158_s18 + $0x40] sm:$0xff] (%p882_p5) }
 0x118   : > { %617 = vst [vmem:[%s1158_s18 + $0x20] sm:$0xff] %v603_v54  ;;  %v611_v57 = vmax.f32 %v574_v56, 0.0  ;;  %v663_v4 = vld [vmem:[%s1158_s18 + $0x38] sm:$0xff] (%p882_p5) }
 0x119   : > { %619 = vst [vmem:[%s1158_s18 + $0x30] sm:$0xff] %v605_v55  ;;  %v667_v6 = vld [vmem:[%s1158_s18 + $0x48] sm:$0xff] (%p882_p5) }
 0x11a   : > { %625 = vst [vmem:[%s1158_s18 + $0x60] sm:$0xff] %v611_v57  ;;  %v669_v7 = vld [vmem:[%s1158_s18 + $0x50] sm:$0xff] (%p882_p5) }
 0x11b   : > { %v596_v58 = vpop.f32.mrf.mxu2  ;;  %654 = vst [vmem:[%s636_s20 + $0x10] sm:$0xff] (%p882_p5), %v653_v63  ;;  %v659_v2 = vld [vmem:[%s1158_s18 + $0x28] sm:$0xff] (%p882_p5) }
 0x11c   : > { %v597_v59 = vadd.f32 %v596_v58, %v407_v34  ;;  %633 = sbr.rel (!%p882_p5) target bundleno = 297 (0x129), region = 59  ;;  %656 = vst [vmem:[%s636_s20 + $0x18] sm:$0xff] (%p882_p5), %v655_v0 }
 0x11d   : > { %660 = vst [vmem:[%s636_s20 + $0x28] sm:$0xff] (%p882_p5), %v659_v2 }
 0x11e   : > { %v612_v60 = vmax.f32 %v597_v59, 0.0  ;;  %664 = vst [vmem:[%s636_s20 + $0x70] sm:$0xff] (%p882_p5), %v663_v4  ;;  %v671_v8 = vld [vmem:[%s1158_s18 + $0x58] sm:$0xff] (%p882_p5) }
 0x11f   : > { %v657_v1 = vld [vmem:[%s1158_s18 + $0x20] sm:$0xff] (%p882_p5)  ;;  %666 = vst [vmem:[%s636_s20 + $0x78] sm:$0xff] (%p882_p5), %v665_v5 }
 0x120   : > { %626 = vst [vmem:[%s1158_s18 + $0x68] sm:$0xff] %v612_v60  ;;  %v661_v3 = vld [vmem:[%s1158_s18 + $0x30] sm:$0xff] (%p882_p5) }
 0x121   : > { %658 = vst [vmem:[%s636_s20 + $0x20] sm:$0xff] %v657_v1  ;;  %v673_v9 = vld [vmem:[%s1158_s18 + $0x60] sm:$0xff] }
 0x122   : > { %662 = vst [vmem:[%s636_s20 + $0x30] sm:$0xff] %v661_v3 }
 0x123   : > { %668 = vst [vmem:[%s636_s20 + $0x80] sm:$0xff] %v667_v6 }
 0x124   : > { %670 = vst [vmem:[%s636_s20 + $0x88] sm:$0xff] %v669_v7 }
 0x125   : > { %672 = vst [vmem:[%s636_s20 + $0x90] sm:$0xff] %v671_v8 }
 0x126   : > { %674 = vst [vmem:[%s636_s20 + $0x98] sm:$0xff] %v673_v9 }
 0x127   : > { %v675_v10 = vld [vmem:[%s1158_s18 + $0x68] sm:$0xff] }
 0x128   : > { %676 = vst [vmem:[%s636_s20 + $0xa0] sm:$0xff] %v675_v10 }
 0x129 PF: > { %p10_p10 = scmp.ge.s32.totalorder %s869_s16, 4   ;;  %s1210_s12 = smov %s825_s13 }
 0x12a   : > { %s1211_s13 = smov %s880_s19  ;;  %s1212_s14 = smov %s869_s16 }
 0x12b   :  { %12 = sbr.rel (!%p10_p10) target bundleno = 2 (0x2), region = 113 }

// kernel: encoder_forward.6
= control target key start
LH: loop header
LB: loop body
LE: loop exit
PB: predicated region body
PF: predicated region fallthrough
CT: control target
= control target key end

     0   :  { %s664_s12 = smov 0   ;;  %s666_s13 = smov 0   ;;  %s904_s0 = inlined_call_operand.vmem [shape: f32[32,144], index: 0, kind: input, shape index: {}]   ;;  %s905_s1 = inlined_call_operand.vmem [shape: f32[144,448], index: 1, kind: input, shape index: {}]   ;;  %s906_s2 = inlined_call_operand.vmem [shape: f32[32,1], index: 2, kind: input, shape index: {}]   ;;  %s907_s3 = inlined_call_operand.vmem [shape: f32[32,448], index: 3, kind: output, shape index: {}]  }
   0x1   :  { %s668_s14 = smov 0  }
   0x2 LB: > { %s567_s15 = sadd.s32 4294967295, %s641_s14   ;;  %s681_s16 = sadd.s32 1, %s641_s14   ;;  %s641_s14 = sphi %s668_s14, %s911_s14   ;;  %s637_s13 = sphi %s666_s13, %s910_s13   ;;  %s633_s12 = sphi %s664_s12, %s909_s12  }
   0x3   : > { %s38_s17 = ssub.s32 %s641_s14, %s681_s16  ;;  %s41_s18 = sadd.s32 1, %s637_s13 }
   0x4   : > { %p39_p0 = scmp.eq.s32.totalorder %s38_s17, 0  ;;  %p48_p1 = scmp.ne.s32.totalorder %s637_s13, %s633_s12 }
   0x5   : > { %p49_p2 = scmp.eq.s32.totalorder %s641_s14, 0  ;;  %p99_p3 = scmp.eq.s32.totalorder %s567_s15, 1 }
   0x6   : > { %s692_s19 = scalar_select %p39_p0, %s637_s13, %s41_s18  }
   0x7   : > { %p50_p4 = por %p49_p2, %p48_p1  ;;  %p694_p5 = por %p99_p3, %p48_p1 }
   0x8   : > { %p570_p6 = scmp.ge.s32.totalorder %s641_s14, 2 }
   0xa   : > { %127 = sbr.rel (%p570_p6) target bundleno = 55 (0x37), region = 24 }
   0xf   : > { %130 = sbr.rel (!%p50_p4) target bundleno = 55 (0x37), region = 28  ;;  %s132_s21 = sand.u32 (%p50_p4), 1, %s637_s13  }
  0x10   : > { %s588_s22 = sshll.u32 (%p50_p4), %s641_s14, 4  ;;  %s590_s23 = smul.u32 (%p50_p4), 288, %s132_s21 }
  0x11   : > { %s704_s26 = scalar_lea.vmem (%p50_p4), %s905_s1, %s588_s22 }
  0x12   : > { %v150_v0 = vld [vmem:[%s704_s26] sm:$0xff] (%p50_p4)  ;;  %v152_v1 = vld [vmem:[%s704_s26 + $0x8] sm:$0xff] (%p50_p4)  ;;  %s709_s27 = scalar_lea.vmem (%p50_p4), [#allocation2], %s590_s23 }
  0x13   : > { %v154_v2 = vld [vmem:[%s704_s26 + $0x20] sm:$0xff] (%p50_p4)  ;;  %151 = vst [vmem:[%s709_s27] sm:$0xff] (%p50_p4), %v150_v0  ;;  %v156_v3 = vld [vmem:[%s704_s26 + $0x28] sm:$0xff] (%p50_p4) }
  0x14   : > { %153 = vst [vmem:[%s709_s27 + $0x8] sm:$0xff] %v152_v1  ;;  %v158_v4 = vld [vmem:[%s704_s26 + $0x40] sm:$0xff]  ;;  %v160_v5 = vld [vmem:[%s704_s26 + $0x48] sm:$0xff] }
  0x15   : > { %155 = vst [vmem:[%s709_s27 + $0x10] sm:$0xff] %v154_v2  ;;  %v162_v6 = vld [vmem:[%s704_s26 + $0x60] sm:$0xff]  ;;  %v164_v7 = vld [vmem:[%s704_s26 + $0x68] sm:$0xff] }
  0x16   : > { %157 = vst [vmem:[%s709_s27 + $0x18] sm:$0xff] %v156_v3  ;;  %v166_v8 = vld [vmem:[%s704_s26 + $0x80] sm:$0xff]  ;;  %v168_v9 = vld [vmem:[%s704_s26 + $0x88] sm:$0xff] }
  0x17   : > { %159 = vst [vmem:[%s709_s27 + $0x20] sm:$0xff] %v158_v4  ;;  %v170_v10 = vld [vmem:[%s704_s26 + $0xa0] sm:$0xff]  ;;  %v172_v11 = vld [vmem:[%s704_s26 + $0xa8] sm:$0xff] }
  0x18   : > { %161 = vst [vmem:[%s709_s27 + $0x28] sm:$0xff] %v160_v5  ;;  %v174_v12 = vld [vmem:[%s704_s26 + $0xc0] sm:$0xff]  ;;  %v176_v13 = vld [vmem:[%s704_s26 + $0xc8] sm:$0xff] }
  0x19   : > { %163 = vst [vmem:[%s709_s27 + $0x30] sm:$0xff] %v162_v6  ;;  %v178_v14 = vld [vmem:[%s704_s26 + $0xe0] sm:$0xff]  ;;  %v180_v15 = vld [vmem:[%s704_s26 + $0xe8] sm:$0xff] }
  0x1a   : > { %165 = vst [vmem:[%s709_s27 + $0x38] sm:$0xff] %v164_v7  ;;  %v182_v16 = vld [vmem:[%s704_s26 + $0x100] sm:$0xff]  ;;  %v184_v17 = vld [vmem:[%s704_s26 + $0x108] sm:$0xff] }
  0x1b   : > { %167 = vst [vmem:[%s709_s27 + $0x40] sm:$0xff] %v166_v8  ;;  %v186_v18 = vld [vmem:[%s704_s26 + $0x120] sm:$0xff]  ;;  %v188_v19 = vld [vmem:[%s704_s26 + $0x128] sm:$0xff] }
  0x1c   : > { %169 = vst [vmem:[%s709_s27 + $0x48] sm:$0xff] %v168_v9  ;;  %v190_v20 = vld [vmem:[%s704_s26 + $0x140] sm:$0xff]  ;;  %v192_v21 = vld [vmem:[%s704_s26 + $0x148] sm:$0xff] }
  0x1d   : > { %171 = vst [vmem:[%s709_s27 + $0x50] sm:$0xff] %v170_v10  ;;  %v194_v22 = vld [vmem:[%s704_s26 + $0x160] sm:$0xff]  ;;  %v196_v23 = vld [vmem:[%s704_s26 + $0x168] sm:$0xff] }
  0x1e   : > { %173 = vst [vmem:[%s709_s27 + $0x58] sm:$0xff] %v172_v11  ;;  %v198_v24 = vld [vmem:[%s704_s26 + $0x180] sm:$0xff]  ;;  %v200_v25 = vld [vmem:[%s704_s26 + $0x188] sm:$0xff] }
  0x1f   : > { %175 = vst [vmem:[%s709_s27 + $0x60] sm:$0xff] %v174_v12  ;;  %v202_v26 = vld [vmem:[%s704_s26 + $0x1a0] sm:$0xff]  ;;  %v204_v27 = vld [vmem:[%s704_s26 + $0x1a8] sm:$0xff] }
  0x20   : > { %177 = vst [vmem:[%s709_s27 + $0x68] sm:$0xff] %v176_v13  ;;  %v206_v28 = vld [vmem:[%s704_s26 + $0x1c0] sm:$0xff]  ;;  %v208_v29 = vld [vmem:[%s704_s26 + $0x1c8] sm:$0xff] }
  0x21   : > { %179 = vst [vmem:[%s709_s27 + $0x70] sm:$0xff] %v178_v14  ;;  %v210_v30 = vld [vmem:[%s704_s26 + $0x1e0] sm:$0xff]  ;;  %v212_v31 = vld [vmem:[%s704_s26 + $0x1e8] sm:$0xff] }
  0x22   : > { %181 = vst [vmem:[%s709_s27 + $0x78] sm:$0xff] %v180_v15  ;;  %v214_v32 = vld [vmem:[%s704_s26 + $0x200] sm:$0xff]  ;;  %v216_v33 = vld [vmem:[%s704_s26 + $0x208] sm:$0xff] }
  0x23   : > { %183 = vst [vmem:[%s709_s27 + $0x80] sm:$0xff] %v182_v16  ;;  %v218_v34 = vld [vmem:[%s704_s26 + $0x220] sm:$0xff]  ;;  %v220_v35 = vld [vmem:[%s704_s26 + $0x228] sm:$0xff] }
  0x24   : > { %185 = vst [vmem:[%s709_s27 + $0x88] sm:$0xff] %v184_v17 }
  0x25   : > { %187 = vst [vmem:[%s709_s27 + $0x90] sm:$0xff] %v186_v18 }
  0x26   : > { %189 = vst [vmem:[%s709_s27 + $0x98] sm:$0xff] %v188_v19 }
  0x27   : > { %191 = vst [vmem:[%s709_s27 + $0xa0] sm:$0xff] %v190_v20 }
  0x28   : > { %193 = vst [vmem:[%s709_s27 + $0xa8] sm:$0xff] %v192_v21 }
  0x29   : > { %195 = vst [vmem:[%s709_s27 + $0xb0] sm:$0xff] %v194_v22 }
  0x2a   : > { %197 = vst [vmem:[%s709_s27 + $0xb8] sm:$0xff] %v196_v23 }
  0x2b   : > { %199 = vst [vmem:[%s709_s27 + $0xc0] sm:$0xff] %v198_v24 }
  0x2c   : > { %201 = vst [vmem:[%s709_s27 + $0xc8] sm:$0xff] %v200_v25 }
  0x2d   : > { %203 = vst [vmem:[%s709_s27 + $0xd0] sm:$0xff] %v202_v26 }
  0x2e   : > { %205 = vst [vmem:[%s709_s27 + $0xd8] sm:$0xff] %v204_v27 }
  0x2f   : > { %207 = vst [vmem:[%s709_s27 + $0xe0] sm:$0xff] %v206_v28 }
  0x30   : > { %209 = vst [vmem:[%s709_s27 + $0xe8] sm:$0xff] %v208_v29 }
  0x31   : > { %211 = vst [vmem:[%s709_s27 + $0xf0] sm:$0xff] %v210_v30 }
  0x32   : > { %213 = vst [vmem:[%s709_s27 + $0xf8] sm:$0xff] %v212_v31 }
  0x33   : > { %215 = vst [vmem:[%s709_s27 + $0x100] sm:$0xff] %v214_v32 }
  0x34   : > { %217 = vst [vmem:[%s709_s27 + $0x108] sm:$0xff] %v216_v33 }
  0x35   : > { %219 = vst [vmem:[%s709_s27 + $0x110] sm:$0xff] %v218_v34 }
  0x36   : > { %221 = vst [vmem:[%s709_s27 + $0x118] sm:$0xff] %v220_v35 }
  0x37 PF: > { %p573_p7 = scmp.ge.s32.totalorder %s641_s14, 1  ;;  %p226_p8 = scmp.lt.s32.totalorder %s641_s14, 3 }
  0x39   : > { %p227_p9 = pnand %p573_p7, %p226_p8 }
  0x3a   : > { %s233_s28 = sand.u32 (!%p227_p9), 1, %s633_s12  }
  0x3b   : > { %230 = sbr.rel (%p227_p9) target bundleno = 267 (0x10b), region = 51  ;;  %s574_s9 = sshll.u32 (!%p227_p9), %s233_s28, 6 }
  0x3c   : > { %s591_s29 = smul.u32 (!%p227_p9), 288, %s233_s28  ;;  %s869_s10 = scalar_lea.vmem (!%p227_p9), [#allocation3], %s574_s9 }
  0x3e   : > { %s785_s30 = scalar_lea.vmem (!%p227_p9), [#allocation2], %s591_s29 }
  0x40   : > { %v295_v36 = vld [vmem:[%s785_s30 + $0xf0] sm:$0xff]  ;;  %v296_v37 = vld [vmem:[%s785_s30 + $0xf8] sm:$0xff]  ;;  %v293_v38 = vld [vmem:[%s785_s30 + $0xe0] sm:$0xff]  ;;  %v643_v51 = vmov 0   ;;  %vm325_vm0 = vcmask 130048   ;;  %s589_s12 = sshll.u32 (%p694_p5), %s567_s15, 4 }
  0x41   : > { %338 = vmatpush.msra.mxu0 %v295_v36  ;;  %396 = vmatpush.msra.mxu2 %v296_v37  ;;  %v294_v39 = vld [vmem:[%s785_s30 + $0xe8] sm:$0xff]  ;;  %v291_v40 = vld [vmem:[%s785_s30 + $0xd0] sm:$0xff]  ;;  %v292_v41 = vld [vmem:[%s785_s30 + $0xd8] sm:$0xff]  ;;  %s479_s17 = scalar_lea.vmem (%p694_p5), %s907_s3, %s589_s12 }
  0x42   : > { %v289_v42 = vld [vmem:[%s785_s30 + $0xc0] sm:$0xff]  ;;  %v290_v43 = vld [vmem:[%s785_s30 + $0xc8] sm:$0xff]  ;;  %v287_v44 = vld [vmem:[%s785_s30 + $0xb0] sm:$0xff]  ;;  %617 = vset.pattern.permute.xlu0 %v643_v51  ;;  %618 = vset.pattern.permute.xlu1 %v643_v51 }
  0x43   : > { %339 = vmatpush.msra.mxu0 %v293_v38  ;;  %397 = vmatpush.msra.mxu2 %v294_v39  ;;  %v288_v45 = vld [vmem:[%s785_s30 + $0xb8] sm:$0xff]  ;;  %v285_v46 = vld [vmem:[%s785_s30 + $0xa0] sm:$0xff]  ;;  %v286_v47 = vld [vmem:[%s785_s30 + $0xa8] sm:$0xff] }
  0x44   : > { %v283_v48 = vld [vmem:[%s785_s30 + $0x90] sm:$0xff]  ;;  %v284_v49 = vld [vmem:[%s785_s30 + $0x98] sm:$0xff]  ;;  %v297_v53 = vld [vmem:[%s785_s30 + $0x100] sm:$0xff] }
  0x45   : > { %340 = vmatpush.msra.mxu0 %v291_v40  ;;  %398 = vmatpush.msra.mxu2 %v292_v41  ;;  %v299_v50 = vld [vmem:[%s785_s30 + $0x110] sm:$0xff]  ;;  %v300_v52 = vld [vmem:[%s785_s30 + $0x118] sm:$0xff]  ;;  %v298_v54 = vld [vmem:[%s785_s30 + $0x108] sm:$0xff] }
  0x46   : > { %v281_v55 = vld [vmem:[%s785_s30 + $0x80] sm:$0xff]  ;;  %v282_v56 = vld [vmem:[%s785_s30 + $0x88] sm:$0xff]  ;;  %381 = vmatpush.msra.mxu1 %v299_v50  ;;  %439 = vmatpush.msra.mxu3 %v300_v52  ;;  %v279_v58 = vld [vmem:[%s785_s30 + $0x70] sm:$0xff] }
  0x47   : > { %341 = vmatpush.msra.mxu0 %v289_v42  ;;  %399 = vmatpush.msra.mxu2 %v290_v43  ;;  %v258_v57 = vld [vmem:[%s904_s0 + $0x8] sm:$0xff]  ;;  %v280_v59 = vld [vmem:[%s785_s30 + $0x78] sm:$0xff]  ;;  %v277_v60 = vld [vmem:[%s785_s30 + $0x60] sm:$0xff] }
  0x48   : > { %382 = vmatpush.msra.mxu1 %v297_v53  ;;  %440 = vmatpush.msra.mxu3 %v298_v54  ;;  %v278_v61 = vld [vmem:[%s785_s30 + $0x68] sm:$0xff]  ;;  %v301_v62 = vld [vmem:[%s906_s2] sm:$0xff]  ;;  %v275_v63 = vld [vmem:[%s785_s30 + $0x50] sm:$0xff] }
  0x49   : > { %342 = vmatpush.msra.mxu0 %v287_v44  ;;  %400 = vmatpush.msra.mxu2 %v288_v45  ;;  %v276_v0 = vld [vmem:[%s785_s30 + $0x58] sm:$0xff]  ;;  %v273_v1 = vld [vmem:[%s785_s30 + $0x40] sm:$0xff]  ;;  %v274_v2 = vld [vmem:[%s785_s30 + $0x48] sm:$0xff] }
  0x4a   : > { %575 = vmatmul.msk.f32.vlgmr.msra.gmra.mxu1 %vm325_vm0, %v258_v57  ;;  %579 = vmatmul.msk.f32.vlgmr.msra.gmra.mxu3 %vm325_vm0, %v258_v57  ;;  %v260_v3 = vld [vmem:[%s904_s0 + $0x18] sm:$0xff]  ;;  %v271_v4 = vld [vmem:[%s785_s30 + $0x30] sm:$0xff]  ;;  %v269_v6 = vld [vmem:[%s785_s30 + $0x20] sm:$0xff] }
  0x4b   : > { %343 = vmatpush.msra.mxu0 %v285_v46  ;;  %401 = vmatpush.msra.mxu2 %v286_v47  ;;  %v272_v5 = vld [vmem:[%s785_s30 + $0x38] sm:$0xff]  ;;  %v270_v7 = vld [vmem:[%s785_s30 + $0x28] sm:$0xff]  ;;  %v303_v8 = vld [vmem:[%s906_s2 + $0x10] sm:$0xff] }
  0x4c   : > { %307 = vperm.xlu0 %617, %v301_v62   ;;  %v302_v9 = vld [vmem:[%s906_s2 + $0x8] sm:$0xff]  ;;  %v267_v10 = vld [vmem:[%s785_s30 + $0x10] sm:$0xff]  ;;  %v268_v11 = vld [vmem:[%s785_s30 + $0x18] sm:$0xff]  ;;  %317 = vperm.xlu1 %618, %v303_v8  }
  0x4d   : > { %344 = vmatpush.msra.mxu0 %v283_v48  ;;  %402 = vmatpush.msra.mxu2 %v284_v49  ;;  %v265_v12 = vld [vmem:[%s785_s30] sm:$0xff]  ;;  %v266_v13 = vld [vmem:[%s785_s30 + $0x8] sm:$0xff]  ;;  %v304_v16 = vld [vmem:[%s906_s2 + $0x18] sm:$0xff] }
  0x4e   : > { %v257_v14 = vld [vmem:[%s904_s0] sm:$0xff]  ;;  %v262_v15 = vld [vmem:[%s904_s0 + $0x28] sm:$0xff]  ;;  %v259_v17 = vld [vmem:[%s904_s0 + $0x10] sm:$0xff] }
  0x4f   : > { %345 = vmatpush.msra.mxu0 %v281_v55  ;;  %403 = vmatpush.msra.mxu2 %v282_v56  ;;  %v264_v18 = vld [vmem:[%s904_s0 + $0x38] sm:$0xff]  ;;  %v261_v19 = vld [vmem:[%s904_s0 + $0x20] sm:$0xff]  ;;  %v263_v20 = vld [vmem:[%s904_s0 + $0x30] sm:$0xff] }
  0x51   : > { %346 = vmatpush.msra.mxu0 %v279_v58  ;;  %404 = vmatpush.msra.mxu2 %v280_v59 }
  0x52   : > { %576 = vmatmul.msk.f32.gmra.mxu1 %vm325_vm0, %v260_v3  ;;  %580 = vmatmul.msk.f32.gmra.mxu3 %vm325_vm0, %v260_v3 }
  0x53   : > { %347 = vmatpush.msra.mxu0 %v277_v60  ;;  %405 = vmatpush.msra.mxu2 %v278_v61 }
  0x54   : > { %312 = vperm.xlu0 %617, %v302_v9   ;;  %322 = vperm.xlu1 %618, %v304_v16  }
  0x55   : > { %348 = vmatpush.msra.mxu0 %v275_v63  ;;  %406 = vmatpush.msra.mxu2 %v276_v0 }
  0x57   : > { %349 = vmatpush.msra.mxu0 %v273_v1  ;;  %407 = vmatpush.msra.mxu2 %v274_v2 }
  0x59   : > { %350 = vmatpush.msra.mxu0 %v271_v4  ;;  %408 = vmatpush.msra.mxu2 %v272_v5 }
  0x5a   : > { %577 = vmatmul.msk.f32.gmra.mxu1 %vm325_vm0, %v262_v15  ;;  %581 = vmatmul.msk.f32.gmra.mxu3 %vm325_vm0, %v262_v15 }
  0x5b   : > { %351 = vmatpush.msra.mxu0 %v269_v6  ;;  %409 = vmatpush.msra.mxu2 %v270_v7 }
  0x5d   : > { %352 = vmatpush.msra.mxu0 %v267_v10  ;;  %410 = vmatpush.msra.mxu2 %v268_v11 }
  0x5f   : > { %353 = vmatpush.msra.mxu0 %v265_v12  ;;  %411 = vmatpush.msra.mxu2 %v266_v13 }
  0x60   : > { %354 = vmatmul.f32.vlgmr.msra.gmra.mxu0 %v257_v14  ;;  %412 = vmatmul.f32.vlgmr.msra.gmra.mxu2 %v257_v14 }
  0x62   : > { %578 = vmatmul.msk.f32.gmra.mxu1 %vm325_vm0, %v264_v18  ;;  %582 = vmatmul.msk.f32.gmra.mxu3 %vm325_vm0, %v264_v18 }
  0x68   : > { %357 = vmatmul.f32.gmra.mxu0 %v259_v17  ;;  %415 = vmatmul.f32.gmra.mxu2 %v259_v17 }
  0x70   : > { %360 = vmatmul.f32.gmra.mxu0 %v261_v19  ;;  %418 = vmatmul.f32.gmra.mxu2 %v261_v19 }
  0x78   : > { %363 = vmatmul.f32.gmra.mxu0 %v263_v20  ;;  %421 = vmatmul.f32.gmra.mxu2 %v263_v20 }
  0xbe   : > { %v308_v22 = vpop.permute.xlu0 %307  ;;  %v318_v38 = vpop.permute.xlu1 %317 }
  0xc6   : > { %v313_v30 = vpop.permute.xlu0 %312  ;;  %v323_v51 = vpop.permute.xlu1 %322 }
  0xc7   : > { %v384_v21 = vpop.f32.mrf.mxu1 }
  0xcd   : > { %v442_v24 = vpop.f32.mrf.mxu3 }
  0xcf   : > { %v387_v27 = vpop.f32.mrf.mxu1 }
  0xd5   : > { %v445_v35 = vpop.f32.mrf.mxu3 }
  0xd7   : > { %v390_v41 = vpop.f32.mrf.mxu1 }
  0xdd   : > { %v355_v23 = vpop.f32.mrf.mxu0  ;;  %v448_v48 = vpop.f32.mrf.mxu3 }
  0xde   : > { %v356_v25 = vadd.f32 %v355_v23, %v308_v22 }
  0xdf   : > { %v393_v54 = vpop.f32.mrf.mxu1 }
  0xe0   : > { %v385_v26 = vadd.f32 %v384_v21, %v356_v25 }
  0xe2   : > { %v454_v28 = vmax.f32 %v385_v26, 0.0 }
  0xe3   : > { %v413_v29 = vpop.f32.mrf.mxu2 }
  0xe4   : > { %462 = vst [vmem:[%s869_s10] sm:$0xff] %v454_v28  ;;  %v414_v31 = vadd.f32 %v413_v29, %v308_v22 }
  0xe5   : > { %v358_v32 = vpop.f32.mrf.mxu0  ;;  %v451_v61 = vpop.f32.mrf.mxu3 }
  0xe6   : > { %v443_v33 = vadd.f32 %v442_v24, %v414_v31  ;;  %v359_v34 = vadd.f32 %v358_v32, %v313_v30 }
  0xe8   : > { %v455_v36 = vmax.f32 %v443_v33, 0.0  ;;  %v388_v37 = vadd.f32 %v387_v27, %v359_v34 }
  0xea   : > { %463 = vst [vmem:[%s869_s10 + $0x8] sm:$0xff] %v455_v36  ;;  %v456_v39 = vmax.f32 %v388_v37, 0.0 }
  0xeb   : > { %v416_v40 = vpop.f32.mrf.mxu2  ;;  %v492_v1 = vld [vmem:[%s869_s10] sm:$0xff] (%p694_p5) }
  0xec   : > { %464 = vst [vmem:[%s869_s10 + $0x10] sm:$0xff] %v456_v39  ;;  %v417_v42 = vadd.f32 %v416_v40, %v313_v30 }
  0xed   : > { %v361_v43 = vpop.f32.mrf.mxu0  ;;  %493 = vst [vmem:[%s479_s17] sm:$0xff] (%p694_p5), %v492_v1 }
  0xee   : > { %v362_v44 = vadd.f32 %v361_v43, %v318_v38  ;;  %v446_v45 = vadd.f32 %v445_v35, %v417_v42 }
  0xf0   : > { %v457_v46 = vmax.f32 %v446_v45, 0.0  ;;  %v391_v47 = vadd.f32 %v390_v41, %v362_v44 }
  0xf1   : > { %v494_v2 = vld [vmem:[%s869_s10 + $0x8] sm:$0xff] (%p694_p5) }
  0xf2   : > { %465 = vst [vmem:[%s869_s10 + $0x18] sm:$0xff] %v457_v46  ;;  %v458_v49 = vmax.f32 %v391_v47, 0.0 }
  0xf3   : > { %v419_v50 = vpop.f32.mrf.mxu2  ;;  %v496_v3 = vld [vmem:[%s869_s10 + $0x10] sm:$0xff] (%p694_p5)  ;;  %495 = vst [vmem:[%s479_s17 + $0x8] sm:$0xff] (%p694_p5), %v494_v2 }
  0xf4   : > { %466 = vst [vmem:[%s869_s10 + $0x20] sm:$0xff] %v458_v49  ;;  %v420_v52 = vadd.f32 %v419_v50, %v318_v38 }
  0xf5   : > { %v364_v53 = vpop.f32.mrf.mxu0  ;;  %497 = vst [vmem:[%s479_s17 + $0x20] sm:$0xff] (%p694_p5), %v496_v3 }
  0xf6   : > { %v365_v55 = vadd.f32 %v364_v53, %v323_v51  ;;  %v449_v56 = vadd.f32 %v448_v48, %v420_v52 }
  0xf8   : > { %v459_v57 = vmax.f32 %v449_v56, 0.0  ;;  %v394_v58 = vadd.f32 %v393_v54, %v365_v55 }
  0xf9   : > { %v498_v4 = vld [vmem:[%s869_s10 + $0x18] sm:$0xff] (%p694_p5) }
  0xfa   : > { %467 = vst [vmem:[%s869_s10 + $0x28] sm:$0xff] %v459_v57  ;;  %v460_v59 = vmax.f32 %v394_v58, 0.0 }
  0xfb   : > { %v422_v60 = vpop.f32.mrf.mxu2  ;;  %v500_v5 = vld [vmem:[%s869_s10 + $0x20] sm:$0xff] (%p694_p5)  ;;  %499 = vst [vmem:[%s479_s17 + $0x28] sm:$0xff] (%p694_p5), %v498_v4 }
  0xfc   : > { %468 = vst [vmem:[%s869_s10 + $0x30] sm:$0xff] %v460_v59  ;;  %v423_v62 = vadd.f32 %v422_v60, %v323_v51 }
  0xfd   : > { %501 = vst [vmem:[%s479_s17 + $0x40] sm:$0xff] (%p694_p5), %v500_v5 }
  0xfe   : > { %v452_v63 = vadd.f32 %v451_v61, %v423_v62  ;;  %476 = sbr.rel (!%p694_p5) target bundleno = 267 (0x10b), region = 59 }
 0x100   : > { %v461_v0 = vmax.f32 %v452_v63, 0.0 }
 0x101   : > { %v502_v6 = vld [vmem:[%s869_s10 + $0x28] sm:$0xff] (%p694_p5) }
 0x102   : > { %469 = vst [vmem:[%s869_s10 + $0x38] sm:$0xff] %v461_v0 }
 0x103   : > { %v504_v7 = vld [vmem:[%s869_s10 + $0x30] sm:$0xff]  ;;  %503 = vst [vmem:[%s479_s17 + $0x48] sm:$0xff] %v502_v6 }
 0x104   : > { %505 = vst [vmem:[%s479_s17 + $0x60] sm:$0xff] %v504_v7 }
 0x109   : > { %v506_v8 = vld [vmem:[%s869_s10 + $0x38] sm:$0xff] }
 0x10a   : > { %507 = vst [vmem:[%s479_s17 + $0x68] sm:$0xff] %v506_v8 }
 0x10b PF: > { %p10_p10 = scmp.ge.s32.totalorder %s681_s16, 4   ;;  %s909_s12 = smov %s637_s13 }
 0x10c   : > { %s910_s13 = smov %s692_s19  ;;  %s911_s14 = smov %s681_s16 }
 0x10d   :  { %12 = sbr.rel (!%p10_p10) target bundleno = 2 (0x2), region = 113 }

// kernel: encoder_forward.7
= control target key start
LH: loop header
LB: loop body
LE: loop exit
PB: predicated region body
PF: predicated region fallthrough
CT: control target
= control target key end

     0   :  { %s826_s12 = smov 0   ;;  %s828_s13 = smov 0   ;;  %s1126_s0 = inlined_call_operand.vmem [shape: f32[48,384], index: 0, kind: input, shape index: {}]   ;;  %s1127_s1 = inlined_call_operand.vmem [shape: f32[384,224], index: 1, kind: input, shape index: {}]   ;;  %s1128_s2 = inlined_call_operand.vmem [shape: f32[48,1], index: 2, kind: input, shape index: {}]   ;;  %s1129_s3 = inlined_call_operand.vmem [shape: f32[48,224], index: 3, kind: output, shape index: {}]  }
   0x1   :  { %s830_s14 = smov 0  }
   0x2 LB: > { %s725_s15 = sadd.s32 4294967295, %s803_s14   ;;  %s843_s16 = sadd.s32 1, %s803_s14   ;;  %s803_s14 = sphi %s830_s14, %s1133_s14   ;;  %s799_s13 = sphi %s828_s13, %s1132_s13   ;;  %s795_s12 = sphi %s826_s12, %s1131_s12  }
   0x3   : > { %s38_s17 = ssub.s32 %s803_s14, %s843_s16  ;;  %s41_s18 = sadd.s32 1, %s799_s13 }
   0x4   : > { %p39_p0 = scmp.eq.s32.totalorder %s38_s17, 0  ;;  %p48_p1 = scmp.ne.s32.totalorder %s799_s13, %s795_s12 }
   0x5   : > { %p49_p2 = scmp.eq.s32.totalorder %s803_s14, 0  ;;  %p99_p3 = scmp.eq.s32.totalorder %s725_s15, 1 }
   0x6   : > { %s854_s19 = scalar_select %p39_p0, %s799_s13, %s41_s18  }
   0x7   : > { %p50_p4 = por %p49_p2, %p48_p1  ;;  %p856_p5 = por %p99_p3, %p48_p1 }
   0x8   : > { %p728_p6 = scmp.ge.s32.totalorder %s803_s14, 2 }
   0xa   : > { %127 = sbr.rel (%p728_p6) target bundleno = 67 (0x43), region = 24 }
   0xf   : > { %130 = sbr.rel (!%p50_p4) target bundleno = 67 (0x43), region = 28  ;;  %s132_s21 = sand.u32 (%p50_p4), 1, %s799_s13  }
  0x10   : > { %s729_s22 = sshll.u32 (%p50_p4), %s803_s14, 3  ;;  %s750_s23 = smul.u32 (%p50_p4), 384, %s132_s21 }
  0x11   : > { %s866_s26 = scalar_lea.vmem (%p50_p4), %s1127_s1, %s729_s22 }
  0x12   : > { %v259_v0 = vld [vmem:[%s866_s26] sm:$0xff] (%p50_p4)  ;;  %v261_v1 = vld [vmem:[%s866_s26 + $0x10] sm:$0xff] (%p50_p4)  ;;  %s871_s27 = scalar_lea.vmem (%p50_p4), [#allocation2], %s750_s23 }
  0x13   : > { %v263_v2 = vld [vmem:[%s866_s26 + $0x20] sm:$0xff] (%p50_p4)  ;;  %260 = vst [vmem:[%s871_s27] sm:$0xff] (%p50_p4), %v259_v0  ;;  %v265_v3 = vld [vmem:[%s866_s26 + $0x30] sm:$0xff] (%p50_p4) }
  0x14   : > { %262 = vst [vmem:[%s871_s27 + $0x8] sm:$0xff] %v261_v1  ;;  %v267_v4 = vld [vmem:[%s866_s26 + $0x40] sm:$0xff]  ;;  %v269_v5 = vld [vmem:[%s866_s26 + $0x50] sm:$0xff] }
  0x15   : > { %264 = vst [vmem:[%s871_s27 + $0x10] sm:$0xff] %v263_v2  ;;  %v271_v6 = vld [vmem:[%s866_s26 + $0x60] sm:$0xff]  ;;  %v273_v7 = vld [vmem:[%s866_s26 + $0x70] sm:$0xff] }
  0x16   : > { %266 = vst [vmem:[%s871_s27 + $0x18] sm:$0xff] %v265_v3  ;;  %v275_v8 = vld [vmem:[%s866_s26 + $0x80] sm:$0xff]  ;;  %v277_v9 = vld [vmem:[%s866_s26 + $0x90] sm:$0xff] }
  0x17   : > { %268 = vst [vmem:[%s871_s27 + $0x20] sm:$0xff] %v267_v4  ;;  %v279_v10 = vld [vmem:[%s866_s26 + $0xa0] sm:$0xff]  ;;  %v281_v11 = vld [vmem:[%s866_s26 + $0xb0] sm:$0xff] }
  0x18   : > { %270 = vst [vmem:[%s871_s27 + $0x28] sm:$0xff] %v269_v5  ;;  %v283_v12 = vld [vmem:[%s866_s26 + $0xc0] sm:$0xff]  ;;  %v285_v13 = vld [vmem:[%s866_s26 + $0xd0] sm:$0xff] }
  0x19   : > { %272 = vst [vmem:[%s871_s27 + $0x30] sm:$0xff] %v271_v6  ;;  %v287_v14 = vld [vmem:[%s866_s26 + $0xe0] sm:$0xff]  ;;  %v289_v15 = vld [vmem:[%s866_s26 + $0xf0] sm:$0xff] }
  0x1a   : > { %274 = vst [vmem:[%s871_s27 + $0x38] sm:$0xff] %v273_v7  ;;  %v291_v16 = vld [vmem:[%s866_s26 + $0x100] sm:$0xff]  ;;  %v293_v17 = vld [vmem:[%s866_s26 + $0x110] sm:$0xff] }
  0x1b   : > { %276 = vst [vmem:[%s871_s27 + $0x40] sm:$0xff] %v275_v8  ;;  %v295_v18 = vld [vmem:[%s866_s26 + $0x120] sm:$0xff]  ;;  %v297_v19 = vld [vmem:[%s866_s26 + $0x130] sm:$0xff] }
  0x1c   : > { %278 = vst [vmem:[%s871_s27 + $0x48] sm:$0xff] %v277_v9  ;;  %v299_v20 = vld [vmem:[%s866_s26 + $0x140] sm:$0xff]  ;;  %v301_v21 = vld [vmem:[%s866_s26 + $0x150] sm:$0xff] }
  0x1d   : > { %280 = vst [vmem:[%s871_s27 + $0x50] sm:$0xff] %v279_v10  ;;  %v303_v22 = vld [vmem:[%s866_s26 + $0x160] sm:$0xff]  ;;  %v305_v23 = vld [vmem:[%s866_s26 + $0x170] sm:$0xff] }
  0x1e   : > { %282 = vst [vmem:[%s871_s27 + $0x58] sm:$0xff] %v281_v11  ;;  %v307_v24 = vld [vmem:[%s866_s26 + $0x180] sm:$0xff]  ;;  %v309_v25 = vld [vmem:[%s866_s26 + $0x190] sm:$0xff] }
  0x1f   : > { %284 = vst [vmem:[%s871_s27 + $0x60] sm:$0xff] %v283_v12  ;;  %v311_v26 = vld [vmem:[%s866_s26 + $0x1a0] sm:$0xff]  ;;  %v313_v27 = vld [vmem:[%s866_s26 + $0x1b0] sm:$0xff] }
  0x20   : > { %286 = vst [vmem:[%s871_s27 + $0x68] sm:$0xff] %v285_v13  ;;  %v315_v28 = vld [vmem:[%s866_s26 + $0x1c0] sm:$0xff]  ;;  %v317_v29 = vld [vmem:[%s866_s26 + $0x1d0] sm:$0xff] }
  0x21   : > { %288 = vst [vmem:[%s871_s27 + $0x70] sm:$0xff] %v287_v14  ;;  %v319_v30 = vld [vmem:[%s866_s26 + $0x1e0] sm:$0xff]  ;;  %v321_v31 = vld [vmem:[%s866_s26 + $0x1f0] sm:$0xff] }
  0x22   : > { %290 = vst [vmem:[%s871_s27 + $0x78] sm:$0xff] %v289_v15  ;;  %v323_v32 = vld [vmem:[%s866_s26 + $0x200] sm:$0xff]  ;;  %v325_v33 = vld [vmem:[%s866_s26 + $0x210] sm:$0xff] }
  0x23   : > { %292 = vst [vmem:[%s871_s27 + $0x80] sm:$0xff] %v291_v16  ;;  %v327_v34 = vld [vmem:[%s866_s26 + $0x220] sm:$0xff]  ;;  %v329_v35 = vld [vmem:[%s866_s26 + $0x230] sm:$0xff] }
  0x24   : > { %294 = vst [vmem:[%s871_s27 + $0x88] sm:$0xff] %v293_v17  ;;  %v331_v36 = vld [vmem:[%s866_s26 + $0x240] sm:$0xff]  ;;  %v333_v37 = vld [vmem:[%s866_s26 + $0x250] sm:$0xff] }
  0x25   : > { %296 = vst [vmem:[%s871_s27 + $0x90] sm:$0xff] %v295_v18  ;;  %v335_v38 = vld [vmem:[%s866_s26 + $0x260] sm:$0xff]  ;;  %v337_v39 = vld [vmem:[%s866_s26 + $0x270] sm:$0xff] }
  0x26   : > { %298 = vst [vmem:[%s871_s27 + $0x98] sm:$0xff] %v297_v19  ;;  %v339_v40 = vld [vmem:[%s866_s26 + $0x280] sm:$0xff]  ;;  %v341_v41 = vld [vmem:[%s866_s26 + $0x290] sm:$0xff] }
  0x27   : > { %300 = vst [vmem:[%s871_s27 + $0xa0] sm:$0xff] %v299_v20  ;;  %v343_v42 = vld [vmem:[%s866_s26 + $0x2a0] sm:$0xff]  ;;  %v345_v43 = vld [vmem:[%s866_s26 + $0x2b0] sm:$0xff] }
  0x28   : > { %302 = vst [vmem:[%s871_s27 + $0xa8] sm:$0xff] %v301_v21  ;;  %v347_v44 = vld [vmem:[%s866_s26 + $0x2c0] sm:$0xff]  ;;  %v349_v45 = vld [vmem:[%s866_s26 + $0x2d0] sm:$0xff] }
  0x29   : > { %304 = vst [vmem:[%s871_s27 + $0xb0] sm:$0xff] %v303_v22  ;;  %v351_v46 = vld [vmem:[%s866_s26 + $0x2e0] sm:$0xff]  ;;  %v353_v47 = vld [vmem:[%s866_s26 + $0x2f0] sm:$0xff] }
  0x2a   : > { %306 = vst [vmem:[%s871_s27 + $0xb8] sm:$0xff] %v305_v23 }
  0x2b   : > { %308 = vst [vmem:[%s871_s27 + $0xc0] sm:$0xff] %v307_v24 }
  0x2c   : > { %310 = vst [vmem:[%s871_s27 + $0xc8] sm:$0xff] %v309_v25 }
  0x2d   : > { %312 = vst [vmem:[%s871_s27 + $0xd0] sm:$0xff] %v311_v26 }
  0x2e   : > { %314 = vst [vmem:[%s871_s27 + $0xd8] sm:$0xff] %v313_v27 }
  0x2f   : > { %316 = vst [vmem:[%s871_s27 + $0xe0] sm:$0xff] %v315_v28 }
  0x30   : > { %318 = vst [vmem:[%s871_s27 + $0xe8] sm:$0xff] %v317_v29 }
  0x31   : > { %320 = vst [vmem:[%s871_s27 + $0xf0] sm:$0xff] %v319_v30 }
  0x32   : > { %322 = vst [vmem:[%s871_s27 + $0xf8] sm:$0xff] %v321_v31 }
  0x33   : > { %324 = vst [vmem:[%s871_s27 + $0x100] sm:$0xff] %v323_v32 }
  0x34   : > { %326 = vst [vmem:[%s871_s27 + $0x108] sm:$0xff] %v325_v33 }
  0x35   : > { %328 = vst [vmem:[%s871_s27 + $0x110] sm:$0xff] %v327_v34 }
  0x36   : > { %330 = vst [vmem:[%s871_s27 + $0x118] sm:$0xff] %v329_v35 }
  0x37   : > { %332 = vst [vmem:[%s871_s27 + $0x120] sm:$0xff] %v331_v36 }
  0x38   : > { %334 = vst [vmem:[%s871_s27 + $0x128] sm:$0xff] %v333_v37 }
  0x39   : > { %336 = vst [vmem:[%s871_s27 + $0x130] sm:$0xff] %v335_v38 }
  0x3a   : > { %338 = vst [vmem:[%s871_s27 + $0x138] sm:$0xff] %v337_v39 }
  0x3b   : > { %340 = vst [vmem:[%s871_s27 + $0x140] sm:$0xff] %v339_v40 }
  0x3c   : > { %342 = vst [vmem:[%s871_s27 + $0x148] sm:$0xff] %v341_v41 }
  0x3d   : > { %344 = vst [vmem:[%s871_s27 + $0x150] sm:$0xff] %v343_v42 }
  0x3e   : > { %346 = vst [vmem:[%s871_s27 + $0x158] sm:$0xff] %v345_v43 }
  0x3f   : > { %348 = vst [vmem:[%s871_s27 + $0x160] sm:$0xff] %v347_v44 }
  0x40   : > { %350 = vst [vmem:[%s871_s27 + $0x168] sm:$0xff] %v349_v45 }
  0x41   : > { %352 = vst [vmem:[%s871_s27 + $0x170] sm:$0xff] %v351_v46 }
  0x42   : > { %354 = vst [vmem:[%s871_s27 + $0x178] sm:$0xff] %v353_v47 }
  0x43 PF: > { %p730_p7 = scmp.ge.s32.totalorder %s803_s14, 1  ;;  %p359_p8 = scmp.lt.s32.totalorder %s803_s14, 3 }
  0x45   : > { %p360_p9 = pnand %p730_p7, %p359_p8 }
  0x46   : > { %s366_s28 = sand.u32 (!%p360_p9), 1, %s795_s12  }
  0x47   : > { %363 = sbr.rel (%p360_p9) target bundleno = 295 (0x127), region = 66 }
  0x48   : > { %s751_s29 = smul.u32 (!%p360_p9), 384, %s366_s28 }
  0x49   : > { %s752_s21 = smul.u32 (!%p360_p9), 48, %s366_s28 }
  0x4a   : > { %s971_s30 = scalar_lea.vmem (!%p360_p9), [#allocation2], %s751_s29 }
  0x4b   : > { %s1095_s22 = scalar_lea.vmem (!%p360_p9), [#allocation3], %s752_s21 }
  0x4c   : > { %v421_v48 = vld [vmem:[%s971_s30 + $0x78] sm:$0xff]  ;;  %v420_v51 = vld [vmem:[%s971_s30 + $0x70] sm:$0xff]  ;;  %v419_v54 = vld [vmem:[%s971_s30 + $0x68] sm:$0xff]  ;;  %v805_v37 = vmov 0   ;;  %s731_s12 = sshll.u32 (%p856_p5), %s725_s15, 3 }
  0x4d   : > { %v437_v49 = vld [vmem:[%s971_s30 + $0xf8] sm:$0xff]  ;;  %734 = vmatpush.msra.mxu3 %v421_v48  ;;  %v436_v52 = vld [vmem:[%s971_s30 + $0xf0] sm:$0xff]  ;;  %490 = vmatpush.msra.mxu0 %v421_v48  ;;  %v435_v55 = vld [vmem:[%s971_s30 + $0xe8] sm:$0xff]  ;;  %s615_s24 = scalar_lea.vmem (%p856_p5), %s1129_s3, %s731_s12 }
  0x4e   : > { %v453_v50 = vld [vmem:[%s971_s30 + $0x178] sm:$0xff]  ;;  %525 = vmatpush.msra.mxu1 %v437_v49  ;;  %v452_v53 = vld [vmem:[%s971_s30 + $0x170] sm:$0xff]  ;;  %v451_v56 = vld [vmem:[%s971_s30 + $0x168] sm:$0xff]  ;;  %778 = vset.pattern.permute.xlu0 %v805_v37 }
  0x4f   : > { %560 = vmatpush.msra.mxu2 %v453_v50  ;;  %735 = vmatpush.msra.mxu3 %v420_v51  ;;  %v418_v57 = vld [vmem:[%s971_s30 + $0x60] sm:$0xff]  ;;  %v417_v60 = vld [vmem:[%s971_s30 + $0x58] sm:$0xff]  ;;  %v416_v63 = vld [vmem:[%s971_s30 + $0x50] sm:$0xff] }
  0x50   : > { %526 = vmatpush.msra.mxu1 %v436_v52  ;;  %491 = vmatpush.msra.mxu0 %v420_v51  ;;  %v434_v58 = vld [vmem:[%s971_s30 + $0xe0] sm:$0xff]  ;;  %v433_v61 = vld [vmem:[%s971_s30 + $0xd8] sm:$0xff]  ;;  %v432_v0 = vld [vmem:[%s971_s30 + $0xd0] sm:$0xff] }
  0x51   : > { %561 = vmatpush.msra.mxu2 %v452_v53  ;;  %736 = vmatpush.msra.mxu3 %v419_v54  ;;  %v450_v59 = vld [vmem:[%s971_s30 + $0x160] sm:$0xff]  ;;  %v449_v62 = vld [vmem:[%s971_s30 + $0x158] sm:$0xff]  ;;  %v448_v1 = vld [vmem:[%s971_s30 + $0x150] sm:$0xff] }
  0x52   : > { %527 = vmatpush.msra.mxu1 %v435_v55  ;;  %492 = vmatpush.msra.mxu0 %v419_v54  ;;  %v415_v2 = vld [vmem:[%s971_s30 + $0x48] sm:$0xff]  ;;  %v414_v5 = vld [vmem:[%s971_s30 + $0x40] sm:$0xff]  ;;  %v413_v8 = vld [vmem:[%s971_s30 + $0x38] sm:$0xff] }
  0x53   : > { %562 = vmatpush.msra.mxu2 %v451_v56  ;;  %737 = vmatpush.msra.mxu3 %v418_v57  ;;  %v431_v3 = vld [vmem:[%s971_s30 + $0xc8] sm:$0xff]  ;;  %v430_v6 = vld [vmem:[%s971_s30 + $0xc0] sm:$0xff]  ;;  %v429_v9 = vld [vmem:[%s971_s30 + $0xb8] sm:$0xff] }
  0x54   : > { %528 = vmatpush.msra.mxu1 %v434_v58  ;;  %493 = vmatpush.msra.mxu0 %v418_v57  ;;  %v447_v4 = vld [vmem:[%s971_s30 + $0x148] sm:$0xff]  ;;  %v446_v7 = vld [vmem:[%s971_s30 + $0x140] sm:$0xff]  ;;  %v445_v10 = vld [vmem:[%s971_s30 + $0x138] sm:$0xff] }
  0x55   : > { %563 = vmatpush.msra.mxu2 %v450_v59  ;;  %738 = vmatpush.msra.mxu3 %v417_v60  ;;  %v412_v11 = vld [vmem:[%s971_s30 + $0x30] sm:$0xff]  ;;  %v411_v14 = vld [vmem:[%s971_s30 + $0x28] sm:$0xff]  ;;  %v410_v17 = vld [vmem:[%s971_s30 + $0x20] sm:$0xff] }
  0x56   : > { %529 = vmatpush.msra.mxu1 %v433_v61  ;;  %494 = vmatpush.msra.mxu0 %v417_v60  ;;  %v428_v12 = vld [vmem:[%s971_s30 + $0xb0] sm:$0xff]  ;;  %v427_v15 = vld [vmem:[%s971_s30 + $0xa8] sm:$0xff]  ;;  %v426_v18 = vld [vmem:[%s971_s30 + $0xa0] sm:$0xff] }
  0x57   : > { %564 = vmatpush.msra.mxu2 %v449_v62  ;;  %739 = vmatpush.msra.mxu3 %v416_v63  ;;  %v444_v13 = vld [vmem:[%s971_s30 + $0x130] sm:$0xff]  ;;  %v443_v16 = vld [vmem:[%s971_s30 + $0x128] sm:$0xff]  ;;  %v442_v19 = vld [vmem:[%s971_s30 + $0x120] sm:$0xff] }
  0x58   : > { %530 = vmatpush.msra.mxu1 %v432_v0  ;;  %495 = vmatpush.msra.mxu0 %v416_v63  ;;  %v409_v20 = vld [vmem:[%s971_s30 + $0x18] sm:$0xff]  ;;  %v408_v23 = vld [vmem:[%s971_s30 + $0x10] sm:$0xff]  ;;  %v407_v26 = vld [vmem:[%s971_s30 + $0x8] sm:$0xff] }
  0x59   : > { %565 = vmatpush.msra.mxu2 %v448_v1  ;;  %740 = vmatpush.msra.mxu3 %v415_v2  ;;  %v425_v21 = vld [vmem:[%s971_s30 + $0x98] sm:$0xff]  ;;  %v424_v24 = vld [vmem:[%s971_s30 + $0x90] sm:$0xff]  ;;  %v423_v27 = vld [vmem:[%s971_s30 + $0x88] sm:$0xff] }
  0x5a   : > { %531 = vmatpush.msra.mxu1 %v431_v3  ;;  %496 = vmatpush.msra.mxu0 %v415_v2  ;;  %v441_v22 = vld [vmem:[%s971_s30 + $0x118] sm:$0xff]  ;;  %v440_v25 = vld [vmem:[%s971_s30 + $0x110] sm:$0xff]  ;;  %v439_v28 = vld [vmem:[%s971_s30 + $0x108] sm:$0xff] }
  0x5b   : > { %566 = vmatpush.msra.mxu2 %v447_v4  ;;  %741 = vmatpush.msra.mxu3 %v414_v5  ;;  %v406_v29 = vld [vmem:[%s971_s30] sm:$0xff]  ;;  %v391_v32 = vld [vmem:[%s1126_s0 + $0x18] sm:$0xff]  ;;  %v389_v33 = vld [vmem:[%s1126_s0 + $0x8] sm:$0xff] }
  0x5c   : > { %532 = vmatpush.msra.mxu1 %v430_v6  ;;  %497 = vmatpush.msra.mxu0 %v414_v5  ;;  %v422_v30 = vld [vmem:[%s971_s30 + $0x80] sm:$0xff]  ;;  %v390_v34 = vld [vmem:[%s1126_s0 + $0x10] sm:$0xff]  ;;  %v393_v41 = vld [vmem:[%s1126_s0 + $0x28] sm:$0xff] }
  0x5d   : > { %567 = vmatpush.msra.mxu2 %v446_v7  ;;  %742 = vmatpush.msra.mxu3 %v413_v8  ;;  %v438_v31 = vld [vmem:[%s971_s30 + $0x100] sm:$0xff]  ;;  %v456_v38 = vld [vmem:[%s1128_s2 + $0x10] sm:$0xff]  ;;  %v455_v42 = vld [vmem:[%s1128_s2 + $0x8] sm:$0xff] }
  0x5e   : > { %533 = vmatpush.msra.mxu1 %v429_v9  ;;  %498 = vmatpush.msra.mxu0 %v413_v8  ;;  %v388_v35 = vld [vmem:[%s1126_s0] sm:$0xff]  ;;  %v394_v39 = vld [vmem:[%s1126_s0 + $0x30] sm:$0xff]  ;;  %v457_v44 = vld [vmem:[%s1128_s2 + $0x18] sm:$0xff] }
  0x5f   : > { %568 = vmatpush.msra.mxu2 %v445_v10  ;;  %743 = vmatpush.msra.mxu3 %v412_v11  ;;  %v454_v36 = vld [vmem:[%s1128_s2] sm:$0xff]  ;;  %v397_v45 = vld [vmem:[%s1126_s0 + $0x48] sm:$0xff]  ;;  %v395_v46 = vld [vmem:[%s1126_s0 + $0x38] sm:$0xff] }
  0x60   : > { %534 = vmatpush.msra.mxu1 %v428_v12  ;;  %499 = vmatpush.msra.mxu0 %v412_v11  ;;  %v392_v40 = vld [vmem:[%s1126_s0 + $0x20] sm:$0xff]  ;;  %v459_v48 = vld [vmem:[%s1128_s2 + $0x28] sm:$0xff]  ;;  %v398_v50 = vld [vmem:[%s1126_s0 + $0x50] sm:$0xff] }
  0x61   : > { %569 = vmatpush.msra.mxu2 %v444_v13  ;;  %744 = vmatpush.msra.mxu3 %v411_v14  ;;  %v458_v43 = vld [vmem:[%s1128_s2 + $0x20] sm:$0xff]  ;;  %v399_v51 = vld [vmem:[%s1126_s0 + $0x58] sm:$0xff]  ;;  %v401_v53 = vld [vmem:[%s1126_s0 + $0x68] sm:$0xff] }
  0x62   : > { %535 = vmatpush.msra.mxu1 %v427_v15  ;;  %500 = vmatpush.msra.mxu0 %v411_v14  ;;  %v396_v47 = vld [vmem:[%s1126_s0 + $0x40] sm:$0xff]  ;;  %v403_v52 = vld [vmem:[%s1126_s0 + $0x78] sm:$0xff]  ;;  %v402_v54 = vld [vmem:[%s1126_s0 + $0x70] sm:$0xff] }
  0x63   : > { %570 = vmatpush.msra.mxu2 %v443_v16  ;;  %745 = vmatpush.msra.mxu3 %v410_v17  ;;  %v400_v49 = vld [vmem:[%s1126_s0 + $0x60] sm:$0xff]  ;;  %v405_v56 = vld [vmem:[%s1126_s0 + $0x88] sm:$0xff] }
  0x64   : > { %536 = vmatpush.msra.mxu1 %v426_v18  ;;  %501 = vmatpush.msra.mxu0 %v410_v17  ;;  %v404_v55 = vld [vmem:[%s1126_s0 + $0x80] sm:$0xff] }
  0x65   : > { %571 = vmatpush.msra.mxu2 %v442_v19  ;;  %746 = vmatpush.msra.mxu3 %v409_v20 }
  0x66   : > { %537 = vmatpush.msra.mxu1 %v425_v21  ;;  %502 = vmatpush.msra.mxu0 %v409_v20 }
  0x67   : > { %572 = vmatpush.msra.mxu2 %v441_v22  ;;  %747 = vmatpush.msra.mxu3 %v408_v23 }
  0x68   : > { %538 = vmatpush.msra.mxu1 %v424_v24  ;;  %503 = vmatpush.msra.mxu0 %v408_v23 }
  0x69   : > { %573 = vmatpush.msra.mxu2 %v440_v25  ;;  %748 = vmatpush.msra.mxu3 %v407_v26 }
  0x6a   : > { %539 = vmatpush.msra.mxu1 %v423_v27  ;;  %504 = vmatpush.msra.mxu0 %v407_v26 }
  0x6b   : > { %574 = vmatpush.msra.mxu2 %v439_v28  ;;  %749 = vmatpush.msra.mxu3 %v406_v29 }
  0x6c   : > { %540 = vmatpush.msra.mxu1 %v422_v30  ;;  %509 = vmatmul.f32.vlgmr.msra.gmra.mxu3 %v391_v32 }
  0x6d   : > { %575 = vmatpush.msra.mxu2 %v438_v31  ;;  %541 = vmatmul.f32.vlgmr.msra.gmra.mxu1 %v389_v33 }
  0x6e   : > { %576 = vmatmul.f32.vlgmr.msra.gmra.mxu2 %v390_v34  ;;  %505 = vmatpush.msra.mxu0 %v406_v29 }
  0x6f   : > { %506 = vmatmul.f32.vlgmr.msra.gmra.mxu0 %v388_v35  ;;  %462 = vperm.xlu0 %778, %v454_v36  }
  0x70   : > { %779 = vset.pattern.permute.xlu1 %v805_v37  ;;  %780 = vset.pattern.permute.xlu2 %v805_v37 }
  0x71   : > { %472 = vperm.xlu1 %779, %v456_v38   ;;  %482 = vperm.xlu2 %780, %v458_v43  }
  0x74   : > { %512 = vmatmul.f32.gmra.mxu3 %v394_v39 }
  0x75   : > { %544 = vmatmul.f32.gmra.mxu1 %v392_v40 }
  0x76   : > { %579 = vmatmul.f32.gmra.mxu2 %v393_v41 }
  0x77   : > { %467 = vperm.xlu0 %778, %v455_v42  }
  0x79   : > { %477 = vperm.xlu1 %779, %v457_v44   ;;  %487 = vperm.xlu2 %780, %v459_v48  }
  0x7c   : > { %515 = vmatmul.f32.gmra.mxu3 %v397_v45 }
  0x7d   : > { %547 = vmatmul.f32.gmra.mxu1 %v395_v46 }
  0x7e   : > { %582 = vmatmul.f32.gmra.mxu2 %v396_v47 }
  0x84   : > { %518 = vmatmul.f32.gmra.mxu3 %v400_v49 }
  0x85   : > { %550 = vmatmul.f32.gmra.mxu1 %v398_v50 }
  0x86   : > { %585 = vmatmul.f32.gmra.mxu2 %v399_v51 }
  0x8c   : > { %521 = vmatmul.f32.gmra.mxu3 %v403_v52 }
  0x8d   : > { %553 = vmatmul.f32.gmra.mxu1 %v401_v53 }
  0x8e   : > { %588 = vmatmul.f32.gmra.mxu2 %v402_v54 }
  0x95   : > { %556 = vmatmul.f32.gmra.mxu1 %v404_v55 }
  0x96   : > { %591 = vmatmul.f32.gmra.mxu2 %v405_v56 }
  0xcb   : > { %v483_v23 = vpop.permute.xlu2 %482 }
  0xd3   : > { %v488_v33 = vpop.permute.xlu2 %487 }
  0xe1   : > { %v463_v57 = vpop.permute.xlu0 %462 }
  0xe3   : > { %v473_v5 = vpop.permute.xlu1 %472 }
  0xe9   : > { %v468_v61 = vpop.permute.xlu0 %467 }
  0xea   : > { %v542_v58 = vpop.f32.mrf.mxu1 }
  0xeb   : > { %v478_v14 = vpop.permute.xlu1 %477 }
  0xec   : > { %v507_v59 = vpop.f32.mrf.mxu0 }
  0xed   : > { %v508_v60 = vadd.f32 %v507_v59, %v463_v57 }
  0xef   : > { %v510_v62 = vpop.f32.mrf.mxu3  ;;  %v543_v63 = vadd.f32 %v542_v58, %v508_v60 }
  0xf0   : > { %v511_v2 = vadd.f32 %v510_v62, %v468_v61 }
  0xf1   : > { %v577_v0 = vpop.f32.mrf.mxu2 }
  0xf2   : > { %v578_v1 = vadd.f32 %v577_v0, %v543_v63  ;;  %v545_v3 = vpop.f32.mrf.mxu1 }
  0xf3   : > { %v546_v6 = vadd.f32 %v545_v3, %v511_v2 }
  0xf4   : > { %v595_v4 = vmax.f32 %v578_v1, 0.0 }
  0xf6   : > { %601 = vst [vmem:[%s1095_s22] sm:$0xff] %v595_v4 }
  0xf7   : > { %v513_v7 = vpop.f32.mrf.mxu3 }
  0xf8   : > { %v514_v10 = vadd.f32 %v513_v7, %v473_v5 }
  0xf9   : > { %v580_v8 = vpop.f32.mrf.mxu2 }
  0xfa   : > { %v581_v9 = vadd.f32 %v580_v8, %v546_v6  ;;  %v548_v11 = vpop.f32.mrf.mxu1 }
  0xfb   : > { %v549_v13 = vadd.f32 %v548_v11, %v514_v10 }
  0xfc   : > { %v596_v12 = vmax.f32 %v581_v9, 0.0 }
  0xfd   : > { %v654_v41 = vld [vmem:[%s1095_s22] sm:$0xff] (%p856_p5) }
  0xfe   : > { %602 = vst [vmem:[%s1095_s22 + $0x8] sm:$0xff] %v596_v12 }
  0xff   : > { %v516_v15 = vpop.f32.mrf.mxu3  ;;  %655 = vst [vmem:[%s615_s24] sm:$0xff] (%p856_p5), %v654_v41 }
 0x100   : > { %v517_v18 = vadd.f32 %v516_v15, %v478_v14 }
 0x101   : > { %v583_v16 = vpop.f32.mrf.mxu2 }
 0x102   : > { %v584_v17 = vadd.f32 %v583_v16, %v549_v13  ;;  %v551_v19 = vpop.f32.mrf.mxu1 }
 0x103   : > { %v552_v21 = vadd.f32 %v551_v19, %v517_v18 }
 0x104   : > { %v597_v20 = vmax.f32 %v584_v17, 0.0 }
 0x105   : > { %v656_v42 = vld [vmem:[%s1095_s22 + $0x8] sm:$0xff] (%p856_p5) }
 0x106   : > { %603 = vst [vmem:[%s1095_s22 + $0x10] sm:$0xff] %v597_v20 }
 0x107   : > { %v519_v22 = vpop.f32.mrf.mxu3  ;;  %657 = vst [vmem:[%s615_s24 + $0x10] sm:$0xff] (%p856_p5), %v656_v42 }
 0x108   : > { %v520_v25 = vadd.f32 %v519_v22, %v483_v23 }
 0x109   : > { %v586_v24 = vpop.f32.mrf.mxu2 }
 0x10a   : > { %v587_v26 = vadd.f32 %v586_v24, %v552_v21  ;;  %v554_v27 = vpop.f32.mrf.mxu1 }
 0x10b   : > { %v555_v29 = vadd.f32 %v554_v27, %v520_v25 }
 0x10c   : > { %v598_v28 = vmax.f32 %v587_v26, 0.0 }
 0x10d   : > { %v658_v43 = vld [vmem:[%s1095_s22 + $0x10] sm:$0xff] (%p856_p5) }
 0x10e   : > { %604 = vst [vmem:[%s1095_s22 + $0x18] sm:$0xff] %v598_v28 }
 0x10f   : > { %v522_v30 = vpop.f32.mrf.mxu3  ;;  %659 = vst [vmem:[%s615_s24 + $0x20] sm:$0xff] (%p856_p5), %v658_v43 }
 0x110   : > { %v523_v34 = vadd.f32 %v522_v30, %v488_v33 }
 0x111   : > { %v589_v31 = vpop.f32.mrf.mxu2 }
 0x112   : > { %v590_v32 = vadd.f32 %v589_v31, %v555_v29  ;;  %v557_v36 = vpop.f32.mrf.mxu1 }
 0x113   : > { %v558_v37 = vadd.f32 %v557_v36, %v523_v34 }
 0x114   : > { %v599_v35 = vmax.f32 %v590_v32, 0.0 }
 0x115   : > { %v660_v44 = vld [vmem:[%s1095_s22 + $0x18] sm:$0xff] (%p856_p5) }
 0x116   : > { %605 = vst [vmem:[%s1095_s22 + $0x20] sm:$0xff] %v599_v35 }
 0x117   : > { %661 = vst [vmem:[%s615_s24 + $0x30] sm:$0xff] (%p856_p5), %v660_v44 }
 0x119   : > { %v592_v38 = vpop.f32.mrf.mxu2 }
 0x11a   : > { %v593_v39 = vadd.f32 %v592_v38, %v558_v37  ;;  %613 = sbr.rel (!%p856_p5) target bundleno = 295 (0x127), region = 74 }
 0x11c   : > { %v600_v40 = vmax.f32 %v593_v39, 0.0 }
 0x11d   : > { %v662_v45 = vld [vmem:[%s1095_s22 + $0x20] sm:$0xff] (%p856_p5) }
 0x11e   : > { %606 = vst [vmem:[%s1095_s22 + $0x28] sm:$0xff] %v600_v40 }
 0x11f   : > { %663 = vst [vmem:[%s615_s24 + $0x40] sm:$0xff] %v662_v45 }
 0x125   : > { %v664_v46 = vld [vmem:[%s1095_s22 + $0x28] sm:$0xff] }
 0x126   : > { %665 = vst [vmem:[%s615_s24 + $0x50] sm:$0xff] %v664_v46 }
 0x127 PF: > { %p10_p10 = scmp.ge.s32.totalorder %s843_s16, 4   ;;  %s1131_s12 = smov %s799_s13 }
 0x128   : > { %s1132_s13 = smov %s854_s19  ;;  %s1133_s14 = smov %s843_s16 }
 0x129   :  { %12 = sbr.rel (!%p10_p10) target bundleno = 2 (0x2), region = 143 }

// kernel: encoder_forward.8
= control target key start
LH: loop header
LB: loop body
LE: loop exit
PB: predicated region body
PF: predicated region fallthrough
CT: control target
= control target key end

     0   :  { %v704_v31 = vmov 0   ;;  %vm655_vm0 = vcmask 457728   ;;  %s1516_s1 = inlined_call_operand.vmem [shape: f32[1152,56], index: 1, kind: input, shape index: {}]   ;;  %s1517_s2 = inlined_call_operand.vmem [shape: f32[64,1], index: 2, kind: input, shape index: {}]   ;;  %s1518_s0 = inlined_call_operand.vmem [shape: f32[64,1152], index: 0, kind: input, shape index: {}]   ;;  %s1519_s3 = inlined_call_operand.vmem [shape: f32[64,56], index: 3, kind: output, shape index: {}]  }
   0x1   :  { %v101_v0 = vld [vmem:[%s1516_s1 + $0x78] sm:$0xff]  ;;  %v100_v1 = vld [vmem:[%s1516_s1 + $0x70] sm:$0xff]  ;;  %v99_v2 = vld [vmem:[%s1516_s1 + $0x68] sm:$0xff]  ;;  %701 = vset.pattern.permute.xlu0 %v704_v31  ;;  %702 = vset.pattern.permute.xlu1 %v704_v31 }
   0x2   :  { %668 = vmatpush.msra.mxu1 %v101_v0  ;;  %278 = vmatpush.msra.mxu0 %v101_v0  ;;  %v133_v3 = vld [vmem:[%s1516_s1 + $0x178] sm:$0xff]  ;;  %v132_v4 = vld [vmem:[%s1516_s1 + $0x170] sm:$0xff]  ;;  %v98_v5 = vld [vmem:[%s1516_s1 + $0x60] sm:$0xff] }
   0x3   :  { %360 = vmatpush.msra.mxu2 %v133_v3  ;;  %v131_v6 = vld [vmem:[%s1516_s1 + $0x168] sm:$0xff]  ;;  %v97_v7 = vld [vmem:[%s1516_s1 + $0x58] sm:$0xff]  ;;  %v130_v8 = vld [vmem:[%s1516_s1 + $0x160] sm:$0xff]  ;;  %703 = vset.pattern.permute.xlu2 %v704_v31 }
   0x4   :  { %669 = vmatpush.msra.mxu1 %v100_v1  ;;  %279 = vmatpush.msra.mxu0 %v100_v1  ;;  %v96_v9 = vld [vmem:[%s1516_s1 + $0x50] sm:$0xff]  ;;  %v149_v10 = vld [vmem:[%s1516_s1 + $0x1f8] sm:$0xff]  ;;  %v95_v13 = vld [vmem:[%s1516_s1 + $0x48] sm:$0xff] }
   0x5   :  { %361 = vmatpush.msra.mxu2 %v132_v4  ;;  %v129_v11 = vld [vmem:[%s1516_s1 + $0x158] sm:$0xff]  ;;  %v148_v12 = vld [vmem:[%s1516_s1 + $0x1f0] sm:$0xff]  ;;  %401 = vmatpush.msra.mxu3 %v149_v10  ;;  %v147_v15 = vld [vmem:[%s1516_s1 + $0x1e8] sm:$0xff] }
   0x6   :  { %670 = vmatpush.msra.mxu1 %v99_v2  ;;  %280 = vmatpush.msra.mxu0 %v99_v2  ;;  %v128_v14 = vld [vmem:[%s1516_s1 + $0x150] sm:$0xff]  ;;  %v94_v16 = vld [vmem:[%s1516_s1 + $0x40] sm:$0xff]  ;;  %v127_v17 = vld [vmem:[%s1516_s1 + $0x148] sm:$0xff] }
   0x7   :  { %362 = vmatpush.msra.mxu2 %v131_v6  ;;  %402 = vmatpush.msra.mxu3 %v148_v12  ;;  %v146_v18 = vld [vmem:[%s1516_s1 + $0x1e0] sm:$0xff]  ;;  %v93_v19 = vld [vmem:[%s1516_s1 + $0x38] sm:$0xff]  ;;  %v92_v22 = vld [vmem:[%s1516_s1 + $0x30] sm:$0xff] }
   0x8   :  { %671 = vmatpush.msra.mxu1 %v98_v5  ;;  %281 = vmatpush.msra.mxu0 %v98_v5  ;;  %v126_v20 = vld [vmem:[%s1516_s1 + $0x140] sm:$0xff]  ;;  %v145_v21 = vld [vmem:[%s1516_s1 + $0x1d8] sm:$0xff]  ;;  %v144_v24 = vld [vmem:[%s1516_s1 + $0x1d0] sm:$0xff] }
   0x9   :  { %363 = vmatpush.msra.mxu2 %v130_v8  ;;  %403 = vmatpush.msra.mxu3 %v147_v15  ;;  %v125_v23 = vld [vmem:[%s1516_s1 + $0x138] sm:$0xff]  ;;  %v91_v25 = vld [vmem:[%s1516_s1 + $0x28] sm:$0xff]  ;;  %v124_v26 = vld [vmem:[%s1516_s1 + $0x130] sm:$0xff] }
   0xa   :  { %672 = vmatpush.msra.mxu1 %v97_v7  ;;  %282 = vmatpush.msra.mxu0 %v97_v7  ;;  %v90_v27 = vld [vmem:[%s1516_s1 + $0x20] sm:$0xff]  ;;  %v123_v28 = vld [vmem:[%s1516_s1 + $0x128] sm:$0xff]  ;;  %v89_v30 = vld [vmem:[%s1516_s1 + $0x18] sm:$0xff] }
   0xb   :  { %364 = vmatpush.msra.mxu2 %v129_v11  ;;  %404 = vmatpush.msra.mxu3 %v146_v18  ;;  %v230_v29 = vld [vmem:[%s1517_s2] sm:$0xff]  ;;  %v143_v33 = vld [vmem:[%s1516_s1 + $0x1c8] sm:$0xff]  ;;  %v88_v34 = vld [vmem:[%s1516_s1 + $0x10] sm:$0xff] }
   0xc   :  { %673 = vmatpush.msra.mxu1 %v96_v9  ;;  %283 = vmatpush.msra.mxu0 %v96_v9  ;;  %v122_v32 = vld [vmem:[%s1516_s1 + $0x120] sm:$0xff]  ;;  %v121_v35 = vld [vmem:[%s1516_s1 + $0x118] sm:$0xff]  ;;  %v87_v37 = vld [vmem:[%s1516_s1 + $0x8] sm:$0xff] }
   0xd   :  { %365 = vmatpush.msra.mxu2 %v128_v14  ;;  %405 = vmatpush.msra.mxu3 %v145_v21  ;;  %v142_v36 = vld [vmem:[%s1516_s1 + $0x1c0] sm:$0xff]  ;;  %v120_v38 = vld [vmem:[%s1516_s1 + $0x110] sm:$0xff]  ;;  %v141_v39 = vld [vmem:[%s1516_s1 + $0x1b8] sm:$0xff] }
   0xe   :  { %674 = vmatpush.msra.mxu1 %v95_v13  ;;  %284 = vmatpush.msra.mxu0 %v95_v13  ;;  %v86_v40 = vld [vmem:[%s1516_s1] sm:$0xff]  ;;  %v117_v43 = vld [vmem:[%s1516_s1 + $0xf8] sm:$0xff]  ;;  %v119_v45 = vld [vmem:[%s1516_s1 + $0x108] sm:$0xff] }
   0xf   :  { %366 = vmatpush.msra.mxu2 %v127_v17  ;;  %406 = vmatpush.msra.mxu3 %v144_v24  ;;  %v50_v41 = vld [vmem:[%s1518_s0 + $0x120] sm:$0xff]  ;;  %v165_v44 = vld [vmem:[%s1516_s1 + $0x278] sm:$0xff]  ;;  %v140_v46 = vld [vmem:[%s1516_s1 + $0x1b0] sm:$0xff] }
  0x10   :  { %675 = vmatpush.msra.mxu1 %v94_v16  ;;  %285 = vmatpush.msra.mxu0 %v94_v16  ;;  %v14_v42 = vld [vmem:[%s1518_s0] sm:$0xff]  ;;  %v116_v47 = vld [vmem:[%s1516_s1 + $0xf0] sm:$0xff]  ;;  %v115_v50 = vld [vmem:[%s1516_s1 + $0xe8] sm:$0xff] }
  0x11   :  { %367 = vmatpush.msra.mxu2 %v126_v20  ;;  %240 = vperm.xlu0 %701, %v230_v29   ;;  %v164_v48 = vld [vmem:[%s1516_s1 + $0x270] sm:$0xff]  ;;  %v118_v49 = vld [vmem:[%s1516_s1 + $0x100] sm:$0xff]  ;;  %v163_v51 = vld [vmem:[%s1516_s1 + $0x268] sm:$0xff] }
  0x12   :  { %676 = vmatpush.msra.mxu1 %v93_v19  ;;  %286 = vmatpush.msra.mxu0 %v93_v19  ;;  %v16_v52 = vld [vmem:[%s1518_s0 + $0x10] sm:$0xff]  ;;  %v114_v54 = vld [vmem:[%s1516_s1 + $0xe0] sm:$0xff]  ;;  %v59_v56 = vld [vmem:[%s1518_s0 + $0x168] sm:$0xff] }
  0x13   :  { %368 = vmatpush.msra.mxu2 %v125_v23  ;;  %407 = vmatpush.msra.mxu3 %v143_v33  ;;  %v232_v53 = vld [vmem:[%s1517_s2 + $0x10] sm:$0xff]  ;;  %v162_v55 = vld [vmem:[%s1516_s1 + $0x260] sm:$0xff]  ;;  %v23_v57 = vld [vmem:[%s1518_s0 + $0x48] sm:$0xff] }
  0x14   :  { %677 = vmatpush.msra.mxu1 %v92_v22  ;;  %287 = vmatpush.msra.mxu0 %v92_v22  ;;  %v113_v58 = vld [vmem:[%s1516_s1 + $0xd8] sm:$0xff]  ;;  %v231_v61 = vld [vmem:[%s1517_s2 + $0x8] sm:$0xff]  ;;  %v112_v62 = vld [vmem:[%s1516_s1 + $0xd0] sm:$0xff] }
  0x15   :  { %369 = vmatpush.msra.mxu2 %v124_v26  ;;  %408 = vmatpush.msra.mxu3 %v142_v36  ;;  %v161_v59 = vld [vmem:[%s1516_s1 + $0x258] sm:$0xff]  ;;  %v160_v63 = vld [vmem:[%s1516_s1 + $0x250] sm:$0xff]  ;;  %v139_v0 = vld [vmem:[%s1516_s1 + $0x1a8] sm:$0xff] }
  0x16   :  { %678 = vmatpush.msra.mxu1 %v91_v25  ;;  %288 = vmatpush.msra.mxu0 %v91_v25  ;;  %v197_v60 = vld [vmem:[%s1516_s1 + $0x378] sm:$0xff]  ;;  %v196_v1 = vld [vmem:[%s1516_s1 + $0x370] sm:$0xff]  ;;  %v111_v2 = vld [vmem:[%s1516_s1 + $0xc8] sm:$0xff] }
  0x17   :  { %370 = vmatpush.msra.mxu2 %v123_v28  ;;  %409 = vmatpush.msra.mxu3 %v141_v39  ;;  %v159_v3 = vld [vmem:[%s1516_s1 + $0x248] sm:$0xff]  ;;  %v138_v4 = vld [vmem:[%s1516_s1 + $0x1a0] sm:$0xff]  ;;  %v25_v5 = vld [vmem:[%s1518_s0 + $0x58] sm:$0xff] }
  0x18   :  { %679 = vmatpush.msra.mxu1 %v90_v27  ;;  %289 = vmatpush.msra.mxu0 %v90_v27  ;;  %v110_v6 = vld [vmem:[%s1516_s1 + $0xc0] sm:$0xff]  ;;  %v68_v8 = vld [vmem:[%s1518_s0 + $0x1b0] sm:$0xff]  ;;  %v109_v10 = vld [vmem:[%s1516_s1 + $0xb8] sm:$0xff] }
  0x19   :  { %371 = vmatpush.msra.mxu2 %v122_v32  ;;  %410 = vmatpush.msra.mxu3 %v140_v46  ;;  %v158_v7 = vld [vmem:[%s1516_s1 + $0x240] sm:$0xff]  ;;  %v32_v9 = vld [vmem:[%s1518_s0 + $0x90] sm:$0xff]  ;;  %v137_v11 = vld [vmem:[%s1516_s1 + $0x198] sm:$0xff] }
  0x1a   :  { %680 = vmatpush.msra.mxu1 %v89_v30  ;;  %290 = vmatpush.msra.mxu0 %v89_v30  ;;  %v157_v12 = vld [vmem:[%s1516_s1 + $0x238] sm:$0xff]  ;;  %v195_v13 = vld [vmem:[%s1516_s1 + $0x368] sm:$0xff]  ;;  %v108_v14 = vld [vmem:[%s1516_s1 + $0xb0] sm:$0xff] }
  0x1b   :  { %372 = vmatpush.msra.mxu2 %v121_v35  ;;  %250 = vperm.xlu1 %702, %v232_v53   ;;  %v136_v15 = vld [vmem:[%s1516_s1 + $0x190] sm:$0xff]  ;;  %v233_v17 = vld [vmem:[%s1517_s2 + $0x18] sm:$0xff]  ;;  %v107_v18 = vld [vmem:[%s1516_s1 + $0xa8] sm:$0xff] }
  0x1c   :  { %681 = vmatpush.msra.mxu1 %v88_v34  ;;  %291 = vmatpush.msra.mxu0 %v88_v34  ;;  %v156_v16 = vld [vmem:[%s1516_s1 + $0x230] sm:$0xff]  ;;  %v135_v20 = vld [vmem:[%s1516_s1 + $0x188] sm:$0xff]  ;;  %v106_v22 = vld [vmem:[%s1516_s1 + $0xa0] sm:$0xff] }
  0x1d   :  { %373 = vmatpush.msra.mxu2 %v120_v38  ;;  %245 = vperm.xlu0 %701, %v231_v61   ;;  %v236_v19 = vld [vmem:[%s1517_s2 + $0x30] sm:$0xff]  ;;  %v155_v21 = vld [vmem:[%s1516_s1 + $0x228] sm:$0xff]  ;;  %v194_v23 = vld [vmem:[%s1516_s1 + $0x360] sm:$0xff] }
  0x1e   :  { %682 = vmatpush.msra.mxu1 %v87_v37  ;;  %292 = vmatpush.msra.mxu0 %v87_v37  ;;  %v77_v24 = vld [vmem:[%s1518_s0 + $0x1f8] sm:$0xff]  ;;  %v134_v25 = vld [vmem:[%s1516_s1 + $0x180] sm:$0xff]  ;;  %v104_v30 = vld [vmem:[%s1516_s1 + $0x90] sm:$0xff] }
  0x1f   :  { %374 = vmatpush.msra.mxu2 %v119_v45  ;;  %411 = vmatpush.msra.mxu3 %v139_v0  ;;  %v105_v26 = vld [vmem:[%s1516_s1 + $0x98] sm:$0xff]  ;;  %v154_v27 = vld [vmem:[%s1516_s1 + $0x220] sm:$0xff]  ;;  %v103_v35 = vld [vmem:[%s1516_s1 + $0x88] sm:$0xff] }
  0x20   :  { %683 = vmatpush.msra.mxu1 %v86_v40  ;;  %293 = vmatpush.msra.mxu0 %v86_v40  ;;  %v41_v28 = vld [vmem:[%s1518_s0 + $0xd8] sm:$0xff]  ;;  %v34_v34 = vld [vmem:[%s1518_s0 + $0xa0] sm:$0xff]  ;;  %v152_v37 = vld [vmem:[%s1516_s1 + $0x210] sm:$0xff] }
  0x21   :  { %306 = vmatmul.f32.vlgmr.msra.gmra.mxu1 %v50_v41  ;;  %294 = vmatmul.f32.vlgmr.msra.gmra.mxu0 %v14_v42  ;;  %v17_v29 = vld [vmem:[%s1518_s0 + $0x18] sm:$0xff]  ;;  %v102_v38 = vld [vmem:[%s1516_s1 + $0x80] sm:$0xff]  ;;  %v212_v39 = vld [vmem:[%s1516_s1 + $0x3f0] sm:$0xff] }
  0x22   :  { %319 = vmatpush.msrb.mxu1 %v117_v43  ;;  %442 = vmatpush.msrb.mxu0 %v165_v44  ;;  %v213_v32 = vld [vmem:[%s1516_s1 + $0x3f8] sm:$0xff]  ;;  %v15_v40 = vld [vmem:[%s1518_s0 + $0x8] sm:$0xff]  ;;  %v234_v41 = vld [vmem:[%s1517_s2 + $0x20] sm:$0xff] }
  0x23   :  { %375 = vmatpush.msra.mxu2 %v118_v49  ;;  %412 = vmatpush.msra.mxu3 %v138_v4  ;;  %v153_v33 = vld [vmem:[%s1516_s1 + $0x218] sm:$0xff]  ;;  %v151_v44 = vld [vmem:[%s1516_s1 + $0x208] sm:$0xff]  ;;  %v192_v45 = vld [vmem:[%s1516_s1 + $0x350] sm:$0xff] }
  0x24   :  { %320 = vmatpush.msrb.mxu1 %v116_v47  ;;  %443 = vmatpush.msrb.mxu0 %v164_v48  ;;  %v193_v36 = vld [vmem:[%s1516_s1 + $0x358] sm:$0xff]  ;;  %v180_v31 = vld [vmem:[%s1516_s1 + $0x2f0] sm:$0xff]  ;;  %v26_v46 = vld [vmem:[%s1518_s0 + $0x60] sm:$0xff] }
  0x25   :  { %376 = vmatmul.f32.vlgmr.msra.gmra.mxu2 %v16_v52  ;;  %413 = vmatpush.msra.mxu3 %v137_v11  ;;  %v181_v42 = vld [vmem:[%s1516_s1 + $0x2f8] sm:$0xff]  ;;  %v150_v47 = vld [vmem:[%s1516_s1 + $0x200] sm:$0xff]  ;;  %v211_v48 = vld [vmem:[%s1516_s1 + $0x3e8] sm:$0xff] }
  0x26   :  { %321 = vmatpush.msrb.mxu1 %v115_v50  ;;  %444 = vmatpush.msrb.mxu0 %v163_v51  ;;  %v237_v43 = vld [vmem:[%s1517_s2 + $0x38] sm:$0xff]  ;;  %v18_v49 = vld [vmem:[%s1518_s0 + $0x20] sm:$0xff]  ;;  %v43_v50 = vld [vmem:[%s1518_s0 + $0xe8] sm:$0xff] }
  0x27   :  { %524 = vmatpush.msrb.mxu2 %v197_v60  ;;  %414 = vmatpush.msra.mxu3 %v136_v15  ;;  %v179_v51 = vld [vmem:[%s1516_s1 + $0x2e8] sm:$0xff]  ;;  %v210_v53 = vld [vmem:[%s1516_s1 + $0x3e0] sm:$0xff]  ;;  %v1103_v60 = vld [vmem:[%s1516_s1 + $0x470] sm:$0xff] }
  0x28   :  { %322 = vmatpush.msrb.mxu1 %v114_v54  ;;  %445 = vmatpush.msrb.mxu0 %v162_v55  ;;  %v191_v52 = vld [vmem:[%s1516_s1 + $0x348] sm:$0xff]  ;;  %v1082_v54 = vld [vmem:[%s1516_s1 + $0x478] sm:$0xff]  ;;  %v24_v55 = vld [vmem:[%s1518_s0 + $0x50] sm:$0xff] }
  0x29   :  { %309 = vmatmul.f32.gmra.mxu1 %v59_v56  ;;  %297 = vmatmul.f32.gmra.mxu0 %v23_v57  ;;  %v235_v56 = vld [vmem:[%s1517_s2 + $0x28] sm:$0xff]  ;;  %v178_v57 = vld [vmem:[%s1516_s1 + $0x2e0] sm:$0xff]  ;;  %v208_v0 = vld [vmem:[%s1516_s1 + $0x3d0] sm:$0xff] }
  0x2a   :  { %323 = vmatpush.msrb.mxu1 %v113_v58  ;;  %446 = vmatpush.msrb.mxu0 %v161_v59  ;;  %v190_v58 = vld [vmem:[%s1516_s1 + $0x340] sm:$0xff]  ;;  %v209_v59 = vld [vmem:[%s1516_s1 + $0x3d8] sm:$0xff]  ;;  %v35_v61 = vld [vmem:[%s1518_s0 + $0xa8] sm:$0xff] }
  0x2b   :  { %525 = vmatpush.msrb.mxu2 %v196_v1  ;;  %255 = vperm.xlu1 %702, %v233_v17   ;;  %v27_v1 = vld [vmem:[%s1518_s0 + $0x68] sm:$0xff]  ;;  %v188_v4 = vld [vmem:[%s1516_s1 + $0x330] sm:$0xff]  ;;  %v186_v11 = vld [vmem:[%s1516_s1 + $0x320] sm:$0xff] }
  0x2c   :  { %324 = vmatpush.msrb.mxu1 %v112_v62  ;;  %447 = vmatpush.msrb.mxu0 %v160_v63  ;;  %v177_v62 = vld [vmem:[%s1516_s1 + $0x2d8] sm:$0xff]  ;;  %v36_v17 = vld [vmem:[%s1518_s0 + $0xb0] sm:$0xff] }
  0x2d   :  { %379 = vmatmul.f32.gmra.mxu2 %v25_v5  ;;  %270 = vperm.xlu0 %701, %v236_v19   ;;  %v189_v63 = vld [vmem:[%s1516_s1 + $0x338] sm:$0xff]  ;;  %v207_v5 = vld [vmem:[%s1516_s1 + $0x3c8] sm:$0xff] }
  0x2e   :  { %325 = vmatpush.msrb.mxu1 %v111_v2  ;;  %448 = vmatpush.msrb.mxu0 %v159_v3  ;;  %v52_v2 = vld [vmem:[%s1518_s0 + $0x130] sm:$0xff]  ;;  %v205_v15 = vld [vmem:[%s1516_s1 + $0x3b8] sm:$0xff] }
  0x2f   :  { %526 = vmatpush.msrb.mxu2 %v195_v13  ;;  %415 = vmatpush.msra.mxu3 %v135_v20  ;;  %v176_v3 = vld [vmem:[%s1516_s1 + $0x2d0] sm:$0xff]  ;;  %v173_v19 = vld [vmem:[%s1516_s1 + $0x2b8] sm:$0xff] }
  0x30   :  { %326 = vmatpush.msrb.mxu1 %v110_v6  ;;  %449 = vmatpush.msrb.mxu0 %v158_v7  ;;  %v1136_v6 = vld [vmem:[%s1516_s1 + $0x468] sm:$0xff]  ;;  %v33_v7 = vld [vmem:[%s1518_s0 + $0x98] sm:$0xff]  ;;  %v44_v13 = vld [vmem:[%s1518_s0 + $0xf0] sm:$0xff] }
  0x31   :  { %312 = vmatmul.f32.gmra.mxu1 %v68_v8  ;;  %300 = vmatmul.f32.gmra.mxu0 %v32_v9  ;;  %v187_v8 = vld [vmem:[%s1516_s1 + $0x328] sm:$0xff]  ;;  %v204_v20 = vld [vmem:[%s1516_s1 + $0x3b0] sm:$0xff] }
  0x32   :  { %327 = vmatpush.msrb.mxu1 %v109_v10  ;;  %450 = vmatpush.msrb.mxu0 %v157_v12  ;;  %v175_v9 = vld [vmem:[%s1516_s1 + $0x2c8] sm:$0xff]  ;;  %v206_v10 = vld [vmem:[%s1516_s1 + $0x3c0] sm:$0xff] }
  0x33   :  { %527 = vmatpush.msrb.mxu2 %v194_v23  ;;  %416 = vmatpush.msra.mxu3 %v134_v25  ;;  %v1157_v12 = vld [vmem:[%s1516_s1 + $0x460] sm:$0xff]  ;;  %v172_v25 = vld [vmem:[%s1516_s1 + $0x2b0] sm:$0xff] }
  0x34   :  { %328 = vmatpush.msrb.mxu1 %v108_v14  ;;  %451 = vmatpush.msrb.mxu0 %v156_v16  ;;  %v174_v14 = vld [vmem:[%s1516_s1 + $0x2c0] sm:$0xff]  ;;  %v185_v16 = vld [vmem:[%s1516_s1 + $0x318] sm:$0xff] }
  0x35   :  { %417 = vmatmul.f32.vlgmr.msra.gmra.mxu3 %v17_v29  ;;  %382 = vmatmul.f32.gmra.mxu2 %v34_v34  ;;  %v42_v23 = vld [vmem:[%s1518_s0 + $0xe0] sm:$0xff]  ;;  %v53_v29 = vld [vmem:[%s1518_s0 + $0x138] sm:$0xff] }
  0x36   :  { %329 = vmatpush.msrb.mxu1 %v107_v18  ;;  %452 = vmatpush.msrb.mxu0 %v155_v21  ;;  %v61_v18 = vld [vmem:[%s1518_s0 + $0x178] sm:$0xff]  ;;  %v184_v21 = vld [vmem:[%s1516_s1 + $0x310] sm:$0xff] }
  0x37   :  { %565 = vmatpush.msrb.mxu3 %v213_v32  ;;  %528 = vmatpush.msrb.mxu2 %v193_v36  ;;  %v182_v32 = vld [vmem:[%s1516_s1 + $0x300] sm:$0xff]  ;;  %v45_v34 = vld [vmem:[%s1518_s0 + $0xf8] sm:$0xff] }
  0x38   :  { %330 = vmatpush.msrb.mxu1 %v106_v22  ;;  %453 = vmatpush.msrb.mxu0 %v154_v27  ;;  %v1190_v22 = vld [vmem:[%s1516_s1 + $0x458] sm:$0xff]  ;;  %v202_v27 = vld [vmem:[%s1516_s1 + $0x3a0] sm:$0xff] }
  0x39   :  { %315 = vmatmul.f32.gmra.mxu1 %v77_v24  ;;  %303 = vmatmul.f32.gmra.mxu0 %v41_v28  ;;  %v203_v24 = vld [vmem:[%s1516_s1 + $0x3a8] sm:$0xff]  ;;  %v1211_v28 = vld [vmem:[%s1516_s1 + $0x450] sm:$0xff]  ;;  %v170_v36 = vld [vmem:[%s1516_s1 + $0x2a0] sm:$0xff] }
  0x3a   :  { %331 = vmatpush.msrb.mxu1 %v105_v26  ;;  %454 = vmatpush.msrb.mxu0 %v153_v33  ;;  %v183_v26 = vld [vmem:[%s1516_s1 + $0x308] sm:$0xff]  ;;  %v201_v33 = vld [vmem:[%s1516_s1 + $0x398] sm:$0xff] }
  0x3b   :  { %566 = vmatpush.msrb.mxu3 %v212_v39  ;;  %260 = vperm.xlu2 %703, %v234_v41   ;;  %v51_v39 = vld [vmem:[%s1518_s0 + $0x128] sm:$0xff]  ;;  %v169_v41 = vld [vmem:[%s1516_s1 + $0x298] sm:$0xff] }
  0x3c   :  { %332 = vmatpush.msrb.mxu1 %v104_v30  ;;  %455 = vmatpush.msrb.mxu0 %v152_v37  ;;  %v171_v30 = vld [vmem:[%s1516_s1 + $0x2a8] sm:$0xff] }
  0x3d   :  { %275 = vperm.xlu1 %702, %v237_v43   ;;  %529 = vmatpush.msrb.mxu2 %v192_v45  ;;  %v223_v37 = vld [vmem:[%s1516_s1 + $0x448] sm:$0xff]  ;;  %v221_v43 = vld [vmem:[%s1516_s1 + $0x438] sm:$0xff]  ;;  %v168_v45 = vld [vmem:[%s1516_s1 + $0x290] sm:$0xff] }
  0x3e   :  { %333 = vmatpush.msrb.mxu1 %v103_v35  ;;  %456 = vmatpush.msrb.mxu0 %v151_v44  ;;  %v70_v35 = vld [vmem:[%s1518_s0 + $0x1c0] sm:$0xff] }
  0x3f   :  { %420 = vmatmul.f32.gmra.mxu3 %v26_v46  ;;  %385 = vmatmul.f32.gmra.mxu2 %v43_v50  ;;  %v62_v44 = vld [vmem:[%s1518_s0 + $0x180] sm:$0xff]  ;;  %v219_v50 = vld [vmem:[%s1516_s1 + $0x428] sm:$0xff] }
  0x40   :  { %334 = vmatpush.msrb.mxu1 %v102_v38  ;;  %457 = vmatpush.msrb.mxu0 %v150_v47  ;;  %v200_v38 = vld [vmem:[%s1516_s1 + $0x390] sm:$0xff]  ;;  %v54_v46 = vld [vmem:[%s1518_s0 + $0x140] sm:$0xff]  ;;  %v79_v47 = vld [vmem:[%s1518_s0 + $0x208] sm:$0xff] }
  0x41   :  { %335 = vmatmul.f32.vlgmr.msrb.gmra.mxu1 %v15_v40  ;;  %567 = vmatpush.msrb.mxu3 %v211_v48  ;;  %v222_v40 = vld [vmem:[%s1516_s1 + $0x440] sm:$0xff]  ;;  %v167_v48 = vld [vmem:[%s1516_s1 + $0x288] sm:$0xff] }
  0x42   :  { %483 = vmatpush.msra.mxu1 %v181_v42  ;;  %458 = vmatmul.f32.vlgmr.msrb.gmra.mxu0 %v18_v49  ;;  %v199_v42 = vld [vmem:[%s1516_s1 + $0x388] sm:$0xff]  ;;  %v198_v49 = vld [vmem:[%s1516_s1 + $0x380] sm:$0xff] }
  0x43   :  { %530 = vmatpush.msrb.mxu2 %v191_v52  ;;  %568 = vmatpush.msrb.mxu3 %v210_v53  ;;  %v166_v52 = vld [vmem:[%s1516_s1 + $0x280] sm:$0xff] }
  0x44   :  { %484 = vmatpush.msra.mxu1 %v180_v31  ;;  %606 = vmatpush.msra.mxu0 %v1082_v54  ;;  %v220_v31 = vld [vmem:[%s1516_s1 + $0x430] sm:$0xff]  ;;  %v218_v53 = vld [vmem:[%s1516_s1 + $0x420] sm:$0xff] }
  0x45   :  { %265 = vperm.xlu2 %703, %v235_v56   ;;  %531 = vmatpush.msrb.mxu2 %v190_v58  ;;  %v63_v56 = vld [vmem:[%s1518_s0 + $0x188] sm:$0xff]  ;;  %v216_v58 = vld [vmem:[%s1516_s1 + $0x410] sm:$0xff] }
  0x46   :  { %485 = vmatpush.msra.mxu1 %v179_v51  ;;  %569 = vmatpush.msrb.mxu3 %v209_v59  ;;  %v60_v51 = vld [vmem:[%s1518_s0 + $0x170] sm:$0xff]  ;;  %v69_v59 = vld [vmem:[%s1518_s0 + $0x1b8] sm:$0xff] }
  0x47   :  { %607 = vmatpush.msra.mxu0 %v1103_v60  ;;  %423 = vmatmul.f32.gmra.mxu3 %v35_v61  ;;  %v214_v61 = vld [vmem:[%s1516_s1 + $0x400] sm:$0xff] }
  0x48   :  { %486 = vmatpush.msra.mxu1 %v178_v57  ;;  %532 = vmatpush.msrb.mxu2 %v189_v63  ;;  %v20_v57 = vld [vmem:[%s1518_s0 + $0x30] sm:$0xff] }
  0x49   :  { %338 = vmatmul.f32.gmra.mxu1 %v24_v55  ;;  %570 = vmatpush.msrb.mxu3 %v208_v0  ;;  %v217_v55 = vld [vmem:[%s1516_s1 + $0x418] sm:$0xff]  ;;  %v72_v63 = vld [vmem:[%s1518_s0 + $0x1d0] sm:$0xff] }
  0x4a   :  { %487 = vmatpush.msra.mxu1 %v177_v62  ;;  %461 = vmatmul.f32.gmra.mxu0 %v27_v1  ;;  %v80_v62 = vld [vmem:[%s1518_s0 + $0x210] sm:$0xff]  ;;  %v29_v0 = vld [vmem:[%s1518_s0 + $0x78] sm:$0xff]  ;;  %v78_v1 = vld [vmem:[%s1518_s0 + $0x200] sm:$0xff] }
  0x4b   :  { %388 = vmatmul.f32.gmra.mxu2 %v52_v2  ;;  %571 = vmatpush.msrb.mxu3 %v207_v5  ;;  %v21_v2 = vld [vmem:[%s1518_s0 + $0x38] sm:$0xff]  ;;  %v19_v5 = vld [vmem:[%s1518_s0 + $0x28] sm:$0xff] }
  0x4c   :  { %488 = vmatpush.msra.mxu1 %v176_v3  ;;  %533 = vmatpush.msrb.mxu2 %v188_v4  ;;  %v81_v3 = vld [vmem:[%s1518_s0 + $0x218] sm:$0xff]  ;;  %v38_v4 = vld [vmem:[%s1518_s0 + $0xc0] sm:$0xff] }
  0x4d   :  { %608 = vmatpush.msra.mxu0 %v1136_v6  ;;  %572 = vmatpush.msrb.mxu3 %v206_v10  ;;  %v39_v10 = vld [vmem:[%s1518_s0 + $0xc8] sm:$0xff] }
  0x4e   :  { %534 = vmatpush.msrb.mxu2 %v187_v8  ;;  %489 = vmatpush.msra.mxu1 %v175_v9  ;;  %v47_v8 = vld [vmem:[%s1518_s0 + $0x108] sm:$0xff]  ;;  %v28_v9 = vld [vmem:[%s1518_s0 + $0x70] sm:$0xff] }
  0x4f   :  { %609 = vmatpush.msra.mxu0 %v1157_v12  ;;  %426 = vmatmul.f32.gmra.mxu3 %v44_v13  ;;  %v37_v13 = vld [vmem:[%s1518_s0 + $0xb8] sm:$0xff] }
  0x50   :  { %535 = vmatpush.msrb.mxu2 %v186_v11  ;;  %490 = vmatpush.msra.mxu1 %v174_v14  ;;  %v31_v11 = vld [vmem:[%s1518_s0 + $0x88] sm:$0xff]  ;;  %v48_v14 = vld [vmem:[%s1518_s0 + $0x110] sm:$0xff] }
  0x51   :  { %341 = vmatmul.f32.gmra.mxu1 %v33_v7  ;;  %573 = vmatpush.msrb.mxu3 %v205_v15  ;;  %v22_v7 = vld [vmem:[%s1518_s0 + $0x40] sm:$0xff]  ;;  %v40_v15 = vld [vmem:[%s1518_s0 + $0xd0] sm:$0xff] }
  0x52   :  { %536 = vmatpush.msrb.mxu2 %v185_v16  ;;  %464 = vmatmul.f32.gmra.mxu0 %v36_v17  ;;  %v65_v16 = vld [vmem:[%s1518_s0 + $0x198] sm:$0xff]  ;;  %v46_v17 = vld [vmem:[%s1518_s0 + $0x100] sm:$0xff] }
  0x53   :  { %391 = vmatmul.f32.gmra.mxu2 %v61_v18  ;;  %491 = vmatpush.msra.mxu1 %v173_v19  ;;  %v57_v18 = vld [vmem:[%s1518_s0 + $0x158] sm:$0xff] }
  0x54   :  { %574 = vmatpush.msrb.mxu3 %v204_v20  ;;  %537 = vmatpush.msrb.mxu2 %v184_v21  ;;  %v49_v19 = vld [vmem:[%s1518_s0 + $0x118] sm:$0xff]  ;;  %v74_v20 = vld [vmem:[%s1518_s0 + $0x1e0] sm:$0xff] }
  0x55   :  { %610 = vmatpush.msra.mxu0 %v1190_v22  ;;  %492 = vmatpush.msra.mxu1 %v172_v25  ;;  %v58_v25 = vld [vmem:[%s1518_s0 + $0x160] sm:$0xff] }
  0x56   :  { %575 = vmatpush.msrb.mxu3 %v203_v24  ;;  %538 = vmatpush.msrb.mxu2 %v183_v26  ;;  %v66_v24 = vld [vmem:[%s1518_s0 + $0x1a0] sm:$0xff]  ;;  %v83_v26 = vld [vmem:[%s1518_s0 + $0x228] sm:$0xff] }
  0x57   :  { %611 = vmatpush.msra.mxu0 %v1211_v28  ;;  %429 = vmatmul.f32.gmra.mxu3 %v53_v29 }
  0x58   :  { %576 = vmatpush.msrb.mxu3 %v202_v27  ;;  %493 = vmatpush.msra.mxu1 %v171_v30  ;;  %v75_v30 = vld [vmem:[%s1518_s0 + $0x1e8] sm:$0xff] }
  0x59   :  { %344 = vmatmul.f32.gmra.mxu1 %v42_v23  ;;  %539 = vmatpush.msrb.mxu2 %v182_v32  ;;  %v67_v32 = vld [vmem:[%s1518_s0 + $0x1a8] sm:$0xff] }
  0x5a   :  { %577 = vmatpush.msrb.mxu3 %v201_v33  ;;  %467 = vmatmul.f32.gmra.mxu0 %v45_v34  ;;  %v76_v33 = vld [vmem:[%s1518_s0 + $0x1f0] sm:$0xff] }
  0x5b   :  { %394 = vmatmul.f32.gmra.mxu2 %v70_v35  ;;  %494 = vmatpush.msra.mxu1 %v170_v36  ;;  %v73_v36 = vld [vmem:[%s1518_s0 + $0x1d8] sm:$0xff] }
  0x5c   :  { %612 = vmatpush.msra.mxu0 %v223_v37  ;;  %684 = vmatpush.msra.mxu2 %v1082_v54  ;;  %v71_v54 = vld [vmem:[%s1518_s0 + $0x1c8] sm:$0xff] }
  0x5d   :  { %578 = vmatpush.msrb.mxu3 %v200_v38  ;;  %495 = vmatpush.msra.mxu1 %v169_v41  ;;  %v84_v38 = vld [vmem:[%s1518_s0 + $0x230] sm:$0xff]  ;;  %v82_v41 = vld [vmem:[%s1518_s0 + $0x220] sm:$0xff] }
  0x5e   :  { %613 = vmatpush.msra.mxu0 %v222_v40  ;;  %685 = vmatpush.msra.mxu2 %v1103_v60  ;;  %v215_v60 = vld [vmem:[%s1516_s1 + $0x408] sm:$0xff] }
  0x5f   :  { %579 = vmatpush.msrb.mxu3 %v199_v42  ;;  %496 = vmatpush.msra.mxu1 %v168_v45 }
  0x60   :  { %614 = vmatpush.msra.mxu0 %v221_v43  ;;  %432 = vmatmul.f32.gmra.mxu3 %v62_v44 }
  0x61   :  { %347 = vmatmul.f32.gmra.mxu1 %v51_v39  ;;  %686 = vmatpush.msra.mxu2 %v1136_v6  ;;  %v30_v6 = vld [vmem:[%s1518_s0 + $0x80] sm:$0xff]  ;;  %v85_v39 = vld [vmem:[%s1518_s0 + $0x238] sm:$0xff] }
  0x62   :  { %615 = vmatpush.msra.mxu0 %v220_v31  ;;  %497 = vmatpush.msra.mxu1 %v167_v48 }
  0x63   :  { %470 = vmatmul.f32.gmra.mxu0 %v54_v46  ;;  %397 = vmatmul.f32.gmra.mxu2 %v79_v47 }
  0x64   :  { %580 = vmatpush.msrb.mxu3 %v198_v49  ;;  %616 = vmatpush.msra.mxu0 %v219_v50 }
  0x65   :  { %687 = vmatpush.msra.mxu2 %v1157_v12  ;;  %498 = vmatpush.msra.mxu1 %v166_v52  ;;  %v56_v12 = vld [vmem:[%s1518_s0 + $0x150] sm:$0xff] }
  0x66   :  { %617 = vmatpush.msra.mxu0 %v218_v53 }
  0x67   :  { %688 = vmatpush.msra.mxu2 %v1190_v22  ;;  %v55_v22 = vld [vmem:[%s1518_s0 + $0x148] sm:$0xff] }
  0x68   :  { %435 = vmatmul.f32.gmra.mxu3 %v71_v54  ;;  %618 = vmatpush.msra.mxu0 %v217_v55 }
  0x69   :  { %350 = vmatmul.f32.gmra.mxu1 %v60_v51  ;;  %689 = vmatpush.msra.mxu2 %v1211_v28  ;;  %v64_v28 = vld [vmem:[%s1518_s0 + $0x190] sm:$0xff] }
  0x6a   :  { %619 = vmatpush.msra.mxu0 %v216_v58 }
  0x6b   :  { %473 = vmatmul.f32.gmra.mxu0 %v63_v56  ;;  %540 = vmatmul.f32.vlgmr.msrb.gmra.mxu2 %v20_v57 }
  0x6c   :  { %690 = vmatpush.msra.mxu2 %v223_v37  ;;  %620 = vmatpush.msra.mxu0 %v215_v60 }
  0x6e   :  { %691 = vmatpush.msra.mxu2 %v222_v40  ;;  %621 = vmatpush.msra.mxu0 %v214_v61 }
  0x70   :  { %438 = vmatmul.f32.gmra.mxu3 %v80_v62  ;;  %692 = vmatpush.msra.mxu2 %v221_v43 }
  0x71   :  { %353 = vmatmul.f32.gmra.mxu1 %v69_v59 }
  0x72   :  { %693 = vmatpush.msra.mxu2 %v220_v31 }
  0x73   :  { %476 = vmatmul.f32.gmra.mxu0 %v72_v63  ;;  %543 = vmatmul.f32.gmra.mxu2 %v29_v0 }
  0x74   :  { %694 = vmatpush.msra.mxu2 %v219_v50 }
  0x76   :  { %695 = vmatpush.msra.mxu2 %v218_v53 }
  0x78   :  { %581 = vmatmul.f32.vlgmr.msrb.gmra.mxu3 %v21_v2  ;;  %696 = vmatpush.msra.mxu2 %v217_v55 }
  0x79   :  { %356 = vmatmul.f32.gmra.mxu1 %v78_v1 }
  0x7a   :  { %697 = vmatpush.msra.mxu2 %v216_v58 }
  0x7b   :  { %479 = vmatmul.f32.gmra.mxu0 %v81_v3  ;;  %546 = vmatmul.f32.gmra.mxu2 %v38_v4 }
  0x7c   :  { %698 = vmatpush.msra.mxu2 %v215_v60 }
  0x7e   :  { %699 = vmatpush.msra.mxu2 %v214_v61 }
  0x80   :  { %584 = vmatmul.f32.gmra.mxu3 %v30_v6 }
  0x81   :  { %499 = vmatmul.f32.vlgmr.msra.gmra.mxu1 %v19_v5 }
  0x83   :  { %622 = vmatmul.f32.vlgmr.msra.gmra.mxu0 %v22_v7  ;;  %549 = vmatmul.f32.gmra.mxu2 %v47_v8  ;;  %v241_v44 = vpop.permute.xlu0 %240 }
  0x88   :  { %587 = vmatmul.f32.gmra.mxu3 %v39_v10 }
  0x89   :  { %502 = vmatmul.f32.gmra.mxu1 %v28_v9 }
  0x8b   :  { %625 = vmatmul.f32.gmra.mxu0 %v31_v11  ;;  %552 = vmatmul.f32.gmra.mxu2 %v56_v12 }
  0x8d   :  { %v251_v58 = vpop.permute.xlu1 %250 }
  0x8f   :  { %v246_v51 = vpop.permute.xlu0 %245 }
  0x90   :  { %590 = vmatmul.f32.gmra.mxu3 %v48_v14 }
  0x91   :  { %505 = vmatmul.f32.gmra.mxu1 %v37_v13 }
  0x93   :  { %628 = vmatmul.f32.gmra.mxu0 %v40_v15  ;;  %555 = vmatmul.f32.gmra.mxu2 %v65_v16 }
  0x95   :  { %v261_v8 = vpop.permute.xlu2 %260 }
  0x98   :  { %593 = vmatmul.f32.gmra.mxu3 %v57_v18 }
  0x99   :  { %508 = vmatmul.f32.gmra.mxu1 %v46_v17 }
  0x9b   :  { %631 = vmatmul.f32.gmra.mxu0 %v49_v19  ;;  %558 = vmatmul.f32.gmra.mxu2 %v74_v20 }
  0x9d   :  { %v256_v3 = vpop.permute.xlu1 %255 }
  0x9e   :  { %v1388_v21 = vpop.f32.mrf.mxu1  ;;  %v295_v23 = vpop.f32.mrf.mxu0 }
  0x9f   :  { %v296_v45 = vadd.f32 %v295_v23, %v241_v44  ;;  %v308_v12 = vadd.f32 %v1388_v21, %v261_v8  ;;  %v266_v18 = vpop.permute.xlu2 %265  ;;  %v271_v21 = vpop.permute.xlu0 %270 }
  0xa0   :  { %596 = vmatmul.f32.gmra.mxu3 %v66_v24 }
  0xa1   :  { %511 = vmatmul.f32.gmra.mxu1 %v55_v22 }
  0xa3   :  { %634 = vmatmul.f32.gmra.mxu0 %v58_v25  ;;  %561 = vmatmul.f32.gmra.mxu2 %v83_v26 }
  0xa6   :  { %v1402_v27 = vpop.f32.mrf.mxu1  ;;  %v298_v29 = vpop.f32.mrf.mxu0 }
  0xa7   :  { %v299_v52 = vadd.f32 %v298_v29, %v246_v51  ;;  %v311_v20 = vadd.f32 %v1402_v27, %v266_v18 }
  0xa8   :  { %599 = vmatmul.f32.gmra.mxu3 %v75_v30  ;;  %v377_v34 = vpop.f32.mrf.mxu2 }
  0xa9   :  { %514 = vmatmul.f32.gmra.mxu1 %v64_v28 }
  0xab   :  { %637 = vmatmul.f32.gmra.mxu0 %v67_v32  ;;  %640 = vmatmul.f32.vlgmr.msra.gmra.mxu2 %v76_v33 }
  0xae   :  { %v1416_v35 = vpop.f32.mrf.mxu1  ;;  %v301_v37 = vpop.f32.mrf.mxu0 }
  0xaf   :  { %v302_v60 = vadd.f32 %v301_v37, %v251_v58  ;;  %v314_v29 = vadd.f32 %v1416_v35, %v271_v21  ;;  %v276_v27 = vpop.permute.xlu1 %275 }
  0xb0   :  { %602 = vmatmul.f32.gmra.mxu3 %v84_v38  ;;  %v380_v42 = vpop.f32.mrf.mxu2 }
  0xb1   :  { %517 = vmatmul.f32.gmra.mxu1 %v73_v36 }
  0xb3   :  { %643 = vmatmul.f32.gmra.mxu2 %v85_v39 }
  0xb6   :  { %v1427_v40 = vpop.f32.mrf.mxu1  ;;  %v304_v43 = vpop.f32.mrf.mxu0 }
  0xb7   :  { %v305_v4 = vadd.f32 %v304_v43, %v256_v3  ;;  %v317_v38 = vadd.f32 %v1427_v40, %v276_v27 }
  0xb8   :  { %v418_v46 = vpop.f32.mrf.mxu3  ;;  %v383_v48 = vpop.f32.mrf.mxu2 }
  0xb9   :  { %520 = vmatmul.f32.gmra.mxu1 %v82_v41 }
  0xbe   :  { %v336_v31 = vpop.f32.mrf.mxu1 }
  0xbf   :  { %v337_v47 = vadd.f32 %v336_v31, %v296_v45  ;;  %v459_v50 = vpop.f32.mrf.mxu0 }
  0xc1   :  { %v378_v49 = vadd.f32 %v377_v34, %v337_v47 }
  0xc2   :  { %v421_v55 = vpop.f32.mrf.mxu3  ;;  %v386_v57 = vpop.f32.mrf.mxu2 }
  0xc3   :  { %v419_v43 = vadd.f32 %v418_v46, %v378_v49 }
  0xc5   :  { %v460_v31 = vadd.f32 %v459_v50, %v419_v43 }
  0xc6   :  { %v339_v53 = vpop.f32.mrf.mxu1 }
  0xc7   :  { %v340_v54 = vadd.f32 %v339_v53, %v299_v52  ;;  %v462_v59 = vpop.f32.mrf.mxu0 }
  0xc9   :  { %v381_v56 = vadd.f32 %v380_v42, %v340_v54 }
  0xca   :  { %v424_v63 = vpop.f32.mrf.mxu3 }
  0xcb   :  { %v422_v52 = vadd.f32 %v421_v55, %v381_v56 }
  0xcd   :  { %v463_v40 = vadd.f32 %v462_v59, %v422_v52 }
  0xce   :  { %v342_v61 = vpop.f32.mrf.mxu1  ;;  %v389_v1 = vpop.f32.mrf.mxu2 }
  0xcf   :  { %v343_v62 = vadd.f32 %v342_v61, %v302_v60  ;;  %v1432_v2 = vpop.f32.mrf.mxu0 }
  0xd1   :  { %v384_v0 = vadd.f32 %v383_v48, %v343_v62 }
  0xd2   :  { %v1434_v7 = vpop.f32.mrf.mxu3 }
  0xd6   :  { %v345_v5 = vpop.f32.mrf.mxu1  ;;  %v392_v10 = vpop.f32.mrf.mxu2 }
  0xd7   :  { %v346_v6 = vadd.f32 %v345_v5, %v305_v4  ;;  %v1438_v11 = vpop.f32.mrf.mxu0 }
  0xd9   :  { %v1436_v9 = vadd.f32 %v386_v57, %v346_v6 }
  0xda   :  { %v1441_v15 = vpop.f32.mrf.mxu3 }
  0xde   :  { %v348_v13 = vpop.f32.mrf.mxu1  ;;  %v395_v17 = vpop.f32.mrf.mxu2 }
  0xdf   :  { %v349_v14 = vadd.f32 %v348_v13, %v308_v12  ;;  %v428_v12 = vadd.f32 %v1434_v7, %v1436_v9 }
  0xe0   :  { %v1445_v19 = vpop.f32.mrf.mxu0 }
  0xe1   :  { %v1443_v16 = vadd.f32 %v389_v1, %v349_v14  ;;  %v425_v1 = vadd.f32 %v424_v63, %v384_v0 }
  0xe3   :  { %v1448_v24 = vpop.f32.mrf.mxu3  ;;  %v466_v4 = vadd.f32 %v1432_v2, %v425_v1 }
  0xe6   :  { %v351_v22 = vpop.f32.mrf.mxu1  ;;  %v398_v26 = vpop.f32.mrf.mxu2 }
  0xe7   :  { %v352_v23 = vadd.f32 %v351_v22, %v311_v20 }
  0xe8   :  { %v1452_v28 = vpop.f32.mrf.mxu0 }
  0xe9   :  { %v1450_v25 = vadd.f32 %v392_v10, %v352_v23 }
  0xeb   :  { %v1455_v33 = vpop.f32.mrf.mxu3 }
  0xee   :  { %v354_v30 = vpop.f32.mrf.mxu1  ;;  %v541_v36 = vpop.f32.mrf.mxu2 }
  0xef   :  { %v355_v32 = vadd.f32 %v354_v30, %v314_v29 }
  0xf0   :  { %v1459_v37 = vpop.f32.mrf.mxu0 }
  0xf1   :  { %v1457_v34 = vadd.f32 %v395_v17, %v355_v32  ;;  %v469_v17 = vadd.f32 %v1438_v11, %v428_v12 }
  0xf3   :  { %v1462_v42 = vpop.f32.mrf.mxu3  ;;  %v437_v52 = vadd.f32 %v1455_v33, %v1457_v34 }
  0xf6   :  { %v357_v39 = vpop.f32.mrf.mxu1  ;;  %v544_v35 = vpop.f32.mrf.mxu2 }
  0xf7   :  { %v358_v41 = vadd.f32 %v357_v39, %v317_v38  ;;  %v434_v39 = vadd.f32 %v1448_v24, %v1450_v25 }
  0xf8   :  { %v1466_v45 = vpop.f32.mrf.mxu0 }
  0xf9   :  { %v1464_v44 = vadd.f32 %v398_v26, %v358_v41  ;;  %v431_v26 = vadd.f32 %v1441_v15, %v1443_v16 }
  0xfb   :  { %v582_v51 = vpop.f32.mrf.mxu3  ;;  %v472_v30 = vadd.f32 %v1445_v19, %v431_v26 }
  0xfe   :  { %v500_v47 = vpop.f32.mrf.mxu1  ;;  %v547_v54 = vpop.f32.mrf.mxu2 }
  0xff   :  { %v501_v48 = vadd.f32 %v500_v47, %v460_v31 }
 0x100   :  { %v623_v58 = vpop.f32.mrf.mxu0 }
 0x101   :  { %v542_v53 = vadd.f32 %v541_v36, %v501_v48 }
 0x103   :  { %v583_v57 = vadd.f32 %v582_v51, %v542_v53  ;;  %v585_v49 = vpop.f32.mrf.mxu3 }
 0x105   :  { %v624_v60 = vadd.f32 %v623_v58, %v583_v57  ;;  %v478_v57 = vadd.f32 %v1459_v37, %v437_v52 }
 0x106   :  { %v503_v61 = vpop.f32.mrf.mxu1  ;;  %v550_v3 = vpop.f32.mrf.mxu2 }
 0x107   :  { %v647_v62 = vmax.f32 %v624_v60, 0.0  ;;  %v504_v46 = vadd.f32 %v503_v61, %v463_v40 }
 0x108   :  { %v626_v56 = vpop.f32.mrf.mxu0 }
 0x109   :  { %656 = vst.msk [vmem:[%s1519_s3] sm:$0xff] %vm655_vm0, %v647_v62  ;;  %v545_v50 = vadd.f32 %v544_v35, %v504_v46  ;;  %v475_v35 = vadd.f32 %v1452_v28, %v434_v39  ;;  %v440_v62 = vadd.f32 %v1462_v42, %v1464_v44 }
 0x10b   :  { %v586_v55 = vadd.f32 %v585_v49, %v545_v50  ;;  %v588_v10 = vpop.f32.mrf.mxu3  ;;  %v481_v49 = vadd.f32 %v1466_v45, %v440_v62 }
 0x10d   :  { %v627_v5 = vadd.f32 %v626_v56, %v586_v55 }
 0x10e   :  { %v506_v59 = vpop.f32.mrf.mxu1  ;;  %v553_v0 = vpop.f32.mrf.mxu2 }
 0x10f   :  { %v648_v6 = vmax.f32 %v627_v5, 0.0  ;;  %v507_v8 = vadd.f32 %v506_v59, %v466_v4 }
 0x110   :  { %v629_v14 = vpop.f32.mrf.mxu0 }
 0x111   :  { %657 = vst.msk [vmem:[%s1519_s3 + $0x8] sm:$0xff] %vm655_vm0, %v648_v6  ;;  %v548_v63 = vadd.f32 %v547_v54, %v507_v8 }
 0x113   :  { %v589_v13 = vadd.f32 %v588_v10, %v548_v63  ;;  %v591_v23 = vpop.f32.mrf.mxu3 }
 0x115   :  { %v630_v2 = vadd.f32 %v629_v14, %v589_v13 }
 0x116   :  { %v509_v18 = vpop.f32.mrf.mxu1  ;;  %v556_v9 = vpop.f32.mrf.mxu2 }
 0x117   :  { %v649_v20 = vmax.f32 %v630_v2, 0.0  ;;  %v510_v22 = vadd.f32 %v509_v18, %v469_v17 }
 0x118   :  { %v632_v29 = vpop.f32.mrf.mxu0 }
 0x119   :  { %658 = vst.msk [vmem:[%s1519_s3 + $0x10] sm:$0xff] %vm655_vm0, %v649_v20  ;;  %v551_v7 = vadd.f32 %v550_v3, %v510_v22 }
 0x11b   :  { %v592_v21 = vadd.f32 %v591_v23, %v551_v7  ;;  %v594_v38 = vpop.f32.mrf.mxu3 }
 0x11d   :  { %v633_v11 = vadd.f32 %v632_v29, %v592_v21 }
 0x11e   :  { %v512_v32 = vpop.f32.mrf.mxu1  ;;  %v559_v16 = vpop.f32.mrf.mxu2 }
 0x11f   :  { %v650_v36 = vmax.f32 %v633_v11, 0.0  ;;  %v513_v27 = vadd.f32 %v512_v32, %v472_v30 }
 0x120   :  { %v635_v43 = vpop.f32.mrf.mxu0 }
 0x121   :  { %659 = vst.msk [vmem:[%s1519_s3 + $0x18] sm:$0xff] %vm655_vm0, %v650_v36  ;;  %v554_v15 = vadd.f32 %v553_v0, %v513_v27 }
 0x123   :  { %v595_v41 = vadd.f32 %v594_v38, %v554_v15  ;;  %v597_v51 = vpop.f32.mrf.mxu3 }
 0x125   :  { %v636_v19 = vadd.f32 %v635_v43, %v595_v41 }
 0x126   :  { %v515_v31 = vpop.f32.mrf.mxu1  ;;  %v562_v25 = vpop.f32.mrf.mxu2 }
 0x127   :  { %v651_v47 = vmax.f32 %v636_v19, 0.0  ;;  %v516_v48 = vadd.f32 %v515_v31, %v475_v35 }
 0x128   :  { %v638_v54 = vpop.f32.mrf.mxu0 }
 0x129   :  { %660 = vst.msk [vmem:[%s1519_s3 + $0x20] sm:$0xff] %vm655_vm0, %v651_v47  ;;  %v557_v24 = vadd.f32 %v556_v9, %v516_v48 }
 0x12b   :  { %v598_v53 = vadd.f32 %v597_v51, %v557_v24  ;;  %v600_v61 = vpop.f32.mrf.mxu3 }
 0x12d   :  { %v639_v28 = vadd.f32 %v638_v54, %v598_v53 }
 0x12e   :  { %v518_v58 = vpop.f32.mrf.mxu1  ;;  %v641_v34 = vpop.f32.mrf.mxu2 }
 0x12f   :  { %v652_v40 = vmax.f32 %v639_v28, 0.0  ;;  %v519_v60 = vadd.f32 %v518_v58, %v478_v57 }
 0x131   :  { %661 = vst.msk [vmem:[%s1519_s3 + $0x28] sm:$0xff] %vm655_vm0, %v652_v40  ;;  %v560_v33 = vadd.f32 %v559_v16, %v519_v60 }
 0x133   :  { %v601_v46 = vadd.f32 %v600_v61, %v560_v33  ;;  %v603_v55 = vpop.f32.mrf.mxu3 }
 0x135   :  { %v642_v1 = vadd.f32 %v641_v34, %v601_v46 }
 0x136   :  { %v521_v37 = vpop.f32.mrf.mxu1  ;;  %v644_v44 = vpop.f32.mrf.mxu2 }
 0x137   :  { %v653_v50 = vmax.f32 %v642_v1, 0.0  ;;  %v522_v3 = vadd.f32 %v521_v37, %v481_v49 }
 0x139   :  { %662 = vst.msk [vmem:[%s1519_s3 + $0x30] sm:$0xff] %vm655_vm0, %v653_v50  ;;  %v563_v42 = vadd.f32 %v562_v25, %v522_v3 }
 0x13b   :  { %v604_v56 = vadd.f32 %v603_v55, %v563_v42 }
 0x13d   :  { %v645_v4 = vadd.f32 %v644_v44, %v604_v56 }
 0x13f   :  { %v654_v5 = vmax.f32 %v645_v4, 0.0 }
 0x141   :  { %663 = vst.msk [vmem:[%s1519_s3 + $0x38] sm:$0xff] %vm655_vm0, %v654_v5 }

// kernel: encoder_forward.9
= control target key start
LH: loop header
LB: loop body
LE: loop exit
PB: predicated region body
PF: predicated region fallthrough
CT: control target
= control target key end

     0   :  { %vm318_vm0 = vcmask 523264   ;;  %vm802_vm1 = vcmask 64512   ;;  %s1794_s1 = inlined_call_operand.vmem [shape: f32[1344,8], index: 1, kind: input, shape index: {}]   ;;  %s1795_s0 = inlined_call_operand.vmem [shape: f32[64,1344], index: 0, kind: input, shape index: {}]   ;;  %s1796_s2 = inlined_call_operand.vmem [shape: f32[64,1], index: 2, kind: input, shape index: {}]   ;;  %s1797_s3 = inlined_call_operand.vmem [shape: f32[64,8], index: 3, kind: output, shape index: {}]  }
   0x1   :  { %v117_v0 = vld [vmem:[%s1794_s1 + $0x78] sm:$0xff]  ;;  %v116_v3 = vld [vmem:[%s1794_s1 + $0x70] sm:$0xff]  ;;  %v115_v6 = vld [vmem:[%s1794_s1 + $0x68] sm:$0xff] }
   0x2   :  { %v133_v1 = vld [vmem:[%s1794_s1 + $0xf8] sm:$0xff]  ;;  %343 = vmatpush.msra.mxu0 %v117_v0  ;;  %823 = vmatpush.msra.mxu3 %v117_v0  ;;  %v132_v4 = vld [vmem:[%s1794_s1 + $0xf0] sm:$0xff]  ;;  %v131_v7 = vld [vmem:[%s1794_s1 + $0xe8] sm:$0xff] }
   0x3   :  { %v149_v2 = vld [vmem:[%s1794_s1 + $0x178] sm:$0xff]  ;;  %v148_v5 = vld [vmem:[%s1794_s1 + $0x170] sm:$0xff]  ;;  %384 = vmatpush.msra.mxu1 %v133_v1  ;;  %v147_v8 = vld [vmem:[%s1794_s1 + $0x168] sm:$0xff] }
   0x4   :  { %425 = vmatpush.msra.mxu2 %v149_v2  ;;  %344 = vmatpush.msra.mxu0 %v116_v3  ;;  %v114_v9 = vld [vmem:[%s1794_s1 + $0x60] sm:$0xff]  ;;  %v113_v12 = vld [vmem:[%s1794_s1 + $0x58] sm:$0xff]  ;;  %v112_v15 = vld [vmem:[%s1794_s1 + $0x50] sm:$0xff] }
   0x5   :  { %824 = vmatpush.msra.mxu3 %v116_v3  ;;  %385 = vmatpush.msra.mxu1 %v132_v4  ;;  %v130_v10 = vld [vmem:[%s1794_s1 + $0xe0] sm:$0xff]  ;;  %v129_v13 = vld [vmem:[%s1794_s1 + $0xd8] sm:$0xff]  ;;  %v128_v16 = vld [vmem:[%s1794_s1 + $0xd0] sm:$0xff] }
   0x6   :  { %426 = vmatpush.msra.mxu2 %v148_v5  ;;  %345 = vmatpush.msra.mxu0 %v115_v6  ;;  %v146_v11 = vld [vmem:[%s1794_s1 + $0x160] sm:$0xff]  ;;  %v145_v14 = vld [vmem:[%s1794_s1 + $0x158] sm:$0xff]  ;;  %v144_v17 = vld [vmem:[%s1794_s1 + $0x150] sm:$0xff]  ;;  %v867_v5 = vmov 0  }
   0x7   :  { %825 = vmatpush.msra.mxu3 %v115_v6  ;;  %386 = vmatpush.msra.mxu1 %v131_v7  ;;  %v111_v18 = vld [vmem:[%s1794_s1 + $0x48] sm:$0xff]  ;;  %v110_v21 = vld [vmem:[%s1794_s1 + $0x40] sm:$0xff]  ;;  %v109_v24 = vld [vmem:[%s1794_s1 + $0x38] sm:$0xff] }
   0x8   :  { %427 = vmatpush.msra.mxu2 %v147_v8  ;;  %346 = vmatpush.msra.mxu0 %v114_v9  ;;  %v127_v19 = vld [vmem:[%s1794_s1 + $0xc8] sm:$0xff]  ;;  %v126_v22 = vld [vmem:[%s1794_s1 + $0xc0] sm:$0xff]  ;;  %v125_v25 = vld [vmem:[%s1794_s1 + $0xb8] sm:$0xff] }
   0x9   :  { %826 = vmatpush.msra.mxu3 %v114_v9  ;;  %387 = vmatpush.msra.mxu1 %v130_v10  ;;  %v143_v20 = vld [vmem:[%s1794_s1 + $0x148] sm:$0xff]  ;;  %v142_v23 = vld [vmem:[%s1794_s1 + $0x140] sm:$0xff]  ;;  %v141_v26 = vld [vmem:[%s1794_s1 + $0x138] sm:$0xff] }
   0xa   :  { %428 = vmatpush.msra.mxu2 %v146_v11  ;;  %347 = vmatpush.msra.mxu0 %v113_v12  ;;  %v108_v27 = vld [vmem:[%s1794_s1 + $0x30] sm:$0xff]  ;;  %v107_v30 = vld [vmem:[%s1794_s1 + $0x28] sm:$0xff]  ;;  %v106_v33 = vld [vmem:[%s1794_s1 + $0x20] sm:$0xff] }
   0xb   :  { %827 = vmatpush.msra.mxu3 %v113_v12  ;;  %388 = vmatpush.msra.mxu1 %v129_v13  ;;  %v124_v28 = vld [vmem:[%s1794_s1 + $0xb0] sm:$0xff]  ;;  %v123_v31 = vld [vmem:[%s1794_s1 + $0xa8] sm:$0xff]  ;;  %v122_v34 = vld [vmem:[%s1794_s1 + $0xa0] sm:$0xff] }
   0xc   :  { %429 = vmatpush.msra.mxu2 %v145_v14  ;;  %348 = vmatpush.msra.mxu0 %v112_v15  ;;  %v140_v29 = vld [vmem:[%s1794_s1 + $0x130] sm:$0xff]  ;;  %v139_v32 = vld [vmem:[%s1794_s1 + $0x128] sm:$0xff]  ;;  %v138_v35 = vld [vmem:[%s1794_s1 + $0x120] sm:$0xff] }
   0xd   :  { %828 = vmatpush.msra.mxu3 %v112_v15  ;;  %389 = vmatpush.msra.mxu1 %v128_v16  ;;  %v105_v36 = vld [vmem:[%s1794_s1 + $0x18] sm:$0xff]  ;;  %v104_v39 = vld [vmem:[%s1794_s1 + $0x10] sm:$0xff]  ;;  %v103_v42 = vld [vmem:[%s1794_s1 + $0x8] sm:$0xff] }
   0xe   :  { %430 = vmatpush.msra.mxu2 %v144_v17  ;;  %349 = vmatpush.msra.mxu0 %v111_v18  ;;  %v121_v37 = vld [vmem:[%s1794_s1 + $0x98] sm:$0xff]  ;;  %v120_v40 = vld [vmem:[%s1794_s1 + $0x90] sm:$0xff]  ;;  %v119_v43 = vld [vmem:[%s1794_s1 + $0x88] sm:$0xff] }
   0xf   :  { %829 = vmatpush.msra.mxu3 %v111_v18  ;;  %390 = vmatpush.msra.mxu1 %v127_v19  ;;  %v137_v38 = vld [vmem:[%s1794_s1 + $0x118] sm:$0xff]  ;;  %v136_v41 = vld [vmem:[%s1794_s1 + $0x110] sm:$0xff]  ;;  %v135_v44 = vld [vmem:[%s1794_s1 + $0x108] sm:$0xff] }
  0x10   :  { %431 = vmatpush.msra.mxu2 %v143_v20  ;;  %350 = vmatpush.msra.mxu0 %v110_v21  ;;  %v102_v45 = vld [vmem:[%s1794_s1] sm:$0xff]  ;;  %v15_v50 = vld [vmem:[%s1795_s0 + $0x8] sm:$0xff]  ;;  %v16_v51 = vld [vmem:[%s1795_s0 + $0x10] sm:$0xff] }
  0x11   :  { %830 = vmatpush.msra.mxu3 %v110_v21  ;;  %391 = vmatpush.msra.mxu1 %v126_v22  ;;  %v118_v46 = vld [vmem:[%s1794_s1 + $0x80] sm:$0xff]  ;;  %v165_v52 = vld [vmem:[%s1794_s1 + $0x1f8] sm:$0xff]  ;;  %v164_v56 = vld [vmem:[%s1794_s1 + $0x1f0] sm:$0xff] }
  0x12   :  { %432 = vmatpush.msra.mxu2 %v142_v23  ;;  %351 = vmatpush.msra.mxu0 %v109_v24  ;;  %v134_v47 = vld [vmem:[%s1794_s1 + $0x100] sm:$0xff]  ;;  %v213_v53 = vld [vmem:[%s1794_s1 + $0x378] sm:$0xff]  ;;  %v212_v57 = vld [vmem:[%s1794_s1 + $0x370] sm:$0xff] }
  0x13   :  { %831 = vmatpush.msra.mxu3 %v109_v24  ;;  %392 = vmatpush.msra.mxu1 %v125_v25  ;;  %v14_v48 = vld [vmem:[%s1795_s0] sm:$0xff]  ;;  %v181_v54 = vld [vmem:[%s1794_s1 + $0x278] sm:$0xff]  ;;  %v180_v58 = vld [vmem:[%s1794_s1 + $0x270] sm:$0xff] }
  0x14   :  { %433 = vmatpush.msra.mxu2 %v141_v26  ;;  %352 = vmatpush.msra.mxu0 %v108_v27  ;;  %v58_v49 = vld [vmem:[%s1795_s0 + $0x160] sm:$0xff]  ;;  %v197_v55 = vld [vmem:[%s1794_s1 + $0x2f8] sm:$0xff]  ;;  %v196_v59 = vld [vmem:[%s1794_s1 + $0x2f0] sm:$0xff] }
  0x15   :  { %832 = vmatpush.msra.mxu3 %v108_v27  ;;  %393 = vmatpush.msra.mxu1 %v124_v28  ;;  %v163_v60 = vld [vmem:[%s1794_s1 + $0x1e8] sm:$0xff]  ;;  %v162_v63 = vld [vmem:[%s1794_s1 + $0x1e0] sm:$0xff]  ;;  %v25_v0 = vld [vmem:[%s1795_s0 + $0x58] sm:$0xff] }
  0x16   :  { %434 = vmatpush.msra.mxu2 %v140_v29  ;;  %353 = vmatpush.msra.mxu0 %v107_v30  ;;  %v211_v61 = vld [vmem:[%s1794_s1 + $0x368] sm:$0xff]  ;;  %v178_v1 = vld [vmem:[%s1794_s1 + $0x260] sm:$0xff]  ;;  %v69_v2 = vld [vmem:[%s1795_s0 + $0x1b8] sm:$0xff] }
  0x17   :  { %833 = vmatpush.msra.mxu3 %v107_v30  ;;  %394 = vmatpush.msra.mxu1 %v123_v31  ;;  %v179_v62 = vld [vmem:[%s1794_s1 + $0x268] sm:$0xff]  ;;  %v26_v3 = vld [vmem:[%s1795_s0 + $0x60] sm:$0xff]  ;;  %v161_v6 = vld [vmem:[%s1794_s1 + $0x1d8] sm:$0xff] }
  0x18   :  { %435 = vmatpush.msra.mxu2 %v139_v32  ;;  %354 = vmatpush.msra.mxu0 %v106_v33  ;;  %v27_v4 = vld [vmem:[%s1795_s0 + $0x68] sm:$0xff]  ;;  %v177_v7 = vld [vmem:[%s1794_s1 + $0x258] sm:$0xff]  ;;  %v210_v9 = vld [vmem:[%s1794_s1 + $0x360] sm:$0xff] }
  0x19   :  { %834 = vmatpush.msra.mxu3 %v106_v33  ;;  %395 = vmatpush.msra.mxu1 %v122_v34  ;;  %v195_v8 = vld [vmem:[%s1794_s1 + $0x2e8] sm:$0xff]  ;;  %v160_v10 = vld [vmem:[%s1794_s1 + $0x1d0] sm:$0xff]  ;;  %v270_v12 = vld [vmem:[%s1796_s2] sm:$0xff] }
  0x1a   :  { %436 = vmatpush.msra.mxu2 %v138_v35  ;;  %355 = vmatpush.msra.mxu0 %v105_v36  ;;  %v176_v11 = vld [vmem:[%s1794_s1 + $0x250] sm:$0xff]  ;;  %v194_v13 = vld [vmem:[%s1794_s1 + $0x2e0] sm:$0xff]  ;;  %v159_v14 = vld [vmem:[%s1794_s1 + $0x1c8] sm:$0xff] }
  0x1b   :  { %835 = vmatpush.msra.mxu3 %v105_v36  ;;  %396 = vmatpush.msra.mxu1 %v121_v37  ;;  %v175_v15 = vld [vmem:[%s1794_s1 + $0x248] sm:$0xff]  ;;  %v36_v16 = vld [vmem:[%s1795_s0 + $0xb0] sm:$0xff]  ;;  %v209_v17 = vld [vmem:[%s1794_s1 + $0x358] sm:$0xff] }
  0x1c   :  { %437 = vmatpush.msra.mxu2 %v137_v38  ;;  %356 = vmatpush.msra.mxu0 %v104_v39  ;;  %v158_v18 = vld [vmem:[%s1794_s1 + $0x1c0] sm:$0xff]  ;;  %v80_v20 = vld [vmem:[%s1795_s0 + $0x210] sm:$0xff]  ;;  %v37_v21 = vld [vmem:[%s1795_s0 + $0xb8] sm:$0xff] }
  0x1d   :  { %836 = vmatpush.msra.mxu3 %v104_v39  ;;  %397 = vmatpush.msra.mxu1 %v120_v40  ;;  %v174_v19 = vld [vmem:[%s1794_s1 + $0x240] sm:$0xff]  ;;  %v157_v23 = vld [vmem:[%s1794_s1 + $0x1b8] sm:$0xff]  ;;  %v156_v26 = vld [vmem:[%s1794_s1 + $0x1b0] sm:$0xff] }
  0x1e   :  { %438 = vmatpush.msra.mxu2 %v136_v41  ;;  %357 = vmatpush.msra.mxu0 %v103_v42  ;;  %v38_v22 = vld [vmem:[%s1795_s0 + $0xc0] sm:$0xff]  ;;  %v173_v24 = vld [vmem:[%s1794_s1 + $0x238] sm:$0xff]  ;;  %v208_v27 = vld [vmem:[%s1794_s1 + $0x350] sm:$0xff] }
  0x1f   :  { %837 = vmatpush.msra.mxu3 %v103_v42  ;;  %398 = vmatpush.msra.mxu1 %v119_v43  ;;  %v193_v25 = vld [vmem:[%s1794_s1 + $0x2d8] sm:$0xff]  ;;  %v172_v28 = vld [vmem:[%s1794_s1 + $0x230] sm:$0xff]  ;;  %v271_v29 = vld [vmem:[%s1796_s2 + $0x8] sm:$0xff] }
  0x20   :  { %439 = vmatpush.msra.mxu2 %v135_v44  ;;  %358 = vmatpush.msra.mxu0 %v102_v45  ;;  %v155_v30 = vld [vmem:[%s1794_s1 + $0x1a8] sm:$0xff]  ;;  %v192_v32 = vld [vmem:[%s1794_s1 + $0x2d0] sm:$0xff]  ;;  %v154_v33 = vld [vmem:[%s1794_s1 + $0x1a0] sm:$0xff] }
  0x21   :  { %838 = vmatpush.msra.mxu3 %v102_v45  ;;  %399 = vmatpush.msra.mxu1 %v118_v46  ;;  %v171_v31 = vld [vmem:[%s1794_s1 + $0x228] sm:$0xff]  ;;  %v170_v35 = vld [vmem:[%s1794_s1 + $0x220] sm:$0xff]  ;;  %v48_v37 = vld [vmem:[%s1795_s0 + $0x110] sm:$0xff] }
  0x22   :  { %440 = vmatpush.msra.mxu2 %v134_v47  ;;  %359 = vmatmul.f32.vlgmr.msra.gmra.mxu0 %v14_v48  ;;  %v47_v34 = vld [vmem:[%s1795_s0 + $0x108] sm:$0xff]  ;;  %v49_v38 = vld [vmem:[%s1795_s0 + $0x118] sm:$0xff]  ;;  %v272_v41 = vld [vmem:[%s1796_s2 + $0x10] sm:$0xff] }
  0x23   :  { %371 = vmatmul.f32.vlgmr.msra.gmra.mxu3 %v58_v49  ;;  %400 = vmatmul.f32.vlgmr.msra.gmra.mxu1 %v15_v50  ;;  %v91_v36 = vld [vmem:[%s1795_s0 + $0x268] sm:$0xff]  ;;  %v153_v39 = vld [vmem:[%s1794_s1 + $0x198] sm:$0xff]  ;;  %v152_v43 = vld [vmem:[%s1794_s1 + $0x190] sm:$0xff] }
  0x24   :  { %441 = vmatmul.f32.vlgmr.msra.gmra.mxu2 %v16_v51  ;;  %466 = vmatpush.msrb.mxu3 %v165_v52  ;;  %v207_v40 = vld [vmem:[%s1794_s1 + $0x348] sm:$0xff]  ;;  %v169_v42 = vld [vmem:[%s1794_s1 + $0x218] sm:$0xff]  ;;  %v168_v45 = vld [vmem:[%s1794_s1 + $0x210] sm:$0xff] }
  0x25   :  { %589 = vmatpush.msrb.mxu2 %v213_v53  ;;  %507 = vmatpush.msrb.mxu0 %v181_v54  ;;  %v191_v44 = vld [vmem:[%s1794_s1 + $0x2c8] sm:$0xff]  ;;  %v206_v46 = vld [vmem:[%s1794_s1 + $0x340] sm:$0xff]  ;;  %v205_v50 = vld [vmem:[%s1794_s1 + $0x338] sm:$0xff] }
  0x26   :  { %548 = vmatpush.msrb.mxu1 %v197_v55  ;;  %467 = vmatpush.msrb.mxu3 %v164_v56  ;;  %v151_v47 = vld [vmem:[%s1794_s1 + $0x188] sm:$0xff]  ;;  %v190_v48 = vld [vmem:[%s1794_s1 + $0x2c0] sm:$0xff]  ;;  %v276_v52 = vld [vmem:[%s1796_s2 + $0x30] sm:$0xff] }
  0x27   :  { %590 = vmatpush.msrb.mxu2 %v212_v57  ;;  %508 = vmatpush.msrb.mxu0 %v180_v58  ;;  %v167_v49 = vld [vmem:[%s1794_s1 + $0x208] sm:$0xff]  ;;  %v150_v51 = vld [vmem:[%s1794_s1 + $0x180] sm:$0xff]  ;;  %v60_v55 = vld [vmem:[%s1795_s0 + $0x170] sm:$0xff] }
  0x28   :  { %549 = vmatpush.msrb.mxu1 %v196_v59  ;;  %468 = vmatpush.msrb.mxu3 %v163_v60  ;;  %v166_v53 = vld [vmem:[%s1794_s1 + $0x200] sm:$0xff]  ;;  %v59_v54 = vld [vmem:[%s1795_s0 + $0x168] sm:$0xff]  ;;  %v17_v56 = vld [vmem:[%s1795_s0 + $0x18] sm:$0xff] }
  0x29   :  { %591 = vmatpush.msrb.mxu2 %v211_v61  ;;  %509 = vmatpush.msrb.mxu0 %v179_v62  ;;  %v18_v57 = vld [vmem:[%s1795_s0 + $0x20] sm:$0xff]  ;;  %v229_v58 = vld [vmem:[%s1794_s1 + $0x3f8] sm:$0xff]  ;;  %v204_v61 = vld [vmem:[%s1794_s1 + $0x330] sm:$0xff] }
  0x2a   :  { %864 = vset.pattern.permute.xlu0 %v867_v5  ;;  %469 = vmatpush.msrb.mxu3 %v162_v63  ;;  %v273_v59 = vld [vmem:[%s1796_s2 + $0x18] sm:$0xff]  ;;  %v228_v62 = vld [vmem:[%s1794_s1 + $0x3f0] sm:$0xff] }
  0x2b   :  { %362 = vmatmul.f32.gmra.mxu0 %v25_v0  ;;  %374 = vmatmul.f32.gmra.mxu3 %v69_v2  ;;  %v189_v60 = vld [vmem:[%s1794_s1 + $0x2b8] sm:$0xff]  ;;  %v188_v0 = vld [vmem:[%s1794_s1 + $0x2b0] sm:$0xff]  ;;  %v227_v2 = vld [vmem:[%s1794_s1 + $0x3e8] sm:$0xff] }
  0x2c   :  { %510 = vmatpush.msrb.mxu0 %v178_v1  ;;  %403 = vmatmul.f32.gmra.mxu1 %v26_v3  ;;  %v245_v63 = vld [vmem:[%s1794_s1 + $0x478] sm:$0xff]  ;;  %v203_v1 = vld [vmem:[%s1794_s1 + $0x328] sm:$0xff]  ;;  %v244_v3 = vld [vmem:[%s1794_s1 + $0x470] sm:$0xff] }
  0x2d   :  { %444 = vmatmul.f32.gmra.mxu2 %v27_v4  ;;  %470 = vmatpush.msrb.mxu3 %v161_v6  ;;  %v70_v4 = vld [vmem:[%s1795_s0 + $0x1c0] sm:$0xff] }
  0x2e   :  { %511 = vmatpush.msrb.mxu0 %v177_v7  ;;  %550 = vmatpush.msrb.mxu1 %v195_v8  ;;  %v274_v6 = vld [vmem:[%s1796_s2 + $0x20] sm:$0xff]  ;;  %v71_v7 = vld [vmem:[%s1795_s0 + $0x1c8] sm:$0xff]  ;;  %v28_v8 = vld [vmem:[%s1795_s0 + $0x70] sm:$0xff] }
  0x2f   :  { %592 = vmatpush.msrb.mxu2 %v210_v9  ;;  %471 = vmatpush.msrb.mxu3 %v160_v10  ;;  %v187_v9 = vld [vmem:[%s1794_s1 + $0x2a8] sm:$0xff]  ;;  %v277_v10 = vld [vmem:[%s1796_s2 + $0x38] sm:$0xff] }
  0x30   :  { %512 = vmatpush.msrb.mxu0 %v176_v11  ;;  %280 = vperm.xlu0 %864, %v270_v12   ;;  %v202_v11 = vld [vmem:[%s1794_s1 + $0x320] sm:$0xff] }
  0x31   :  { %551 = vmatpush.msrb.mxu1 %v194_v13  ;;  %472 = vmatpush.msrb.mxu3 %v159_v14  ;;  %v226_v12 = vld [vmem:[%s1794_s1 + $0x3e0] sm:$0xff]  ;;  %v243_v13 = vld [vmem:[%s1794_s1 + $0x468] sm:$0xff] }
  0x32   :  { %513 = vmatpush.msrb.mxu0 %v175_v15  ;;  %593 = vmatpush.msrb.mxu2 %v209_v17  ;;  %v186_v14 = vld [vmem:[%s1794_s1 + $0x2a0] sm:$0xff]  ;;  %v201_v15 = vld [vmem:[%s1794_s1 + $0x318] sm:$0xff] }
  0x33   :  { %365 = vmatmul.f32.gmra.mxu0 %v36_v16  ;;  %473 = vmatpush.msrb.mxu3 %v158_v18  ;;  %v225_v16 = vld [vmem:[%s1794_s1 + $0x3d8] sm:$0xff]  ;;  %v242_v17 = vld [vmem:[%s1794_s1 + $0x460] sm:$0xff] }
  0x34   :  { %514 = vmatpush.msrb.mxu0 %v174_v19  ;;  %377 = vmatmul.f32.gmra.mxu3 %v80_v20  ;;  %v185_v18 = vld [vmem:[%s1794_s1 + $0x298] sm:$0xff]  ;;  %v200_v19 = vld [vmem:[%s1794_s1 + $0x310] sm:$0xff] }
  0x35   :  { %406 = vmatmul.f32.gmra.mxu1 %v37_v21  ;;  %447 = vmatmul.f32.gmra.mxu2 %v38_v22  ;;  %v81_v20 = vld [vmem:[%s1795_s0 + $0x218] sm:$0xff]  ;;  %v275_v21 = vld [vmem:[%s1796_s2 + $0x28] sm:$0xff]  ;;  %v82_v22 = vld [vmem:[%s1795_s0 + $0x220] sm:$0xff] }
  0x36   :  { %474 = vmatpush.msrb.mxu3 %v157_v23  ;;  %515 = vmatpush.msrb.mxu0 %v173_v24  ;;  %v39_v23 = vld [vmem:[%s1795_s0 + $0xc8] sm:$0xff]  ;;  %v40_v24 = vld [vmem:[%s1795_s0 + $0xd0] sm:$0xff] }
  0x37   :  { %552 = vmatpush.msrb.mxu1 %v193_v25  ;;  %594 = vmatpush.msrb.mxu2 %v208_v27  ;;  %v224_v25 = vld [vmem:[%s1794_s1 + $0x3d0] sm:$0xff] }
  0x38   :  { %475 = vmatpush.msrb.mxu3 %v156_v26  ;;  %516 = vmatpush.msrb.mxu0 %v172_v28  ;;  %v241_v26 = vld [vmem:[%s1794_s1 + $0x458] sm:$0xff]  ;;  %v184_v27 = vld [vmem:[%s1794_s1 + $0x290] sm:$0xff]  ;;  %v199_v28 = vld [vmem:[%s1794_s1 + $0x308] sm:$0xff] }
  0x39   :  { %285 = vperm.xlu0 %864, %v271_v29   ;;  %865 = vset.pattern.permute.xlu1 %v867_v5  ;;  %v223_v29 = vld [vmem:[%s1794_s1 + $0x3c8] sm:$0xff] }
  0x3a   :  { %476 = vmatpush.msrb.mxu3 %v155_v30  ;;  %517 = vmatpush.msrb.mxu0 %v171_v31  ;;  %v240_v30 = vld [vmem:[%s1794_s1 + $0x450] sm:$0xff]  ;;  %v183_v31 = vld [vmem:[%s1794_s1 + $0x288] sm:$0xff] }
  0x3b   :  { %553 = vmatpush.msrb.mxu1 %v192_v32  ;;  %368 = vmatmul.f32.gmra.mxu0 %v47_v34  ;;  %v198_v32 = vld [vmem:[%s1794_s1 + $0x300] sm:$0xff]  ;;  %v239_v34 = vld [vmem:[%s1794_s1 + $0x448] sm:$0xff] }
  0x3c   :  { %477 = vmatpush.msrb.mxu3 %v154_v33  ;;  %518 = vmatpush.msrb.mxu0 %v170_v35  ;;  %v222_v33 = vld [vmem:[%s1794_s1 + $0x3c0] sm:$0xff] }
  0x3d   :  { %380 = vmatmul.f32.gmra.mxu3 %v91_v36  ;;  %409 = vmatmul.f32.gmra.mxu1 %v48_v37  ;;  %v182_v35 = vld [vmem:[%s1794_s1 + $0x280] sm:$0xff]  ;;  %v92_v36 = vld [vmem:[%s1795_s0 + $0x270] sm:$0xff]  ;;  %v221_v37 = vld [vmem:[%s1794_s1 + $0x3b8] sm:$0xff] }
  0x3e   :  { %450 = vmatmul.f32.gmra.mxu2 %v49_v38  ;;  %478 = vmatpush.msrb.mxu3 %v153_v39  ;;  %v93_v38 = vld [vmem:[%s1795_s0 + $0x278] sm:$0xff]  ;;  %v50_v39 = vld [vmem:[%s1795_s0 + $0x120] sm:$0xff] }
  0x3f   :  { %595 = vmatpush.msrb.mxu2 %v207_v40  ;;  %290 = vperm.xlu1 %865, %v272_v41   ;;  %v51_v40 = vld [vmem:[%s1795_s0 + $0x128] sm:$0xff]  ;;  %v1398_v41 = vld [vmem:[%s1794_s1 + $0x538] sm:$0xff] }
  0x40   :  { %519 = vmatpush.msrb.mxu0 %v169_v42  ;;  %479 = vmatpush.msrb.mxu3 %v152_v43  ;;  %v238_v42 = vld [vmem:[%s1794_s1 + $0x440] sm:$0xff]  ;;  %v220_v43 = vld [vmem:[%s1794_s1 + $0x3b0] sm:$0xff] }
  0x41   :  { %554 = vmatpush.msrb.mxu1 %v191_v44  ;;  %596 = vmatpush.msrb.mxu2 %v206_v46  ;;  %v1409_v44 = vld [vmem:[%s1794_s1 + $0x4f8] sm:$0xff] }
  0x42   :  { %520 = vmatpush.msrb.mxu0 %v168_v45  ;;  %480 = vmatpush.msrb.mxu3 %v151_v47  ;;  %v1414_v45 = vld [vmem:[%s1794_s1 + $0x530] sm:$0xff]  ;;  %v237_v46 = vld [vmem:[%s1794_s1 + $0x438] sm:$0xff]  ;;  %v219_v47 = vld [vmem:[%s1794_s1 + $0x3a8] sm:$0xff] }
  0x43   :  { %555 = vmatpush.msrb.mxu1 %v190_v48  ;;  %597 = vmatpush.msrb.mxu2 %v205_v50  ;;  %v1426_v48 = vld [vmem:[%s1794_s1 + $0x4f0] sm:$0xff] }
  0x44   :  { %521 = vmatpush.msrb.mxu0 %v167_v49  ;;  %481 = vmatpush.msrb.mxu3 %v150_v51  ;;  %v1431_v49 = vld [vmem:[%s1794_s1 + $0x528] sm:$0xff]  ;;  %v236_v50 = vld [vmem:[%s1794_s1 + $0x430] sm:$0xff]  ;;  %v218_v51 = vld [vmem:[%s1794_s1 + $0x3a0] sm:$0xff] }
  0x45   :  { %310 = vperm.xlu0 %864, %v276_v52   ;;  %412 = vmatmul.f32.gmra.mxu1 %v59_v54  ;;  %v19_v52 = vld [vmem:[%s1795_s0 + $0x28] sm:$0xff]  ;;  %v61_v54 = vld [vmem:[%s1795_s0 + $0x178] sm:$0xff] }
  0x46   :  { %522 = vmatpush.msrb.mxu0 %v166_v53  ;;  %453 = vmatmul.f32.gmra.mxu2 %v60_v55  ;;  %v1447_v53 = vld [vmem:[%s1794_s1 + $0x520] sm:$0xff]  ;;  %v20_v55 = vld [vmem:[%s1795_s0 + $0x30] sm:$0xff] }
  0x47   :  { %482 = vmatmul.f32.vlgmr.msrb.gmra.mxu3 %v17_v56  ;;  %523 = vmatmul.f32.vlgmr.msrb.gmra.mxu0 %v18_v57  ;;  %v62_v56 = vld [vmem:[%s1795_s0 + $0x180] sm:$0xff]  ;;  %v1463_v57 = vld [vmem:[%s1794_s1 + $0x4e8] sm:$0xff] }
  0x48   :  { %630 = vmatpush.msra.mxu3 %v229_v58  ;;  %295 = vperm.xlu1 %865, %v273_v59   ;;  %v235_v58 = vld [vmem:[%s1794_s1 + $0x428] sm:$0xff]  ;;  %v217_v59 = vld [vmem:[%s1794_s1 + $0x398] sm:$0xff] }
  0x49   :  { %556 = vmatpush.msrb.mxu1 %v189_v60  ;;  %598 = vmatpush.msrb.mxu2 %v204_v61  ;;  %v1475_v60 = vld [vmem:[%s1794_s1 + $0x4e0] sm:$0xff] }
  0x4a   :  { %631 = vmatpush.msra.mxu3 %v228_v62  ;;  %671 = vmatpush.msra.mxu0 %v245_v63  ;;  %v234_v61 = vld [vmem:[%s1794_s1 + $0x420] sm:$0xff]  ;;  %v216_v62 = vld [vmem:[%s1794_s1 + $0x390] sm:$0xff]  ;;  %v1487_v63 = vld [vmem:[%s1794_s1 + $0x518] sm:$0xff] }
  0x4b   :  { %866 = vset.pattern.permute.xlu2 %v867_v5  ;;  %557 = vmatpush.msrb.mxu1 %v188_v0  ;;  %v29_v5 = vld [vmem:[%s1795_s0 + $0x78] sm:$0xff] }
  0x4c   :  { %599 = vmatpush.msrb.mxu2 %v203_v1  ;;  %632 = vmatpush.msra.mxu3 %v227_v2  ;;  %v1492_v0 = vld [vmem:[%s1794_s1 + $0x4d8] sm:$0xff]  ;;  %v215_v2 = vld [vmem:[%s1794_s1 + $0x388] sm:$0xff] }
  0x4d   :  { %672 = vmatpush.msra.mxu0 %v244_v3  ;;  %415 = vmatmul.f32.gmra.mxu1 %v70_v4  ;;  %v233_v1 = vld [vmem:[%s1794_s1 + $0x418] sm:$0xff]  ;;  %v30_v3 = vld [vmem:[%s1795_s0 + $0x80] sm:$0xff]  ;;  %v72_v4 = vld [vmem:[%s1795_s0 + $0x1d0] sm:$0xff] }
  0x4e   :  { %300 = vperm.xlu2 %866, %v274_v6   ;;  %456 = vmatmul.f32.gmra.mxu2 %v71_v7  ;;  %v31_v6 = vld [vmem:[%s1795_s0 + $0x88] sm:$0xff]  ;;  %v73_v7 = vld [vmem:[%s1795_s0 + $0x1d8] sm:$0xff] }
  0x4f   :  { %485 = vmatmul.f32.gmra.mxu3 %v28_v8  ;;  %526 = vmatmul.f32.gmra.mxu0 %v29_v5  ;;  %v256_v8 = vld [vmem:[%s1794_s1 + $0x4d0] sm:$0xff] }
  0x50   :  { %558 = vmatpush.msrb.mxu1 %v187_v9  ;;  %315 = vperm.xlu1 %865, %v277_v10   ;;  %v232_v5 = vld [vmem:[%s1794_s1 + $0x410] sm:$0xff]  ;;  %v214_v9 = vld [vmem:[%s1794_s1 + $0x380] sm:$0xff]  ;;  %v255_v10 = vld [vmem:[%s1794_s1 + $0x4c8] sm:$0xff] }
  0x51   :  { %600 = vmatpush.msrb.mxu2 %v202_v11  ;;  %633 = vmatpush.msra.mxu3 %v226_v12  ;;  %v231_v11 = vld [vmem:[%s1794_s1 + $0x408] sm:$0xff]  ;;  %v264_v12 = vld [vmem:[%s1794_s1 + $0x510] sm:$0xff] }
  0x52   :  { %673 = vmatpush.msra.mxu0 %v243_v13  ;;  %559 = vmatpush.msrb.mxu1 %v186_v14  ;;  %v1536_v13 = vld [vmem:[%s1794_s1 + $0x4c0] sm:$0xff] }
  0x53   :  { %601 = vmatpush.msrb.mxu2 %v201_v15  ;;  %634 = vmatpush.msra.mxu3 %v225_v16  ;;  %v230_v14 = vld [vmem:[%s1794_s1 + $0x400] sm:$0xff]  ;;  %v41_v15 = vld [vmem:[%s1795_s0 + $0xd8] sm:$0xff]  ;;  %v83_v16 = vld [vmem:[%s1795_s0 + $0x228] sm:$0xff] }
  0x54   :  { %674 = vmatpush.msra.mxu0 %v242_v17  ;;  %560 = vmatpush.msrb.mxu1 %v185_v18  ;;  %v42_v17 = vld [vmem:[%s1795_s0 + $0xe0] sm:$0xff]  ;;  %v84_v18 = vld [vmem:[%s1795_s0 + $0x230] sm:$0xff] }
  0x55   :  { %602 = vmatpush.msrb.mxu2 %v200_v19  ;;  %418 = vmatmul.f32.gmra.mxu1 %v81_v20  ;;  %v253_v19 = vld [vmem:[%s1794_s1 + $0x4b8] sm:$0xff]  ;;  %v252_v20 = vld [vmem:[%s1794_s1 + $0x4b0] sm:$0xff] }
  0x56   :  { %305 = vperm.xlu2 %866, %v275_v21   ;;  %459 = vmatmul.f32.gmra.mxu2 %v82_v22  ;;  %v263_v21 = vld [vmem:[%s1794_s1 + $0x508] sm:$0xff] }
  0x57   :  { %488 = vmatmul.f32.gmra.mxu3 %v39_v23  ;;  %529 = vmatmul.f32.gmra.mxu0 %v40_v24  ;;  %v251_v22 = vld [vmem:[%s1794_s1 + $0x4a8] sm:$0xff]  ;;  %v52_v23 = vld [vmem:[%s1795_s0 + $0x130] sm:$0xff]  ;;  %v94_v24 = vld [vmem:[%s1795_s0 + $0x280] sm:$0xff] }
  0x58   :  { %635 = vmatpush.msra.mxu3 %v224_v25  ;;  %675 = vmatpush.msra.mxu0 %v241_v26  ;;  %v53_v25 = vld [vmem:[%s1795_s0 + $0x138] sm:$0xff]  ;;  %v95_v26 = vld [vmem:[%s1795_s0 + $0x288] sm:$0xff] }
  0x59   :  { %561 = vmatpush.msrb.mxu1 %v184_v27  ;;  %603 = vmatpush.msrb.mxu2 %v199_v28  ;;  %v250_v27 = vld [vmem:[%s1794_s1 + $0x4a0] sm:$0xff]  ;;  %v249_v28 = vld [vmem:[%s1794_s1 + $0x498] sm:$0xff] }
  0x5a   :  { %636 = vmatpush.msra.mxu3 %v223_v29  ;;  %676 = vmatpush.msra.mxu0 %v240_v30  ;;  %v262_v29 = vld [vmem:[%s1794_s1 + $0x500] sm:$0xff]  ;;  %v248_v30 = vld [vmem:[%s1794_s1 + $0x490] sm:$0xff] }
  0x5b   :  { %562 = vmatpush.msrb.mxu1 %v183_v31  ;;  %604 = vmatpush.msrb.mxu2 %v198_v32  ;;  %v63_v31 = vld [vmem:[%s1795_s0 + $0x188] sm:$0xff]  ;;  %v64_v32 = vld [vmem:[%s1795_s0 + $0x190] sm:$0xff] }
  0x5c   :  { %637 = vmatpush.msra.mxu3 %v222_v33  ;;  %677 = vmatpush.msra.mxu0 %v239_v34  ;;  %v21_v33 = vld [vmem:[%s1795_s0 + $0x38] sm:$0xff]  ;;  %v22_v34 = vld [vmem:[%s1795_s0 + $0x40] sm:$0xff] }
  0x5d   :  { %563 = vmatpush.msrb.mxu1 %v182_v35  ;;  %761 = vmatpush.msra.mxu2 %v1398_v41  ;;  %v247_v35 = vld [vmem:[%s1794_s1 + $0x488] sm:$0xff] }
  0x5e   :  { %421 = vmatmul.f32.gmra.mxu1 %v92_v36  ;;  %638 = vmatpush.msra.mxu3 %v221_v37  ;;  %v246_v36 = vld [vmem:[%s1794_s1 + $0x480] sm:$0xff] }
  0x5f   :  { %462 = vmatmul.f32.gmra.mxu2 %v93_v38  ;;  %491 = vmatmul.f32.gmra.mxu3 %v50_v39  ;;  %v74_v37 = vld [vmem:[%s1795_s0 + $0x1e0] sm:$0xff]  ;;  %v75_v38 = vld [vmem:[%s1795_s0 + $0x1e8] sm:$0xff]  ;;  %v32_v39 = vld [vmem:[%s1795_s0 + $0x90] sm:$0xff] }
  0x60   :  { %532 = vmatmul.f32.gmra.mxu0 %v51_v40  ;;  %639 = vmatpush.msra.mxu3 %v220_v43  ;;  %v33_v40 = vld [vmem:[%s1795_s0 + $0x98] sm:$0xff]  ;;  %v43_v43 = vld [vmem:[%s1795_s0 + $0xe8] sm:$0xff] }
  0x61   :  { %678 = vmatpush.msra.mxu0 %v238_v42  ;;  %839 = vmatpush.msra.mxu1 %v1409_v44  ;;  %v86_v42 = vld [vmem:[%s1795_s0 + $0x240] sm:$0xff] }
  0x62   :  { %762 = vmatpush.msra.mxu2 %v1414_v45  ;;  %640 = vmatpush.msra.mxu3 %v219_v47  ;;  %v54_v47 = vld [vmem:[%s1795_s0 + $0x140] sm:$0xff] }
  0x63   :  { %679 = vmatpush.msra.mxu0 %v237_v46  ;;  %840 = vmatpush.msra.mxu1 %v1426_v48  ;;  %v97_v46 = vld [vmem:[%s1795_s0 + $0x298] sm:$0xff] }
  0x64   :  { %763 = vmatpush.msra.mxu2 %v1431_v49  ;;  %641 = vmatpush.msra.mxu3 %v218_v51 }
  0x65   :  { %680 = vmatpush.msra.mxu0 %v236_v50  ;;  %841 = vmatpush.msra.mxu1 %v1463_v57 }
  0x66   :  { %564 = vmatmul.f32.vlgmr.msrb.gmra.mxu1 %v19_v52  ;;  %764 = vmatpush.msra.mxu2 %v1447_v53  ;;  %v45_v52 = vld [vmem:[%s1795_s0 + $0xf8] sm:$0xff] }
  0x67   :  { %494 = vmatmul.f32.gmra.mxu3 %v61_v54  ;;  %605 = vmatmul.f32.vlgmr.msrb.gmra.mxu2 %v20_v55  ;;  %v65_v54 = vld [vmem:[%s1795_s0 + $0x198] sm:$0xff]  ;;  %v24_v55 = vld [vmem:[%s1795_s0 + $0x50] sm:$0xff] }
  0x68   :  { %535 = vmatmul.f32.gmra.mxu0 %v62_v56  ;;  %642 = vmatpush.msra.mxu3 %v217_v59  ;;  %v66_v56 = vld [vmem:[%s1795_s0 + $0x1a0] sm:$0xff] }
  0x69   :  { %681 = vmatpush.msra.mxu0 %v235_v58  ;;  %842 = vmatpush.msra.mxu1 %v1475_v60 }
  0x6a   :  { %765 = vmatpush.msra.mxu2 %v1487_v63  ;;  %643 = vmatpush.msra.mxu3 %v216_v62 }
  0x6b   :  { %682 = vmatpush.msra.mxu0 %v234_v61  ;;  %843 = vmatpush.msra.mxu1 %v1492_v0 }
  0x6c   :  { %644 = vmatpush.msra.mxu3 %v215_v2  ;;  %766 = vmatpush.msra.mxu2 %v264_v12  ;;  %v76_v2 = vld [vmem:[%s1795_s0 + $0x1f0] sm:$0xff] }
  0x6d   :  { %683 = vmatpush.msra.mxu0 %v233_v1  ;;  %844 = vmatpush.msra.mxu1 %v256_v8 }
  0x6e   :  { %567 = vmatmul.f32.gmra.mxu1 %v30_v3  ;;  %645 = vmatpush.msra.mxu3 %v214_v9  ;;  %v35_v3 = vld [vmem:[%s1795_s0 + $0xa8] sm:$0xff] }
  0x6f   :  { %497 = vmatmul.f32.gmra.mxu3 %v72_v4  ;;  %608 = vmatmul.f32.gmra.mxu2 %v31_v6  ;;  %v77_v4 = vld [vmem:[%s1795_s0 + $0x1f8] sm:$0xff] }
  0x70   :  { %538 = vmatmul.f32.gmra.mxu0 %v73_v7  ;;  %845 = vmatpush.msra.mxu1 %v255_v10 }
  0x71   :  { %684 = vmatpush.msra.mxu0 %v232_v5  ;;  %855 = vmatpush.msrb.mxu3 %v1398_v41  ;;  %v85_v41 = vld [vmem:[%s1795_s0 + $0x238] sm:$0xff] }
  0x72   :  { %846 = vmatpush.msra.mxu1 %v1536_v13  ;;  %767 = vmatpush.msra.mxu2 %v263_v21 }
  0x73   :  { %685 = vmatpush.msra.mxu0 %v231_v11  ;;  %856 = vmatpush.msrb.mxu3 %v1414_v45  ;;  %v96_v45 = vld [vmem:[%s1795_s0 + $0x290] sm:$0xff] }
  0x74   :  { %847 = vmatpush.msra.mxu1 %v253_v19  ;;  %768 = vmatpush.msra.mxu2 %v262_v29 }
  0x75   :  { %686 = vmatpush.msra.mxu0 %v230_v14  ;;  %857 = vmatpush.msrb.mxu3 %v1431_v49  ;;  %v87_v14 = vld [vmem:[%s1795_s0 + $0x248] sm:$0xff] }
  0x76   :  { %570 = vmatmul.f32.gmra.mxu1 %v41_v15  ;;  %v46_v15 = vld [vmem:[%s1795_s0 + $0x100] sm:$0xff] }
  0x77   :  { %712 = vmatpush.msrb.mxu0 %v1409_v44  ;;  %500 = vmatmul.f32.gmra.mxu3 %v83_v16  ;;  %v44_v44 = vld [vmem:[%s1795_s0 + $0xf0] sm:$0xff] }
  0x78   :  { %611 = vmatmul.f32.gmra.mxu2 %v42_v17  ;;  %541 = vmatmul.f32.gmra.mxu0 %v84_v18  ;;  %v88_v17 = vld [vmem:[%s1795_s0 + $0x250] sm:$0xff] }
  0x79   :  { %713 = vmatpush.msrb.mxu0 %v1426_v48  ;;  %848 = vmatpush.msra.mxu1 %v252_v20  ;;  %v55_v48 = vld [vmem:[%s1795_s0 + $0x148] sm:$0xff] }
  0x7a   :  { %858 = vmatpush.msrb.mxu3 %v1447_v53 }
  0x7b   :  { %714 = vmatpush.msrb.mxu0 %v1463_v57  ;;  %849 = vmatpush.msra.mxu1 %v251_v22 }
  0x7c   :  { %859 = vmatpush.msrb.mxu3 %v1487_v63 }
  0x7d   :  { %715 = vmatpush.msrb.mxu0 %v1475_v60  ;;  %850 = vmatpush.msra.mxu1 %v250_v27 }
  0x7e   :  { %573 = vmatmul.f32.gmra.mxu1 %v52_v23  ;;  %860 = vmatpush.msrb.mxu3 %v264_v12 }
  0x7f   :  { %503 = vmatmul.f32.gmra.mxu3 %v94_v24  ;;  %716 = vmatpush.msrb.mxu0 %v1492_v0  ;;  %v56_v0 = vld [vmem:[%s1795_s0 + $0x150] sm:$0xff]  ;;  %v78_v24 = vld [vmem:[%s1795_s0 + $0x200] sm:$0xff] }
  0x80   :  { %614 = vmatmul.f32.gmra.mxu2 %v53_v25  ;;  %544 = vmatmul.f32.gmra.mxu0 %v95_v26  ;;  %v98_v26 = vld [vmem:[%s1795_s0 + $0x2a0] sm:$0xff] }
  0x81   :  { %851 = vmatpush.msra.mxu1 %v249_v28  ;;  %717 = vmatpush.msrb.mxu0 %v256_v8 }
  0x82   :  { %861 = vmatpush.msrb.mxu3 %v263_v21 }
  0x83   :  { %852 = vmatpush.msra.mxu1 %v248_v30  ;;  %718 = vmatpush.msrb.mxu0 %v255_v10 }
  0x84   :  { %862 = vmatpush.msrb.mxu3 %v262_v29  ;;  %v99_v29 = vld [vmem:[%s1795_s0 + $0x2a8] sm:$0xff] }
  0x85   :  { %853 = vmatpush.msra.mxu1 %v247_v35  ;;  %719 = vmatpush.msrb.mxu0 %v1536_v13  ;;  %v67_v13 = vld [vmem:[%s1795_s0 + $0x1a8] sm:$0xff] }
  0x86   :  { %576 = vmatmul.f32.gmra.mxu1 %v63_v31 }
  0x87   :  { %646 = vmatmul.f32.vlgmr.msra.gmra.mxu3 %v21_v33  ;;  %854 = vmatpush.msra.mxu1 %v246_v36 }
  0x88   :  { %617 = vmatmul.f32.gmra.mxu2 %v64_v32  ;;  %687 = vmatmul.f32.vlgmr.msra.gmra.mxu0 %v22_v34 }
  0x89   :  { %720 = vmatpush.msrb.mxu0 %v253_v19 }
  0x8b   :  { %721 = vmatpush.msrb.mxu0 %v252_v20 }
  0x8d   :  { %722 = vmatpush.msrb.mxu0 %v251_v22 }
  0x8e   :  { %579 = vmatmul.f32.gmra.mxu1 %v74_v37 }
  0x8f   :  { %649 = vmatmul.f32.gmra.mxu3 %v32_v39  ;;  %723 = vmatpush.msrb.mxu0 %v250_v27  ;;  %v57_v27 = vld [vmem:[%s1795_s0 + $0x158] sm:$0xff]  ;;  %v90_v39 = vld [vmem:[%s1795_s0 + $0x260] sm:$0xff] }
  0x90   :  { %620 = vmatmul.f32.gmra.mxu2 %v75_v38  ;;  %690 = vmatmul.f32.gmra.mxu0 %v33_v40  ;;  %v68_v38 = vld [vmem:[%s1795_s0 + $0x1b0] sm:$0xff] }
  0x91   :  { %724 = vmatpush.msrb.mxu0 %v249_v28 }
  0x93   :  { %725 = vmatpush.msrb.mxu0 %v248_v30 }
  0x95   :  { %726 = vmatpush.msrb.mxu0 %v247_v35 }
  0x96   :  { %582 = vmatmul.f32.gmra.mxu1 %v85_v41  ;;  %v23_v41 = vld [vmem:[%s1795_s0 + $0x48] sm:$0xff] }
  0x97   :  { %652 = vmatmul.f32.gmra.mxu3 %v43_v43  ;;  %727 = vmatpush.msrb.mxu0 %v246_v36  ;;  %v89_v36 = vld [vmem:[%s1795_s0 + $0x258] sm:$0xff] }
  0x98   :  { %623 = vmatmul.f32.gmra.mxu2 %v86_v42  ;;  %693 = vmatmul.f32.gmra.mxu0 %v44_v44 }
  0x9e   :  { %585 = vmatmul.f32.gmra.mxu1 %v96_v45 }
  0x9f   :  { %655 = vmatmul.f32.gmra.mxu3 %v54_v47  ;;  %v360_v49 = vpop.f32.mrf.mxu0 }
  0xa0   :  { %626 = vmatmul.f32.gmra.mxu2 %v97_v46  ;;  %696 = vmatmul.f32.gmra.mxu0 %v55_v48  ;;  %v401_v50 = vpop.f32.mrf.mxu1 }
  0xa2   :  { %v281_v51 = vpop.permute.xlu0 %280 }
  0xa3   :  { %v361_v53 = vadd.f32 %v360_v49, %v281_v51  ;;  %v100_v49 = vld [vmem:[%s1795_s0 + $0x2b0] sm:$0xff]  ;;  %v79_v51 = vld [vmem:[%s1795_s0 + $0x208] sm:$0xff] }
  0xa5   :  { %v402_v58 = vadd.f32 %v401_v50, %v361_v53 }
  0xa6   :  { %734 = vmatmul.f32.vlgmr.msra.gmra.mxu1 %v45_v52  ;;  %v372_v57 = vpop.f32.mrf.mxu3  ;;  %v101_v52 = vld [vmem:[%s1795_s0 + $0x2b8] sm:$0xff] }
  0xa7   :  { %658 = vmatmul.f32.gmra.mxu3 %v65_v54  ;;  %v442_v59 = vpop.f32.mrf.mxu2  ;;  %v34_v54 = vld [vmem:[%s1795_s0 + $0xa0] sm:$0xff] }
  0xa8   :  { %815 = vmatmul.msk.f32.vlgmr.msra.gmra.mxu2 %vm318_vm0, %v24_v55  ;;  %699 = vmatmul.f32.gmra.mxu0 %v66_v56  ;;  %v1668_v60 = vadd.f32 %v442_v59, %v402_v58  ;;  %v363_v61 = vpop.f32.mrf.mxu0  ;;  %v301_v28 = vpop.permute.xlu2 %300 }
  0xa9   :  { %v404_v62 = vpop.f32.mrf.mxu1  ;;  %v373_v33 = vadd.f32 %v372_v57, %v301_v28 }
  0xab   :  { %v286_v63 = vpop.permute.xlu0 %285 }
  0xac   :  { %v364_v1 = vadd.f32 %v363_v61, %v286_v63 }
  0xae   :  { %737 = vmatmul.f32.gmra.mxu1 %v56_v0  ;;  %v405_v6 = vadd.f32 %v404_v62, %v364_v1  ;;  %v375_v7 = vpop.f32.mrf.mxu3 }
  0xaf   :  { %661 = vmatmul.f32.gmra.mxu3 %v76_v2 }
  0xb0   :  { %816 = vmatmul.msk.f32.gmra.mxu2 %vm318_vm0, %v35_v3  ;;  %702 = vmatmul.f32.gmra.mxu0 %v77_v4  ;;  %v445_v8 = vpop.f32.mrf.mxu2  ;;  %v366_v9 = vpop.f32.mrf.mxu0 }
  0xb1   :  { %v1683_v5 = vadd.f32 %v445_v8, %v405_v6  ;;  %v291_v10 = vpop.permute.xlu1 %290  ;;  %v306_v42 = vpop.permute.xlu2 %305 }
  0xb2   :  { %v407_v11 = vpop.f32.mrf.mxu1  ;;  %v367_v12 = vadd.f32 %v366_v9, %v291_v10  ;;  %v376_v43 = vadd.f32 %v375_v7, %v306_v42 }
  0xb4   :  { %v408_v16 = vadd.f32 %v407_v11, %v367_v12 }
  0xb6   :  { %740 = vmatmul.f32.gmra.mxu1 %v67_v13 }
  0xb7   :  { %664 = vmatmul.f32.gmra.mxu3 %v87_v14  ;;  %v378_v18 = vpop.f32.mrf.mxu3  ;;  %v311_v56 = vpop.permute.xlu0 %310 }
  0xb8   :  { %817 = vmatmul.msk.f32.gmra.mxu2 %vm318_vm0, %v46_v15  ;;  %705 = vmatmul.f32.gmra.mxu0 %v88_v17  ;;  %v448_v19 = vpop.f32.mrf.mxu2  ;;  %v369_v21 = vpop.f32.mrf.mxu0  ;;  %v379_v57 = vadd.f32 %v378_v18, %v311_v56 }
  0xb9   :  { %v1698_v20 = vadd.f32 %v448_v19, %v408_v16 }
  0xba   :  { %v296_v22 = vpop.permute.xlu1 %295  ;;  %v410_v23 = vpop.f32.mrf.mxu1 }
  0xbb   :  { %v370_v25 = vadd.f32 %v369_v21, %v296_v22 }
  0xbd   :  { %v411_v30 = vadd.f32 %v410_v23, %v370_v25 }
  0xbe   :  { %743 = vmatmul.f32.gmra.mxu1 %v78_v24 }
  0xbf   :  { %667 = vmatmul.f32.gmra.mxu3 %v98_v26 }
  0xc0   :  { %818 = vmatmul.msk.f32.gmra.mxu2 %vm318_vm0, %v57_v27  ;;  %708 = vmatmul.f32.gmra.mxu0 %v99_v29  ;;  %v381_v31 = vpop.f32.mrf.mxu3 }
  0xc1   :  { %v451_v32 = vpop.f32.mrf.mxu2 }
  0xc2   :  { %v452_v34 = vadd.f32 %v451_v32, %v411_v30  ;;  %v413_v35 = vpop.f32.mrf.mxu1  ;;  %v316_v2 = vpop.permute.xlu1 %315 }
  0xc3   :  { %v414_v37 = vadd.f32 %v413_v35, %v373_v33  ;;  %v382_v3 = vadd.f32 %v381_v31, %v316_v2 }
  0xc4   :  { %v524_v40 = vpop.f32.mrf.mxu0 }
  0xc6   :  { %746 = vmatmul.f32.gmra.mxu1 %v89_v36 }
  0xc7   :  { %821 = vmatmul.msk.f32.vlgmr.msrb.gmra.mxu3 %vm318_vm0, %v90_v39 }
  0xc8   :  { %819 = vmatmul.msk.f32.gmra.mxu2 %vm318_vm0, %v68_v38  ;;  %728 = vmatmul.f32.vlgmr.msrb.gmra.mxu0 %v23_v41 }
  0xc9   :  { %v454_v44 = vpop.f32.mrf.mxu2 }
  0xca   :  { %v483_v45 = vpop.f32.mrf.mxu3  ;;  %v455_v46 = vadd.f32 %v454_v44, %v414_v37  ;;  %v416_v48 = vpop.f32.mrf.mxu1 }
  0xcb   :  { %v484_v47 = vadd.f32 %v483_v45, %v1668_v60  ;;  %v417_v50 = vadd.f32 %v416_v48, %v376_v43 }
  0xcc   :  { %v527_v53 = vpop.f32.mrf.mxu0 }
  0xcd   :  { %v525_v55 = vadd.f32 %v524_v40, %v484_v47 }
  0xce   :  { %749 = vmatmul.f32.gmra.mxu1 %v100_v49 }
  0xcf   :  { %822 = vmatmul.msk.f32.gmra.mxu3 %vm318_vm0, %v101_v52 }
  0xd0   :  { %820 = vmatmul.msk.f32.gmra.mxu2 %vm318_vm0, %v79_v51  ;;  %731 = vmatmul.f32.gmra.mxu0 %v34_v54 }
  0xd1   :  { %v457_v58 = vpop.f32.mrf.mxu2 }
  0xd2   :  { %v486_v59 = vpop.f32.mrf.mxu3  ;;  %v458_v60 = vadd.f32 %v457_v58, %v417_v50  ;;  %v419_v62 = vpop.f32.mrf.mxu1 }
  0xd3   :  { %v487_v61 = vadd.f32 %v486_v59, %v1683_v5  ;;  %v420_v63 = vadd.f32 %v419_v62, %v379_v57 }
  0xd4   :  { %v530_v0 = vpop.f32.mrf.mxu0 }
  0xd5   :  { %v528_v1 = vadd.f32 %v527_v53, %v487_v61 }
  0xd9   :  { %v460_v4 = vpop.f32.mrf.mxu2 }
  0xda   :  { %v489_v6 = vpop.f32.mrf.mxu3  ;;  %v461_v7 = vadd.f32 %v460_v4, %v420_v63 }
  0xdb   :  { %v490_v8 = vadd.f32 %v489_v6, %v1698_v20  ;;  %v422_v9 = vpop.f32.mrf.mxu1 }
  0xdc   :  { %v423_v10 = vadd.f32 %v422_v9, %v382_v3 }
  0xdd   :  { %v533_v11 = vpop.f32.mrf.mxu0  ;;  %v531_v12 = vadd.f32 %v530_v0, %v490_v8 }
  0xe2   :  { %v463_v13 = vpop.f32.mrf.mxu2  ;;  %v492_v14 = vpop.f32.mrf.mxu3 }
  0xe3   :  { %v464_v15 = vadd.f32 %v463_v13, %v423_v10  ;;  %v493_v16 = vadd.f32 %v492_v14, %v452_v34  ;;  %v565_v5 = vpop.f32.mrf.mxu1 }
  0xe4   :  { %v566_v17 = vadd.f32 %v565_v5, %v525_v55 }
  0xe5   :  { %v536_v18 = vpop.f32.mrf.mxu0  ;;  %v534_v19 = vadd.f32 %v533_v11, %v493_v16 }
  0xea   :  { %v495_v21 = vpop.f32.mrf.mxu3  ;;  %v606_v22 = vpop.f32.mrf.mxu2 }
  0xeb   :  { %v496_v23 = vadd.f32 %v495_v21, %v455_v46  ;;  %v1744_v24 = vadd.f32 %v606_v22, %v566_v17  ;;  %v568_v25 = vpop.f32.mrf.mxu1 }
  0xec   :  { %v569_v26 = vadd.f32 %v568_v25, %v528_v1 }
  0xed   :  { %v539_v20 = vpop.f32.mrf.mxu0  ;;  %v537_v27 = vadd.f32 %v536_v18, %v496_v23 }
  0xf2   :  { %v498_v28 = vpop.f32.mrf.mxu3  ;;  %v609_v29 = vpop.f32.mrf.mxu2 }
  0xf3   :  { %v499_v30 = vadd.f32 %v498_v28, %v458_v60  ;;  %v1746_v31 = vadd.f32 %v609_v29, %v569_v26  ;;  %v571_v32 = vpop.f32.mrf.mxu1 }
  0xf4   :  { %v572_v3 = vadd.f32 %v571_v32, %v531_v12 }
  0xf5   :  { %v542_v33 = vpop.f32.mrf.mxu0  ;;  %v1748_v34 = vadd.f32 %v539_v20, %v499_v30 }
  0xfa   :  { %v501_v35 = vpop.f32.mrf.mxu3 }
  0xfb   :  { %v612_v36 = vpop.f32.mrf.mxu2  ;;  %v502_v37 = vadd.f32 %v501_v35, %v461_v7  ;;  %v574_v38 = vpop.f32.mrf.mxu1 }
  0xfc   :  { %v613_v4 = vadd.f32 %v612_v36, %v572_v3  ;;  %v575_v11 = vadd.f32 %v574_v38, %v534_v19 }
  0xfd   :  { %v545_v39 = vpop.f32.mrf.mxu0  ;;  %v543_v40 = vadd.f32 %v542_v33, %v502_v37 }
 0x102   :  { %v504_v41 = vpop.f32.mrf.mxu3 }
 0x103   :  { %v615_v42 = vpop.f32.mrf.mxu2  ;;  %v505_v43 = vadd.f32 %v504_v41, %v464_v15  ;;  %v577_v44 = vpop.f32.mrf.mxu1 }
 0x104   :  { %v616_v14 = vadd.f32 %v615_v42, %v575_v11  ;;  %v578_v12 = vadd.f32 %v577_v44, %v537_v27 }
 0x105   :  { %v688_v45 = vpop.f32.mrf.mxu0  ;;  %v546_v46 = vadd.f32 %v545_v39, %v505_v43 }
 0x10a   :  { %v647_v48 = vpop.f32.mrf.mxu3 }
 0x10b   :  { %v618_v47 = vpop.f32.mrf.mxu2  ;;  %v580_v49 = vpop.f32.mrf.mxu1  ;;  %v648_v19 = vadd.f32 %v647_v48, %v1744_v24 }
 0x10c   :  { %v619_v20 = vadd.f32 %v618_v47, %v578_v12  ;;  %v581_v41 = vadd.f32 %v580_v49, %v1748_v34 }
 0x10d   :  { %v1750_v50 = vpop.f32.mrf.mxu0  ;;  %v689_v37 = vadd.f32 %v688_v45, %v648_v19 }
 0x112   :  { %v650_v52 = vpop.f32.mrf.mxu3 }
 0x113   :  { %v621_v51 = vpop.f32.mrf.mxu2  ;;  %v583_v53 = vpop.f32.mrf.mxu1  ;;  %v651_v44 = vadd.f32 %v650_v52, %v1746_v31 }
 0x114   :  { %v584_v25 = vadd.f32 %v583_v53, %v543_v40  ;;  %v622_v48 = vadd.f32 %v621_v51, %v581_v41 }
 0x115   :  { %v694_v54 = vpop.f32.mrf.mxu0 }
 0x11a   :  { %v653_v56 = vpop.f32.mrf.mxu3 }
 0x11b   :  { %v624_v55 = vpop.f32.mrf.mxu2  ;;  %v586_v57 = vpop.f32.mrf.mxu1  ;;  %v654_v8 = vadd.f32 %v653_v56, %v613_v4 }
 0x11c   :  { %v625_v28 = vadd.f32 %v624_v55, %v584_v25  ;;  %v587_v42 = vadd.f32 %v586_v57, %v546_v46  ;;  %v692_v57 = vadd.f32 %v1750_v50, %v651_v44 }
 0x11d   :  { %v697_v58 = vpop.f32.mrf.mxu0  ;;  %v695_v13 = vadd.f32 %v694_v54, %v654_v8 }
 0x122   :  { %v656_v60 = vpop.f32.mrf.mxu3 }
 0x123   :  { %v627_v59 = vpop.f32.mrf.mxu2  ;;  %v735_v61 = vpop.f32.mrf.mxu1  ;;  %v657_v17 = vadd.f32 %v656_v60, %v616_v14 }
 0x124   :  { %v736_v15 = vadd.f32 %v735_v61, %v695_v13  ;;  %v628_v53 = vadd.f32 %v627_v59, %v587_v42 }
 0x125   :  { %v700_v62 = vpop.f32.mrf.mxu0  ;;  %v698_v26 = vadd.f32 %v697_v58, %v657_v17 }
 0x12a   :  { %v659_v63 = vpop.f32.mrf.mxu3 }
 0x12b   :  { %v770_v0 = vpop.f32.mrf.mxu2  ;;  %v738_v1 = vpop.f32.mrf.mxu1  ;;  %v660_v33 = vadd.f32 %v659_v63, %v619_v20 }
 0x12c   :  { %v739_v29 = vadd.f32 %v738_v1, %v698_v26 }
 0x12d   :  { %v1752_v2 = vpop.f32.mrf.mxu0  ;;  %v701_v43 = vadd.f32 %v700_v62, %v660_v33 }
 0x132   :  { %v662_v6 = vpop.f32.mrf.mxu3 }
 0x133   :  { %v1754_v7 = vpop.f32.mrf.mxu2  ;;  %v741_v9 = vpop.f32.mrf.mxu1  ;;  %v663_v60 = vadd.f32 %v662_v6, %v622_v48 }
 0x134   :  { %v742_v45 = vadd.f32 %v741_v9, %v701_v43 }
 0x135   :  { %v706_v10 = vpop.f32.mrf.mxu0  ;;  %v704_v62 = vadd.f32 %v1752_v2, %v663_v60 }
 0x13a   :  { %v665_v16 = vpop.f32.mrf.mxu3 }
 0x13b   :  { %v776_v5 = vpop.f32.mrf.mxu2  ;;  %v744_v21 = vpop.f32.mrf.mxu1  ;;  %v666_v35 = vadd.f32 %v665_v16, %v625_v28 }
 0x13c   :  { %v777_v18 = vadd.f32 %v776_v5, %v736_v15 }
 0x13d   :  { %v709_v23 = vpop.f32.mrf.mxu0  ;;  %v707_v24 = vadd.f32 %v706_v10, %v666_v35 }
 0x13e   :  { %v796_v22 = vmax.f32 %v777_v18, 0.0 }
 0x140   :  { %805 = vst.msk [vmem:[%s1797_s3 + $0x10] sm:$0xff] %vm802_vm1, %v796_v22 }
 0x142   :  { %v668_v30 = vpop.f32.mrf.mxu3 }
 0x143   :  { %v779_v32 = vpop.f32.mrf.mxu2  ;;  %v747_v38 = vpop.f32.mrf.mxu1  ;;  %v669_v34 = vadd.f32 %v668_v30, %v628_v53 }
 0x144   :  { %v780_v36 = vadd.f32 %v779_v32, %v739_v29  ;;  %v748_v54 = vadd.f32 %v747_v38, %v707_v24 }
 0x145   :  { %v729_v39 = vpop.f32.mrf.mxu0  ;;  %v710_v63 = vadd.f32 %v709_v23, %v669_v34 }
 0x146   :  { %v797_v27 = vmax.f32 %v780_v36, 0.0  ;;  %v730_v40 = vadd.f32 %v729_v39, %v689_v37 }
 0x148   :  { %806 = vst.msk [vmem:[%s1797_s3 + $0x18] sm:$0xff] %vm802_vm1, %v797_v27  ;;  %v771_v47 = vadd.f32 %v770_v0, %v730_v40  ;;  %v745_v0 = vadd.f32 %v744_v21, %v704_v62 }
 0x14a   :  { %v794_v55 = vmax.f32 %v771_v47, 0.0  ;;  %v788_v58 = vpop.f32.mrf.mxu3 }
 0x14b   :  { %v782_v56 = vpop.f32.mrf.mxu2  ;;  %v789_v49 = vadd.f32 %v788_v58, %v748_v54  ;;  %v750_v61 = vpop.f32.mrf.mxu1 }
 0x14c   :  { %v783_v46 = vadd.f32 %v782_v56, %v742_v45  ;;  %803 = vst.msk [vmem:[%s1797_s3] sm:$0xff] %vm802_vm1, %v794_v55  ;;  %v751_v1 = vadd.f32 %v750_v61, %v710_v63 }
 0x14d   :  { %v800_v52 = vmax.f32 %v789_v49, 0.0  ;;  %v732_v51 = vpop.f32.mrf.mxu0 }
 0x14e   :  { %v798_v31 = vmax.f32 %v783_v46, 0.0  ;;  %v733_v59 = vadd.f32 %v732_v51, %v692_v57 }
 0x14f   :  { %809 = vst.msk [vmem:[%s1797_s3 + $0x30] sm:$0xff] %vm802_vm1, %v800_v52 }
 0x150   :  { %807 = vst.msk [vmem:[%s1797_s3 + $0x20] sm:$0xff] %vm802_vm1, %v798_v31  ;;  %v774_v50 = vadd.f32 %v1754_v7, %v733_v59 }
 0x152   :  { %v795_v3 = vmax.f32 %v774_v50, 0.0  ;;  %v791_v6 = vpop.f32.mrf.mxu3 }
 0x153   :  { %v785_v4 = vpop.f32.mrf.mxu2  ;;  %v792_v2 = vadd.f32 %v791_v6, %v751_v1 }
 0x154   :  { %v786_v8 = vadd.f32 %v785_v4, %v745_v0  ;;  %804 = vst.msk [vmem:[%s1797_s3 + $0x8] sm:$0xff] %vm802_vm1, %v795_v3 }
 0x155   :  { %v801_v10 = vmax.f32 %v792_v2, 0.0 }
 0x156   :  { %v799_v9 = vmax.f32 %v786_v8, 0.0 }
 0x157   :  { %810 = vst.msk [vmem:[%s1797_s3 + $0x38] sm:$0xff] %vm802_vm1, %v801_v10 }
 0x158   :  { %808 = vst.msk [vmem:[%s1797_s3 + $0x28] sm:$0xff] %vm802_vm1, %v799_v9 }

</bundles_post_ra>
